<compile_context>
chip_gen: v5e
topology: v5e:2x2
jax: 0.10.0
libtpu: 0.0.40
codegen_flags: <defaults>
</compile_context>

<pallas_src>
import jax
import jax.numpy as jnp
import numpy as np
from jax.experimental import pallas as pl
from jax.experimental.pallas import tpu as pltpu


_PAD_LEFT = 8  # sublane-aligned start column of the image interior inside the halo buffers


# ----------------------------- in-kernel helpers -----------------------------
def _conv3x3_relu(pad_ref, w_ref, b_ref, H, W, Cin, left):
    """3x3 conv (padding=1) + bias + ReLU on a zero-halo'd VMEM buffer.

    pad_ref : (H+2, >=left+W+1, Cin) f32, image at rows 1..H, cols left..left+W-1,
              zeros everywhere else (halo).
    w_ref   : (9*Cin, Cout) bf16, rows ordered (ky, kx, cin).
    b_ref   : (1, Cout) f32.
    Returns (H*W, Cout) f32, row index = h*W + w.
    """
    slabs = []
    for ky in range(3):
        for kx in range(3):
            c0 = left - 1 + kx
            slabs.append(pad_ref[ky:ky + H, c0:c0 + W, :].reshape(H * W, Cin))
    # im2col: one K=9*Cin MXU matmul instead of 9 K=Cin matmuls.
    patch = jnp.concatenate(slabs, axis=1).astype(w_ref.dtype)      # (H*W, 9*Cin) bf16
    acc = jnp.dot(patch, w_ref[...], preferred_element_type=jnp.float32)
    return jnp.maximum(acc + b_ref[...], 0.0)                       # bias + ReLU in f32


def _maxpool2x2(flat, H, W, C, scratch_ref):
    """2x2 / stride-2 max pool of a flattened (H*W, C) activation.

    Returns (H//2 * W//2, C), row index = (h//2)*(W//2) + (w//2).
    """
    # H-pool: rows of the h-pair land in the same outer chunk -> one vector max.
    x = flat.reshape(H // 2, 2 * W, C)                 # chunk j holds h in {2j, 2j+1}
    hp = jnp.maximum(x[:, :W, :], x[:, W:, :])         # (H//2, W, C)
    scratch_ref[...] = hp.reshape((H // 2) * W, C)     # rows = j*W + w
    # W-pool: even/odd rows via stride-2 VMEM reads + one vector max.
    n = (H // 2) * (W // 2)
    even = scratch_ref[pl.ds(0, n, 2), :]
    odd = scratch_ref[pl.ds(1, n, 2), :]
    return jnp.maximum(even, odd)                      # (n, C)


# ------------------------------ fused VGG kernel ------------------------------
def _vgg_fused_kernel(x_ref, w1_ref, b1_ref, w2_ref, b2_ref, o_ref,
                      xpad_ref, pool1_ref, ppad_ref, pool2_ref):
    H, W, Cin = x_ref.shape
    C1 = w1_ref.shape[1]
    C2 = w2_ref.shape[1]
    H2, W2 = H // 2, W // 2
    P = _PAD_LEFT

    # ---- stage 1: conv3x3 + ReLU + maxpool2x2, entirely in VMEM ----
    xpad_ref[...] = jnp.zeros_like(xpad_ref)
    xpad_ref[1:H + 1, P:P + W, :] = x_ref[...]                       # aligned interior store
    a1 = _conv3x3_relu(xpad_ref, w1_ref, b1_ref, H, W, Cin, P)       # (H*W, C1)
    p1 = _maxpool2x2(a1, H, W, C1, pool1_ref)                        # (H2*W2, C1)

    # ---- stage 2 ----
    ppad_ref[...] = jnp.zeros_like(ppad_ref)
    ppad_ref[1:H2 + 1, P:P + W2, :] = p1.reshape(H2, W2, C1)
    a2 = _conv3x3_relu(ppad_ref, w2_ref, b2_ref, H2, W2, C1, P)      # (H2*W2, C2)
    p2 = _maxpool2x2(a2, H2, W2, C2, pool2_ref)                      # (H2*W2//4, C2)

    # ---- AdaptiveAvgPool2d((1,1)): f32 accumulation, scale folded into the store ----
    s = jnp.sum(p2, axis=0, keepdims=True)                           # (1, C2) f32
    o_ref[...] = (s * (1.0 / p2.shape[0])).astype(o_ref.dtype)


# --------------------------------- wrapper ------------------------------------
def vgg_forward(x_nchw, params):
    """features(x) -> AdaptiveAvgPool2d((1,1)), PyTorch semantics, NCHW in/out."""
    (w1, b1), (w2, b2) = params                   # two conv stages (fused kernel is 2-stage)
    N, Cin, H, W = x_nchw.shape
    C1 = w1.shape[-1]
    C2 = w2.shape[-1]
    assert H % 4 == 0 and W % 16 == 0, "fused kernel assumes pool/tile-friendly spatial dims"

    x = jnp.transpose(x_nchw, (0, 2, 3, 1))       # NCHW -> NHWC (one-time layout glue)
    # Weights flattened to (9*Cin, Cout) so each conv is one MXU matmul; bf16 for the MXU,
    # f32 accumulation and f32 bias/ReLU/pool (v5e-safe).
    w1f = w1.reshape(9 * Cin, C1).astype(jnp.bfloat16)
    w2f = w2.reshape(9 * C1, C2).astype(jnp.bfloat16)
    b1f = b1.reshape(1, C1).astype(jnp.float32)
    b2f = b2.reshape(1, C2).astype(jnp.float32)

    H2, W2 = H // 2, W // 2
    P = _PAD_LEFT

    out = pl.pallas_call(
        _vgg_fused_kernel,
        out_shape=jax.ShapeDtypeStruct((N, 1, C2), x.dtype),
        grid_spec=pltpu.PrefetchScalarGridSpec(
            num_scalar_prefetch=0,
            grid=(N,),
            in_specs=[
                pl.BlockSpec((None, H, W, Cin), lambda n: (n, 0, 0, 0)),
                pl.BlockSpec((9 * Cin, C1), lambda n: (0, 0)),
                pl.BlockSpec((1, C1), lambda n: (0, 0)),
                pl.BlockSpec((9 * C1, C2), lambda n: (0, 0)),
                pl.BlockSpec((1, C2), lambda n: (0, 0)),
            ],
            out_specs=pl.BlockSpec((None, 1, C2), lambda n: (n, 0, 0)),
            scratch_shapes=[
                pltpu.VMEM((H + 2, W + P + 8, Cin), jnp.float32),     # conv1 halo buffer
                pltpu.VMEM((H2 * W, C1), jnp.float32),                # pool-1 staging
                pltpu.VMEM((H2 + 2, W2 + P + 8, C1), jnp.float32),    # conv2 halo buffer
                pltpu.VMEM(((H2 // 2) * W2, C2), jnp.float32),        # pool-2 staging
            ],
        ),
        compiler_params=pltpu.CompilerParams(dimension_semantics=("parallel",)),
    )(x, w1f, b1f, w2f, b2f)
    return out.reshape(N, C2, 1, 1)               # (N, C, 1, 1), matches PyTorch


def init_params(key, cfg, in_ch):
    # Deterministic He-style init; weights in HWIO (cross-correlation, identical
    # semantics to PyTorch Conv2d which does not flip kernels).
    params = []
    for out_ch in cfg:
        key, kw, kb = jax.random.split(key, 3)
        fan_in = 9 * in_ch
        w = jax.random.normal(kw, (3, 3, in_ch, out_ch), jnp.float32) * np.sqrt(2.0 / fan_in)
        b = jax.random.normal(kb, (out_ch,), jnp.float32) * 0.01
        params.append((w, b))
        in_ch = out_ch
    return params


# ----------------------------- pure-JAX reference ------------------------------
def vgg_reference(x_nchw, params):
    x = x_nchw
    for (w, b) in params:
        w_oihw = jnp.transpose(w, (3, 2, 0, 1))
        x = jax.lax.conv_general_dilated(
            x, w_oihw, window_strides=(1, 1), padding="SAME",
            dimension_numbers=("NCHW", "OIHW", "NCHW"))
        x = jax.nn.relu(x + b[None, :, None, None])
        x = jax.lax.reduce_window(x, -jnp.inf, jax.lax.max,
                                  (1, 1, 2, 2), (1, 1, 2, 2), "VALID")
    return jnp.mean(x, axis=(2, 3), keepdims=True)


if __name__ == "__main__":
    key = jax.random.PRNGKey(0)
    key, kx = jax.random.split(key)
    # Small input consistent with VGG's NCHW RGB images: (batch=2, C=3, 16, 16)
    x = jax.random.normal(kx, (2, 3, 16, 16), jnp.float32)
    params = init_params(key, cfg=[8, 16], in_ch=3)

    out = jax.jit(vgg_forward)(x, params)
    out = jax.block_until_ready(out)
    assert out.shape == (2, 16, 1, 1), out.shape

    ref = vgg_reference(x, params)
    np.testing.assert_allclose(np.asarray(out), np.asarray(ref), rtol=5e-2, atol=5e-2)
    print("KERNEL_OK")
</pallas_src>

<mosaic_0001>
module attributes {stable_mosaic.version = 11 : i64} {
  func.func @_vgg_fused_kernel(%arg0: i32, %arg1: memref<1x16x16x3xf32, #tpu.memory_space<vmem>>, %arg2: memref<27x8xbf16, #tpu.memory_space<vmem>>, %arg3: memref<1x8xf32, #tpu.memory_space<vmem>>, %arg4: memref<72x16xbf16, #tpu.memory_space<vmem>>, %arg5: memref<1x16xf32, #tpu.memory_space<vmem>>, %arg6: memref<1x1x16xf32, #tpu.memory_space<vmem>>, %arg7: memref<18x32x3xf32, #tpu.memory_space<vmem>>, %arg8: memref<128x8xf32, #tpu.memory_space<vmem>>, %arg9: memref<10x24x8xf32, #tpu.memory_space<vmem>>, %arg10: memref<32x16xf32, #tpu.memory_space<vmem>>) attributes {dimension_semantics = [#tpu.dimension_semantics<parallel>], iteration_bounds = array<i64: 2>, scalar_prefetch = 0 : i64, scratch_operands = 4 : i64, tpu.core_type = #tpu.core_type<tc>, window_params = [{transform_indices = @transform_0, window_bounds = array<i64: 1, 16, 16, 3>}, {pipeline_mode = #tpu.pipeline_mode<synchronous>, transform_indices = @transform_1, window_bounds = array<i64: 27, 8>}, {pipeline_mode = #tpu.pipeline_mode<synchronous>, transform_indices = @transform_2, window_bounds = array<i64: 1, 8>}, {pipeline_mode = #tpu.pipeline_mode<synchronous>, transform_indices = @transform_3, window_bounds = array<i64: 72, 16>}, {pipeline_mode = #tpu.pipeline_mode<synchronous>, transform_indices = @transform_4, window_bounds = array<i64: 1, 16>}, {transform_indices = @transform_5, window_bounds = array<i64: 1, 1, 16>}]} {
    %cst = arith.constant 0.000000e+00 : f32
    %0 = vector.broadcast %cst : f32 to vector<18x32x3xf32>
    %c0 = arith.constant 0 : index
    %c0_0 = arith.constant 0 : index
    %c0_1 = arith.constant 0 : index
    %1 = vector.load %arg7[%c0, %c0_0, %c0_1] : memref<18x32x3xf32, #tpu.memory_space<vmem>>, vector<18x32x3xf32>
    tpu.vector_store %arg7[%c0, %c0_0, %c0_1], %0 {strides = array<i32>} : memref<18x32x3xf32, #tpu.memory_space<vmem>>, vector<18x32x3xf32>,
    %c0_2 = arith.constant 0 : index
    %c0_3 = arith.constant 0 : index
    %c0_4 = arith.constant 0 : index
    %c0_5 = arith.constant 0 : index
    %2 = vector.load %arg1[%c0_2, %c0_3, %c0_4, %c0_5] : memref<1x16x16x3xf32, #tpu.memory_space<vmem>>, vector<1x16x16x3xf32>
    %3 = vector.shape_cast %2 : vector<1x16x16x3xf32> to vector<16x16x3xf32>
    %c1 = arith.constant 1 : index
    %c8 = arith.constant 8 : index
    %c0_6 = arith.constant 0 : index
    %4 = vector.load %arg7[%c1, %c8, %c0_6] : memref<18x32x3xf32, #tpu.memory_space<vmem>>, vector<16x16x3xf32>
    tpu.vector_store %arg7[%c1, %c8, %c0_6], %3 {strides = array<i32>} : memref<18x32x3xf32, #tpu.memory_space<vmem>>, vector<16x16x3xf32>,
    %c0_7 = arith.constant 0 : index
    %c7 = arith.constant 7 : index
    %c0_8 = arith.constant 0 : index
    %5 = vector.load %arg7[%c0_7, %c7, %c0_8] : memref<18x32x3xf32, #tpu.memory_space<vmem>>, vector<16x16x3xf32>
    %6 = vector.shape_cast %5 : vector<16x16x3xf32> to vector<256x3xf32>
    %c0_9 = arith.constant 0 : index
    %c8_10 = arith.constant 8 : index
    %c0_11 = arith.constant 0 : index
    %7 = vector.load %arg7[%c0_9, %c8_10, %c0_11] : memref<18x32x3xf32, #tpu.memory_space<vmem>>, vector<16x16x3xf32>
    %8 = vector.shape_cast %7 : vector<16x16x3xf32> to vector<256x3xf32>
    %c0_12 = arith.constant 0 : index
    %c9 = arith.constant 9 : index
    %c0_13 = arith.constant 0 : index
    %9 = vector.load %arg7[%c0_12, %c9, %c0_13] : memref<18x32x3xf32, #tpu.memory_space<vmem>>, vector<16x16x3xf32>
    %10 = vector.shape_cast %9 : vector<16x16x3xf32> to vector<256x3xf32>
    %c1_14 = arith.constant 1 : index
    %c7_15 = arith.constant 7 : index
    %c0_16 = arith.constant 0 : index
    %11 = vector.load %arg7[%c1_14, %c7_15, %c0_16] : memref<18x32x3xf32, #tpu.memory_space<vmem>>, vector<16x16x3xf32>
    %12 = vector.shape_cast %11 : vector<16x16x3xf32> to vector<256x3xf32>
    %c1_17 = arith.constant 1 : index
    %c8_18 = arith.constant 8 : index
    %c0_19 = arith.constant 0 : index
    %13 = vector.load %arg7[%c1_17, %c8_18, %c0_19] : memref<18x32x3xf32, #tpu.memory_space<vmem>>, vector<16x16x3xf32>
    %14 = vector.shape_cast %13 : vector<16x16x3xf32> to vector<256x3xf32>
    %c1_20 = arith.constant 1 : index
    %c9_21 = arith.constant 9 : index
    %c0_22 = arith.constant 0 : index
    %15 = vector.load %arg7[%c1_20, %c9_21, %c0_22] : memref<18x32x3xf32, #tpu.memory_space<vmem>>, vector<16x16x3xf32>
    %16 = vector.shape_cast %15 : vector<16x16x3xf32> to vector<256x3xf32>
    %c2 = arith.constant 2 : index
    %c7_23 = arith.constant 7 : index
    %c0_24 = arith.constant 0 : index
    %17 = vector.load %arg7[%c2, %c7_23, %c0_24] : memref<18x32x3xf32, #tpu.memory_space<vmem>>, vector<16x16x3xf32>
    %18 = vector.shape_cast %17 : vector<16x16x3xf32> to vector<256x3xf32>
    %c2_25 = arith.constant 2 : index
    %c8_26 = arith.constant 8 : index
    %c0_27 = arith.constant 0 : index
    %19 = vector.load %arg7[%c2_25, %c8_26, %c0_27] : memref<18x32x3xf32, #tpu.memory_space<vmem>>, vector<16x16x3xf32>
    %20 = vector.shape_cast %19 : vector<16x16x3xf32> to vector<256x3xf32>
    %c2_28 = arith.constant 2 : index
    %c9_29 = arith.constant 9 : index
    %c0_30 = arith.constant 0 : index
    %21 = vector.load %arg7[%c2_28, %c9_29, %c0_30] : memref<18x32x3xf32, #tpu.memory_space<vmem>>, vector<16x16x3xf32>
    %22 = vector.shape_cast %21 : vector<16x16x3xf32> to vector<256x3xf32>
    %23 = tpu.concatenate %6, %8, %10, %12, %14, %16, %18, %20, %22 in 1 : vector<256x3xf32>, vector<256x3xf32>, vector<256x3xf32>, vector<256x3xf32>, vector<256x3xf32>, vector<256x3xf32>, vector<256x3xf32>, vector<256x3xf32>, vector<256x3xf32> -> vector<256x27xf32>
    %24 = arith.truncf %23 : vector<256x27xf32> to vector<256x27xbf16>
    %c0_31 = arith.constant 0 : index
    %c0_32 = arith.constant 0 : index
    %25 = vector.load %arg2[%c0_31, %c0_32] : memref<27x8xbf16, #tpu.memory_space<vmem>>, vector<27x8xbf16>
    %cst_33 = arith.constant dense<0.000000e+00> : vector<256x8xf32>
    %26 = tpu.matmul %24, %25, %cst_33 {dimension_numbers = #tpu.dot_dimension_numbers<[1], [0], [0], [1], [0, 0, 1, 1], [], []>} : vector<256x27xbf16>, vector<27x8xbf16>, vector<256x8xf32> -> vector<256x8xf32>
    %c0_34 = arith.constant 0 : index
    %c0_35 = arith.constant 0 : index
    %27 = vector.load %arg3[%c0_34, %c0_35] : memref<1x8xf32, #tpu.memory_space<vmem>>, vector<1x8xf32>
    %28 = vector.broadcast %27 : vector<1x8xf32> to vector<256x8xf32>
    %29 = arith.addf %26, %28 : vector<256x8xf32>
    %cst_36 = arith.constant 0.000000e+00 : f32
    %30 = vector.broadcast %cst_36 : f32 to vector<256x8xf32>
    %31 = arith.maximumf %29, %30 : vector<256x8xf32>
    %32 = vector.shape_cast %31 : vector<256x8xf32> to vector<8x32x8xf32>
    %33 = vector.extract_strided_slice %32 {offsets = [0, 0, 0], sizes = [8, 16, 8], strides = [1, 1, 1]} : vector<8x32x8xf32> to vector<8x16x8xf32>
    %34 = vector.extract_strided_slice %32 {offsets = [0, 16, 0], sizes = [8, 16, 8], strides = [1, 1, 1]} : vector<8x32x8xf32> to vector<8x16x8xf32>
    %35 = arith.maximumf %33, %34 : vector<8x16x8xf32>
    %36 = vector.shape_cast %35 : vector<8x16x8xf32> to vector<128x8xf32>
    %c0_37 = arith.constant 0 : index
    %c0_38 = arith.constant 0 : index
    %37 = vector.load %arg8[%c0_37, %c0_38] : memref<128x8xf32, #tpu.memory_space<vmem>>, vector<128x8xf32>
    tpu.vector_store %arg8[%c0_37, %c0_38], %36 {strides = array<i32>} : memref<128x8xf32, #tpu.memory_space<vmem>>, vector<128x8xf32>,
    %c0_39 = arith.constant 0 : index
    %c0_40 = arith.constant 0 : index
    %38 = tpu.strided_load %arg8[%c0_39, %c0_40] {strides = array<i32: 2, 1>} : memref<128x8xf32, #tpu.memory_space<vmem>>, vector<64x8xf32>
    %c1_41 = arith.constant 1 : index
    %c0_42 = arith.constant 0 : index
    %39 = tpu.strided_load %arg8[%c1_41, %c0_42] {strides = array<i32: 2, 1>} : memref<128x8xf32, #tpu.memory_space<vmem>>, vector<64x8xf32>
    %40 = arith.maximumf %38, %39 : vector<64x8xf32>
    %cst_43 = arith.constant 0.000000e+00 : f32
    %41 = vector.broadcast %cst_43 : f32 to vector<10x24x8xf32>
    %c0_44 = arith.constant 0 : index
    %c0_45 = arith.constant 0 : index
    %c0_46 = arith.constant 0 : index
    %42 = vector.load %arg9[%c0_44, %c0_45, %c0_46] : memref<10x24x8xf32, #tpu.memory_space<vmem>>, vector<10x24x8xf32>
    tpu.vector_store %arg9[%c0_44, %c0_45, %c0_46], %41 {strides = array<i32>} : memref<10x24x8xf32, #tpu.memory_space<vmem>>, vector<10x24x8xf32>,
    %43 = vector.shape_cast %40 : vector<64x8xf32> to vector<8x8x8xf32>
    %c1_47 = arith.constant 1 : index
    %c8_48 = arith.constant 8 : index
    %c0_49 = arith.constant 0 : index
    %44 = vector.load %arg9[%c1_47, %c8_48, %c0_49] : memref<10x24x8xf32, #tpu.memory_space<vmem>>, vector<8x8x8xf32>
    tpu.vector_store %arg9[%c1_47, %c8_48, %c0_49], %43 {strides = array<i32>} : memref<10x24x8xf32, #tpu.memory_space<vmem>>, vector<8x8x8xf32>,
    %c0_50 = arith.constant 0 : index
    %c7_51 = arith.constant 7 : index
    %c0_52 = arith.constant 0 : index
    %45 = vector.load %arg9[%c0_50, %c7_51, %c0_52] : memref<10x24x8xf32, #tpu.memory_space<vmem>>, vector<8x8x8xf32>
    %46 = vector.shape_cast %45 : vector<8x8x8xf32> to vector<64x8xf32>
    %c0_53 = arith.constant 0 : index
    %c8_54 = arith.constant 8 : index
    %c0_55 = arith.constant 0 : index
    %47 = vector.load %arg9[%c0_53, %c8_54, %c0_55] : memref<10x24x8xf32, #tpu.memory_space<vmem>>, vector<8x8x8xf32>
    %48 = vector.shape_cast %47 : vector<8x8x8xf32> to vector<64x8xf32>
    %c0_56 = arith.constant 0 : index
    %c9_57 = arith.constant 9 : index
    %c0_58 = arith.constant 0 : index
    %49 = vector.load %arg9[%c0_56, %c9_57, %c0_58] : memref<10x24x8xf32, #tpu.memory_space<vmem>>, vector<8x8x8xf32>
    %50 = vector.shape_cast %49 : vector<8x8x8xf32> to vector<64x8xf32>
    %c1_59 = arith.constant 1 : index
    %c7_60 = arith.constant 7 : index
    %c0_61 = arith.constant 0 : index
    %51 = vector.load %arg9[%c1_59, %c7_60, %c0_61] : memref<10x24x8xf32, #tpu.memory_space<vmem>>, vector<8x8x8xf32>
    %52 = vector.shape_cast %51 : vector<8x8x8xf32> to vector<64x8xf32>
    %c1_62 = arith.constant 1 : index
    %c8_63 = arith.constant 8 : index
    %c0_64 = arith.constant 0 : index
    %53 = vector.load %arg9[%c1_62, %c8_63, %c0_64] : memref<10x24x8xf32, #tpu.memory_space<vmem>>, vector<8x8x8xf32>
    %54 = vector.shape_cast %53 : vector<8x8x8xf32> to vector<64x8xf32>
    %c1_65 = arith.constant 1 : index
    %c9_66 = arith.constant 9 : index
    %c0_67 = arith.constant 0 : index
    %55 = vector.load %arg9[%c1_65, %c9_66, %c0_67] : memref<10x24x8xf32, #tpu.memory_space<vmem>>, vector<8x8x8xf32>
    %56 = vector.shape_cast %55 : vector<8x8x8xf32> to vector<64x8xf32>
    %c2_68 = arith.constant 2 : index
    %c7_69 = arith.constant 7 : index
    %c0_70 = arith.constant 0 : index
    %57 = vector.load %arg9[%c2_68, %c7_69, %c0_70] : memref<10x24x8xf32, #tpu.memory_space<vmem>>, vector<8x8x8xf32>
    %58 = vector.shape_cast %57 : vector<8x8x8xf32> to vector<64x8xf32>
    %c2_71 = arith.constant 2 : index
    %c8_72 = arith.constant 8 : index
    %c0_73 = arith.constant 0 : index
    %59 = vector.load %arg9[%c2_71, %c8_72, %c0_73] : memref<10x24x8xf32, #tpu.memory_space<vmem>>, vector<8x8x8xf32>
    %60 = vector.shape_cast %59 : vector<8x8x8xf32> to vector<64x8xf32>
    %c2_74 = arith.constant 2 : index
    %c9_75 = arith.constant 9 : index
    %c0_76 = arith.constant 0 : index
    %61 = vector.load %arg9[%c2_74, %c9_75, %c0_76] : memref<10x24x8xf32, #tpu.memory_space<vmem>>, vector<8x8x8xf32>
    %62 = vector.shape_cast %61 : vector<8x8x8xf32> to vector<64x8xf32>
    %63 = tpu.concatenate %46, %48, %50, %52, %54, %56, %58, %60, %62 in 1 : vector<64x8xf32>, vector<64x8xf32>, vector<64x8xf32>, vector<64x8xf32>, vector<64x8xf32>, vector<64x8xf32>, vector<64x8xf32>, vector<64x8xf32>, vector<64x8xf32> -> vector<64x72xf32>
    %64 = arith.truncf %63 : vector<64x72xf32> to vector<64x72xbf16>
    %c0_77 = arith.constant 0 : index
    %c0_78 = arith.constant 0 : index
    %65 = vector.load %arg4[%c0_77, %c0_78] : memref<72x16xbf16, #tpu.memory_space<vmem>>, vector<72x16xbf16>
    %cst_79 = arith.constant dense<0.000000e+00> : vector<64x16xf32>
    %66 = tpu.matmul %64, %65, %cst_79 {dimension_numbers = #tpu.dot_dimension_numbers<[1], [0], [0], [1], [0, 0, 1, 1], [], []>} : vector<64x72xbf16>, vector<72x16xbf16>, vector<64x16xf32> -> vector<64x16xf32>
    %c0_80 = arith.constant 0 : index
    %c0_81 = arith.constant 0 : index
    %67 = vector.load %arg5[%c0_80, %c0_81] : memref<1x16xf32, #tpu.memory_space<vmem>>, vector<1x16xf32>
    %68 = vector.broadcast %67 : vector<1x16xf32> to vector<64x16xf32>
    %69 = arith.addf %66, %68 : vector<64x16xf32>
    %cst_82 = arith.constant 0.000000e+00 : f32
    %70 = vector.broadcast %cst_82 : f32 to vector<64x16xf32>
    %71 = arith.maximumf %69, %70 : vector<64x16xf32>
    %72 = vector.shape_cast %71 : vector<64x16xf32> to vector<4x16x16xf32>
    %73 = vector.extract_strided_slice %72 {offsets = [0, 0, 0], sizes = [4, 8, 16], strides = [1, 1, 1]} : vector<4x16x16xf32> to vector<4x8x16xf32>
    %74 = vector.extract_strided_slice %72 {offsets = [0, 8, 0], sizes = [4, 8, 16], strides = [1, 1, 1]} : vector<4x16x16xf32> to vector<4x8x16xf32>
    %75 = arith.maximumf %73, %74 : vector<4x8x16xf32>
    %76 = vector.shape_cast %75 : vector<4x8x16xf32> to vector<32x16xf32>
    %c0_83 = arith.constant 0 : index
    %c0_84 = arith.constant 0 : index
    %77 = vector.load %arg10[%c0_83, %c0_84] : memref<32x16xf32, #tpu.memory_space<vmem>>, vector<32x16xf32>
    tpu.vector_store %arg10[%c0_83, %c0_84], %76 {strides = array<i32>} : memref<32x16xf32, #tpu.memory_space<vmem>>, vector<32x16xf32>,
    %c0_85 = arith.constant 0 : index
    %c0_86 = arith.constant 0 : index
    %78 = tpu.strided_load %arg10[%c0_85, %c0_86] {strides = array<i32: 2, 1>} : memref<32x16xf32, #tpu.memory_space<vmem>>, vector<16x16xf32>
    %c1_87 = arith.constant 1 : index
    %c0_88 = arith.constant 0 : index
    %79 = tpu.strided_load %arg10[%c1_87, %c0_88] {strides = array<i32: 2, 1>} : memref<32x16xf32, #tpu.memory_space<vmem>>, vector<16x16xf32>
    %80 = arith.maximumf %78, %79 : vector<16x16xf32>
    %cst_89 = arith.constant dense<0.000000e+00> : vector<16xf32>
    %81 = vector.multi_reduction <add>, %80, %cst_89 [0] : vector<16x16xf32> to vector<16xf32>
    %82 = vector.shape_cast %81 : vector<16xf32> to vector<1x16xf32>
    %cst_90 = arith.constant 6.250000e-02 : f32
    %83 = vector.broadcast %cst_90 : f32 to vector<1x16xf32>
    %84 = arith.mulf %82, %83 : vector<1x16xf32>
    %c0_91 = arith.constant 0 : index
    %c0_92 = arith.constant 0 : index
    %c0_93 = arith.constant 0 : index
    %85 = vector.load %arg6[%c0_91, %c0_92, %c0_93] : memref<1x1x16xf32, #tpu.memory_space<vmem>>, vector<1x1x16xf32>
    %86 = vector.shape_cast %85 : vector<1x1x16xf32> to vector<1x16xf32>
    %87 = vector.shape_cast %84 : vector<1x16xf32> to vector<1x1x16xf32>
    tpu.vector_store %arg6[%c0_91, %c0_92, %c0_93], %87 {strides = array<i32>} : memref<1x1x16xf32, #tpu.memory_space<vmem>>, vector<1x1x16xf32>,
    return
  }
  func.func @transform_0(%arg0: i32) -> (i32, i32, i32, i32) {
    %c0_i32 = arith.constant 0 : i32
    %c0_i32_0 = arith.constant 0 : i32
    %c0_i32_1 = arith.constant 0 : i32
    %c0_i32_2 = arith.constant 0 : i32
    return %arg0, %c0_i32, %c0_i32_0, %c0_i32_1 : i32, i32, i32, i32
  }
  func.func @transform_1(%arg0: i32) -> (i32, i32) {
    %c0_i32 = arith.constant 0 : i32
    %c0_i32_0 = arith.constant 0 : i32
    %c0_i32_1 = arith.constant 0 : i32
    return %c0_i32, %c0_i32_0 : i32, i32
  }
  func.func @transform_2(%arg0: i32) -> (i32, i32) {
    %c0_i32 = arith.constant 0 : i32
    %c0_i32_0 = arith.constant 0 : i32
    %c0_i32_1 = arith.constant 0 : i32
    return %c0_i32, %c0_i32_0 : i32, i32
  }
  func.func @transform_3(%arg0: i32) -> (i32, i32) {
    %c0_i32 = arith.constant 0 : i32
    %c0_i32_0 = arith.constant 0 : i32
    %c0_i32_1 = arith.constant 0 : i32
    return %c0_i32, %c0_i32_0 : i32, i32
  }
  func.func @transform_4(%arg0: i32) -> (i32, i32) {
    %c0_i32 = arith.constant 0 : i32
    %c0_i32_0 = arith.constant 0 : i32
    %c0_i32_1 = arith.constant 0 : i32
    return %c0_i32, %c0_i32_0 : i32, i32
  }
  func.func @transform_5(%arg0: i32) -> (i32, i32, i32) {
    %c0_i32 = arith.constant 0 : i32
    %c0_i32_0 = arith.constant 0 : i32
    %c0_i32_1 = arith.constant 0 : i32
    return %arg0, %c0_i32, %c0_i32_0 : i32, i32, i32
  }
}

</mosaic_0001>

<bundles_post_ra>
// kernel: vgg_forward.1
= control target key start
LH: loop header
LB: loop body
LE: loop exit
PB: predicated region body
PF: predicated region fallthrough
CT: control target
= control target key end

     0   :  { %10 = vsyncpa [#allocation7], 0  ;;  %s5493_s0 = inlined_call_operand.vmem [shape: f32[2,16,16,3], index: 0, kind: input, shape index: {}]   ;;  %s5494_s1 = inlined_call_operand.vmem [shape: bf16[27,8], index: 1, kind: input, shape index: {}]   ;;  %s5495_s2 = inlined_call_operand.vmem [shape: f32[1,8], index: 2, kind: input, shape index: {}]   ;;  %s5496_s3 = inlined_call_operand.vmem [shape: bf16[72,16], index: 3, kind: input, shape index: {}]   ;;  %s5497_s4 = inlined_call_operand.vmem [shape: f32[1,16], index: 4, kind: input, shape index: {}]   ;;  %s5498_s5 = inlined_call_operand.hbm [shape: f32[2,1,16], index: 5, kind: output, shape index: {}]  }
   0x1   :  { %12 = vsyncpa [#allocation7 + $0x1], 0  ;;  %s3886_s18 = smov 0   ;;  %s3888_s19 = smov 0  }
   0x2   :  { %s3890_s20 = smov 0   ;;  %s3892_s21 = smov 0  }
   0x3 LB: > { %s3907_s22 = sadd.s32 4294967295, %s3837_s21   ;;  %s2854_s23 = sadd.s32 4294967294, %s3837_s21   ;;  %s3837_s21 = sphi %s3892_s21, %s5553_s21   ;;  %s3833_s20 = sphi %s3890_s20, %s5552_s20   ;;  %s3829_s19 = sphi %s3888_s19, %s5551_s19   ;;  %s3825_s18 = sphi %s3886_s18, %s5550_s18  }
   0x4   : > { %s3911_s24 = sadd.s32 1, %s3837_s21   ;;  %s135_s25 = sadd.s32 1, %s3833_s20 }
   0x5   : > { %s132_s26 = ssub.s32 %s3837_s21, %s3911_s24  ;;  %p145_p0 = scmp.ne.s32.totalorder %s3833_s20, %s3829_s19 }
   0x6   : > { %p133_p1 = scmp.eq.s32.totalorder %s132_s26, 0  ;;  %p146_p2 = scmp.eq.s32.totalorder %s3907_s22, 1 }
   0x7   : > { %p151_p3 = scmp.ne.s32.totalorder %s3829_s19, %s3825_s18  ;;  %p152_p4 = scmp.eq.s32.totalorder %s2854_s23, 1 }
   0x8   : > { %s3922_s27 = scalar_select %p133_p1, %s3833_s20, %s135_s25  }
   0x9   : > { %p3924_p5 = por %p146_p2, %p145_p0  ;;  %p3928_p6 = por %p152_p4, %p151_p3 }
   0xa   : > { %p2857_p7 = scmp.ge.s32.totalorder %s3837_s21, 1  ;;  %p190_p8 = scmp.lt.s32.totalorder %s3837_s21, 3 }
   0xc   : > { %p191_p9 = pnand %p2857_p7, %p190_p8 }
   0xe   : > { %194 = sbr.rel (%p191_p9) target bundleno = 1029 (0x405), region = 40 }
  0x13   : > { %vm223_vm0 = vcmask 23552   ;;  %v5499_v0 = vmov 0.0   ;;  %s3840_s30 = smov 3   ;;  %p217_p10 = scmp.lt.s32.totalorder %s3907_s22, 1  ;;  %vm1706_vm1 = vcmask 48128   ;;  %vm1739_vm2 = vcmask 72704  }
  0x14   : > { %225 = vst.msk [vmem:[#allocation2 + $0x8] sm:$0xff] %vm223_vm0, %v5499_v0  ;;  %s3841_s11 = smov 6   ;;  %s3842_s12 = smov 9   ;;  %vm1772_vm3 = vcmask 97280   ;;  %vm2021_vm4 = vcmask 1044480   ;;  %vm2022_vm5 = vcmask 1045504  }
  0x15   : > { %226 = vst.msk [vmem:[#allocation2 + $0x10] sm:$0xff] %vm223_vm0, %v5499_v0  ;;  %s218_s6 = scalar_select %p217_p10, %s3907_s22, 1  ;;  %vm1805_vm6 = vcmask 121856   ;;  %vm1838_vm7 = vcmask 146432   ;;  %vm1871_vm8 = vcmask 171008   ;;  %vm1904_vm9 = vcmask 195584  }
  0x16   : > { %224 = vst.msk [vmem:[#allocation2] sm:$0xff] %vm223_vm0, %v5499_v0  ;;  %s3843_s13 = smov 12   ;;  %s3844_s14 = smov 15   ;;  %vm1972_vm10 = vcmask 220160   ;;  %vm2165_vm11 = vcmask 64512   ;;  %vm2716_vm12 = vcmask 1043456  }
  0x17   : > { %227 = vst.msk [vmem:[#allocation2 + $0x18] sm:$0xff] %vm223_vm0, %v5499_v0  ;;  %s2906_s7 = sshll.u32 %s218_s6, 8  ;;  %s3845_s15 = smov 21   ;;  %vm2597_vm13 = vcmask 130048   ;;  %vm2614_vm14 = vcmask 261120   ;;  %vm2623_vm15 = vcmask 326656  }
  0x18   : > { %228 = vst.msk [vmem:[#allocation2 + $0x20] sm:$0xff] %vm223_vm0, %v5499_v0  ;;  %s4074_s10 = scalar_lea.vmem %s5493_s0, %s2906_s7  ;;  %s3846_s16 = smov 18  }
  0x19   : > { %229 = vst.msk [vmem:[#allocation2 + $0x28] sm:$0xff] %vm223_vm0, %v5499_v0  ;;  %v302_v4 = vld [vmem:[%s4074_s10 + $0x30] sm:$0xff]  ;;  %v303_v5 = vld [vmem:[%s4074_s10 + $0x38] sm:$0xff]  ;;  %v296_v8 = vld [vmem:[%s4074_s10] sm:$0xff]  ;;  %s3847_s17 = smov 24   ;;  %s3795_s8 = scalar_lea.hbm %s5498_s5, 2 }
  0x1a   : > { %230 = vst.msk [vmem:[#allocation2 + $0x30] sm:$0xff] %vm223_vm0, %v5499_v0  ;;  %v298_v6 = vld [vmem:[%s4074_s10 + $0x10] sm:$0xff]  ;;  %v299_v7 = vld [vmem:[%s4074_s10 + $0x18] sm:$0xff]  ;;  %v297_v9 = vld [vmem:[%s4074_s10 + $0x8] sm:$0xff] }
  0x1b   : > { %v393_v1 = vld [vmem:[#allocation2 + $0x8] sm:$0xff]  ;;  %231 = vst.msk [vmem:[#allocation2 + $0x38] sm:$0xff] %vm223_vm0, %v5499_v0  ;;  %v304_v10 = vld [vmem:[%s4074_s10 + $0x40] sm:$0xff]  ;;  %v306_v15 = vld [vmem:[%s4074_s10 + $0x50] sm:$0xff] }
  0x1c   : > { %v394_v2 = vld [vmem:[#allocation2 + $0x10] sm:$0xff]  ;;  %232 = vst.msk [vmem:[#allocation2 + $0x40] sm:$0xff] %vm223_vm0, %v5499_v0  ;;  %v305_v11 = vld [vmem:[%s4074_s10 + $0x48] sm:$0xff]  ;;  %v300_v12 = vld [vmem:[%s4074_s10 + $0x20] sm:$0xff] }
  0x1d   : > { %v2973_v3 = vpack.i.bf16 %v394_v2, %v393_v1  ;;  %233 = vst.msk [vmem:[#allocation2 + $0x48] sm:$0xff] %vm223_vm0, %v5499_v0  ;;  %v301_v13 = vld [vmem:[%s4074_s10 + $0x28] sm:$0xff]  ;;  %v307_v17 = vld [vmem:[%s4074_s10 + $0x58] sm:$0xff]  ;;  %v310_v20 = vld [vmem:[%s4074_s10 + $0x70] sm:$0xff] }
  0x1e   : > { %234 = vst.msk [vmem:[#allocation2 + $0x50] sm:$0xff] %vm223_vm0, %v5499_v0  ;;  %v311_v22 = vld [vmem:[%s4074_s10 + $0x78] sm:$0xff]  ;;  %v308_v25 = vld [vmem:[%s4074_s10 + $0x60] sm:$0xff]  ;;  %v309_v27 = vld [vmem:[%s4074_s10 + $0x68] sm:$0xff] }
  0x1f   : > { %2974 = vrot.lane.b32.xlu0 %v2973_v3, %s3840_s30  ;;  %235 = vst.msk [vmem:[#allocation2 + $0x58] sm:$0xff] %vm223_vm0, %v5499_v0  ;;  %v312_v30 = vld [vmem:[%s4074_s10 + $0x80] sm:$0xff]  ;;  %v313_v32 = vld [vmem:[%s4074_s10 + $0x88] sm:$0xff]  ;;  %v314_v40 = vld [vmem:[%s4074_s10 + $0x90] sm:$0xff] }
  0x20   : > { %236 = vst.msk [vmem:[#allocation2 + $0x60] sm:$0xff] %vm223_vm0, %v5499_v0  ;;  %v316_v35 = vld [vmem:[%s4074_s10 + $0xa0] sm:$0xff]  ;;  %v317_v37 = vld [vmem:[%s4074_s10 + $0xa8] sm:$0xff]  ;;  %v315_v42 = vld [vmem:[%s4074_s10 + $0x98] sm:$0xff] }
  0x21   : > { %237 = vst.msk [vmem:[#allocation2 + $0x68] sm:$0xff] %vm223_vm0, %v5499_v0  ;;  %v318_v44 = vld [vmem:[%s4074_s10 + $0xb0] sm:$0xff]  ;;  %v319_v47 = vld [vmem:[%s4074_s10 + $0xb8] sm:$0xff]  ;;  %v320_v53 = vld [vmem:[%s4074_s10 + $0xc0] sm:$0xff] }
  0x22   : > { %238 = vst.msk [vmem:[#allocation2 + $0x70] sm:$0xff] %vm223_vm0, %v5499_v0  ;;  %v322_v48 = vld [vmem:[%s4074_s10 + $0xd0] sm:$0xff]  ;;  %v323_v51 = vld [vmem:[%s4074_s10 + $0xd8] sm:$0xff]  ;;  %v321_v56 = vld [vmem:[%s4074_s10 + $0xc8] sm:$0xff] }
  0x23   : > { %239 = vst.msk [vmem:[#allocation2 + $0x78] sm:$0xff] %vm223_vm0, %v5499_v0  ;;  %v324_v58 = vld [vmem:[%s4074_s10 + $0xe0] sm:$0xff]  ;;  %v325_v59 = vld [vmem:[%s4074_s10 + $0xe8] sm:$0xff] }
  0x24   : > { %240 = vst.msk [vmem:[#allocation2 + $0x80] sm:$0xff] %vm223_vm0, %v5499_v0 }
  0x25   : > { %241 = vst.msk [vmem:[#allocation2 + $0x88] sm:$0xff] %vm223_vm0, %v5499_v0 }
  0x26   : > { %242 = vst.msk [vmem:[#allocation2 + $0x90] sm:$0xff] %vm223_vm0, %v5499_v0 }
  0x27   : > { %243 = vst.msk [vmem:[#allocation2 + $0x98] sm:$0xff] %vm223_vm0, %v5499_v0 }
  0x28   : > { %244 = vst.msk [vmem:[#allocation2 + $0xa0] sm:$0xff] %vm223_vm0, %v5499_v0 }
  0x29   : > { %245 = vst.msk [vmem:[#allocation2 + $0xa8] sm:$0xff] %vm223_vm0, %v5499_v0 }
  0x2a   : > { %246 = vst.msk [vmem:[#allocation2 + $0xb0] sm:$0xff] %vm223_vm0, %v5499_v0 }
  0x2b   : > { %247 = vst.msk [vmem:[#allocation2 + $0xb8] sm:$0xff] %vm223_vm0, %v5499_v0 }
  0x2c   : > { %248 = vst.msk [vmem:[#allocation2 + $0xc0] sm:$0xff] %vm223_vm0, %v5499_v0 }
  0x2d   : > { %249 = vst.msk [vmem:[#allocation2 + $0xc8] sm:$0xff] %vm223_vm0, %v5499_v0 }
  0x2e   : > { %250 = vst.msk [vmem:[#allocation2 + $0xd0] sm:$0xff] %vm223_vm0, %v5499_v0 }
  0x2f   : > { %251 = vst.msk [vmem:[#allocation2 + $0xd8] sm:$0xff] %vm223_vm0, %v5499_v0 }
  0x30   : > { %252 = vst.msk [vmem:[#allocation2 + $0xe0] sm:$0xff] %vm223_vm0, %v5499_v0 }
  0x31   : > { %253 = vst.msk [vmem:[#allocation2 + $0xe8] sm:$0xff] %vm223_vm0, %v5499_v0 }
  0x32   : > { %254 = vst.msk [vmem:[#allocation2 + $0xf0] sm:$0xff] %vm223_vm0, %v5499_v0 }
  0x33   : > { %255 = vst.msk [vmem:[#allocation2 + $0xf8] sm:$0xff] %vm223_vm0, %v5499_v0 }
  0x34   : > { %256 = vst.msk [vmem:[#allocation2 + $0x100] sm:$0xff] %vm223_vm0, %v5499_v0 }
  0x35   : > { %257 = vst.msk [vmem:[#allocation2 + $0x108] sm:$0xff] %vm223_vm0, %v5499_v0 }
  0x36   : > { %258 = vst.msk [vmem:[#allocation2 + $0x110] sm:$0xff] %vm223_vm0, %v5499_v0 }
  0x37   : > { %259 = vst.msk [vmem:[#allocation2 + $0x118] sm:$0xff] %vm223_vm0, %v5499_v0 }
  0x38   : > { %260 = vst.msk [vmem:[#allocation2 + $0x120] sm:$0xff] %vm223_vm0, %v5499_v0 }
  0x39   : > { %261 = vst.msk [vmem:[#allocation2 + $0x128] sm:$0xff] %vm223_vm0, %v5499_v0 }
  0x3a   : > { %262 = vst.msk [vmem:[#allocation2 + $0x130] sm:$0xff] %vm223_vm0, %v5499_v0 }
  0x3b   : > { %263 = vst.msk [vmem:[#allocation2 + $0x138] sm:$0xff] %vm223_vm0, %v5499_v0 }
  0x3c   : > { %264 = vst.msk [vmem:[#allocation2 + $0x140] sm:$0xff] %vm223_vm0, %v5499_v0 }
  0x3d   : > { %265 = vst.msk [vmem:[#allocation2 + $0x148] sm:$0xff] %vm223_vm0, %v5499_v0 }
  0x3e   : > { %266 = vst.msk [vmem:[#allocation2 + $0x150] sm:$0xff] %vm223_vm0, %v5499_v0 }
  0x3f   : > { %267 = vst.msk [vmem:[#allocation2 + $0x158] sm:$0xff] %vm223_vm0, %v5499_v0 }
  0x40   : > { %268 = vst.msk [vmem:[#allocation2 + $0x160] sm:$0xff] %vm223_vm0, %v5499_v0 }
  0x41   : > { %269 = vst.msk [vmem:[#allocation2 + $0x168] sm:$0xff] %vm223_vm0, %v5499_v0 }
  0x42   : > { %270 = vst.msk [vmem:[#allocation2 + $0x170] sm:$0xff] %vm223_vm0, %v5499_v0 }
  0x43   : > { %271 = vst.msk [vmem:[#allocation2 + $0x178] sm:$0xff] %vm223_vm0, %v5499_v0 }
  0x44   : > { %272 = vst.msk [vmem:[#allocation2 + $0x180] sm:$0xff] %vm223_vm0, %v5499_v0 }
  0x45   : > { %273 = vst.msk [vmem:[#allocation2 + $0x188] sm:$0xff] %vm223_vm0, %v5499_v0 }
  0x46   : > { %274 = vst.msk [vmem:[#allocation2 + $0x190] sm:$0xff] %vm223_vm0, %v5499_v0 }
  0x47   : > { %275 = vst.msk [vmem:[#allocation2 + $0x198] sm:$0xff] %vm223_vm0, %v5499_v0 }
  0x48   : > { %276 = vst.msk [vmem:[#allocation2 + $0x1a0] sm:$0xff] %vm223_vm0, %v5499_v0 }
  0x49   : > { %277 = vst.msk [vmem:[#allocation2 + $0x1a8] sm:$0xff] %vm223_vm0, %v5499_v0 }
  0x4a   : > { %278 = vst.msk [vmem:[#allocation2 + $0x1b0] sm:$0xff] %vm223_vm0, %v5499_v0 }
  0x4b   : > { %279 = vst.msk [vmem:[#allocation2 + $0x1b8] sm:$0xff] %vm223_vm0, %v5499_v0 }
  0x4c   : > { %280 = vst.msk [vmem:[#allocation2 + $0x1c0] sm:$0xff] %vm223_vm0, %v5499_v0 }
  0x4d   : > { %281 = vst.msk [vmem:[#allocation2 + $0x1c8] sm:$0xff] %vm223_vm0, %v5499_v0 }
  0x4e   : > { %282 = vst.msk [vmem:[#allocation2 + $0x1d0] sm:$0xff] %vm223_vm0, %v5499_v0 }
  0x4f   : > { %283 = vst.msk [vmem:[#allocation2 + $0x1d8] sm:$0xff] %vm223_vm0, %v5499_v0 }
  0x50   : > { %284 = vst.msk [vmem:[#allocation2 + $0x1e0] sm:$0xff] %vm223_vm0, %v5499_v0 }
  0x51   : > { %285 = vst.msk [vmem:[#allocation2 + $0x1e8] sm:$0xff] %vm223_vm0, %v5499_v0 }
  0x52   : > { %286 = vst.msk [vmem:[#allocation2 + $0x1f0] sm:$0xff] %vm223_vm0, %v5499_v0 }
  0x53   : > { %287 = vst.msk [vmem:[#allocation2 + $0x1f8] sm:$0xff] %vm223_vm0, %v5499_v0 }
  0x54   : > { %288 = vst.msk [vmem:[#allocation2 + $0x200] sm:$0xff] %vm223_vm0, %v5499_v0 }
  0x55   : > { %289 = vst.msk [vmem:[#allocation2 + $0x208] sm:$0xff] %vm223_vm0, %v5499_v0 }
  0x56   : > { %290 = vst.msk [vmem:[#allocation2 + $0x210] sm:$0xff] %vm223_vm0, %v5499_v0 }
  0x57   : > { %291 = vst.msk [vmem:[#allocation2 + $0x218] sm:$0xff] %vm223_vm0, %v5499_v0 }
  0x58   : > { %292 = vst.msk [vmem:[#allocation2 + $0x220] sm:$0xff] %vm223_vm0, %v5499_v0 }
  0x59   : > { %293 = vst.msk [vmem:[#allocation2 + $0x228] sm:$0xff] %vm223_vm0, %v5499_v0 }
  0x5a   : > { %294 = vst.msk [vmem:[#allocation2 + $0x230] sm:$0xff] %vm223_vm0, %v5499_v0 }
  0x5b   : > { %295 = vst.msk [vmem:[#allocation2 + $0x238] sm:$0xff] %vm223_vm0, %v5499_v0 }
  0x5c   : > { %335 = vst.msk [vmem:[#allocation2 + $0x88] sm:$0xff] %vm223_vm0, %v302_v4 }
  0x5d   : > { %336 = vst.msk [vmem:[#allocation2 + $0x90] sm:$0xff] %vm223_vm0, %v303_v5 }
  0x5e   : > { %331 = vst.msk [vmem:[#allocation2 + $0x48] sm:$0xff] %vm223_vm0, %v298_v6 }
  0x5f   : > { %332 = vst.msk [vmem:[#allocation2 + $0x50] sm:$0xff] %vm223_vm0, %v299_v7 }
  0x60   : > { %329 = vst.msk [vmem:[#allocation2 + $0x28] sm:$0xff] %vm223_vm0, %v296_v8 }
  0x61   : > { %330 = vst.msk [vmem:[#allocation2 + $0x30] sm:$0xff] %vm223_vm0, %v297_v9 }
  0x62   : > { %337 = vst.msk [vmem:[#allocation2 + $0xa8] sm:$0xff] %vm223_vm0, %v304_v10 }
  0x63   : > { %v401_v14 = vld [vmem:[#allocation2 + $0x88] sm:$0xff]  ;;  %338 = vst.msk [vmem:[#allocation2 + $0xb0] sm:$0xff] %vm223_vm0, %v305_v11 }
  0x64   : > { %v402_v16 = vld [vmem:[#allocation2 + $0x90] sm:$0xff]  ;;  %333 = vst.msk [vmem:[#allocation2 + $0x68] sm:$0xff] %vm223_vm0, %v300_v12 }
  0x65   : > { %v4107_v18 = vpack.i.bf16 %v402_v16, %v401_v14  ;;  %v397_v19 = vld [vmem:[#allocation2 + $0x48] sm:$0xff]  ;;  %334 = vst.msk [vmem:[#allocation2 + $0x70] sm:$0xff] %vm223_vm0, %v301_v13 }
  0x66   : > { %v398_v21 = vld [vmem:[#allocation2 + $0x50] sm:$0xff]  ;;  %339 = vst.msk [vmem:[#allocation2 + $0xc8] sm:$0xff] %vm223_vm0, %v306_v15 }
  0x67   : > { %2994 = vrot.lane.b32.xlu2 %v4107_v18, %s3840_s30  ;;  %v4115_v23 = vpack.i.bf16 %v398_v21, %v397_v19  ;;  %v395_v24 = vld [vmem:[#allocation2 + $0x28] sm:$0xff]  ;;  %340 = vst.msk [vmem:[#allocation2 + $0xd0] sm:$0xff] %vm223_vm0, %v307_v17 }
  0x68   : > { %v396_v26 = vld [vmem:[#allocation2 + $0x30] sm:$0xff]  ;;  %343 = vst.msk [vmem:[#allocation2 + $0x108] sm:$0xff] %vm223_vm0, %v310_v20 }
  0x69   : > { %2984 = vrot.lane.b32.xlu1 %v4115_v23, %s3840_s30  ;;  %v4123_v28 = vpack.i.bf16 %v396_v26, %v395_v24  ;;  %v403_v29 = vld [vmem:[#allocation2 + $0xa8] sm:$0xff]  ;;  %344 = vst.msk [vmem:[#allocation2 + $0x110] sm:$0xff] %vm223_vm0, %v311_v22  ;;  %v428_v17 = vld [vmem:[#allocation2 + $0x31] sm:$0xff] }
  0x6a   : > { %v404_v31 = vld [vmem:[#allocation2 + $0xb0] sm:$0xff]  ;;  %341 = vst.msk [vmem:[#allocation2 + $0xe8] sm:$0xff] %vm223_vm0, %v308_v25 }
  0x6b   : > { %2979 = vrot.lane.b32.xlu0 %v4123_v28, %s3840_s30  ;;  %v4131_v33 = vpack.i.bf16 %v404_v31, %v403_v29  ;;  %v399_v34 = vld [vmem:[#allocation2 + $0x68] sm:$0xff]  ;;  %342 = vst.msk [vmem:[#allocation2 + $0xf0] sm:$0xff] %vm223_vm0, %v309_v27  ;;  %v426_v20 = vld [vmem:[#allocation2 + $0x11] sm:$0xff] }
  0x6c   : > { %v400_v36 = vld [vmem:[#allocation2 + $0x70] sm:$0xff]  ;;  %345 = vst.msk [vmem:[#allocation2 + $0x128] sm:$0xff] %vm223_vm0, %v312_v30 }
  0x6d   : > { %v4137_v38 = vpack.i.bf16 %v400_v36, %v399_v34  ;;  %v405_v39 = vld [vmem:[#allocation2 + $0xc8] sm:$0xff]  ;;  %346 = vst.msk [vmem:[#allocation2 + $0x130] sm:$0xff] %vm223_vm0, %v313_v32  ;;  %v430_v24 = vld [vmem:[#allocation2 + $0x51] sm:$0xff] }
  0x6e   : > { %v406_v41 = vld [vmem:[#allocation2 + $0xd0] sm:$0xff]  ;;  %349 = vst.msk [vmem:[#allocation2 + $0x168] sm:$0xff] %vm223_vm0, %v316_v35 }
  0x6f   : > { %2999 = vrot.lane.b32.xlu2 %v4131_v33, %s3840_s30  ;;  %v4145_v43 = vpack.i.bf16 %v406_v41, %v405_v39  ;;  %350 = vst.msk [vmem:[#allocation2 + $0x170] sm:$0xff] %vm223_vm0, %v317_v37  ;;  %v409_v45 = vld [vmem:[#allocation2 + $0x108] sm:$0xff]  ;;  %v434_v29 = vld [vmem:[#allocation2 + $0x91] sm:$0xff] }
  0x70   : > { %v410_v46 = vld [vmem:[#allocation2 + $0x110] sm:$0xff]  ;;  %347 = vst.msk [vmem:[#allocation2 + $0x148] sm:$0xff] %vm223_vm0, %v314_v40 }
  0x71   : > { %2989 = vrot.lane.b32.xlu1 %v4137_v38, %s3840_s30  ;;  %348 = vst.msk [vmem:[#allocation2 + $0x150] sm:$0xff] %vm223_vm0, %v315_v42  ;;  %v407_v49 = vld [vmem:[#allocation2 + $0xe8] sm:$0xff]  ;;  %v4159_v52 = vpack.i.bf16 %v410_v46, %v409_v45  ;;  %v432_v31 = vld [vmem:[#allocation2 + $0x71] sm:$0xff] }
  0x72   : > { %v408_v50 = vld [vmem:[#allocation2 + $0xf0] sm:$0xff]  ;;  %351 = vst.msk [vmem:[#allocation2 + $0x188] sm:$0xff] %vm223_vm0, %v318_v44 }
  0x73   : > { %3004 = vrot.lane.b32.xlu0 %v4145_v43, %s3840_s30  ;;  %352 = vst.msk [vmem:[#allocation2 + $0x190] sm:$0xff] %vm223_vm0, %v319_v47  ;;  %v411_v54 = vld [vmem:[#allocation2 + $0x128] sm:$0xff]  ;;  %v4165_v57 = vpack.i.bf16 %v408_v50, %v407_v49  ;;  %v436_v35 = vld [vmem:[#allocation2 + $0xb1] sm:$0xff] }
  0x74   : > { %v412_v55 = vld [vmem:[#allocation2 + $0x130] sm:$0xff]  ;;  %355 = vst.msk [vmem:[#allocation2 + $0x1c8] sm:$0xff] %vm223_vm0, %v322_v48 }
  0x75   : > { %356 = vst.msk [vmem:[#allocation2 + $0x1d0] sm:$0xff] %vm223_vm0, %v323_v51  ;;  %v4173_v60 = vpack.i.bf16 %v412_v55, %v411_v54  ;;  %v415_v61 = vld [vmem:[#allocation2 + $0x168] sm:$0xff]  ;;  %v440_v40 = vld [vmem:[#allocation2 + $0xf1] sm:$0xff] }
  0x76   : > { %353 = vst.msk [vmem:[#allocation2 + $0x1a8] sm:$0xff] %vm223_vm0, %v320_v53  ;;  %v416_v62 = vld [vmem:[#allocation2 + $0x170] sm:$0xff] }
  0x77   : > { %3014 = vrot.lane.b32.xlu2 %v4159_v52, %s3840_s30  ;;  %354 = vst.msk [vmem:[#allocation2 + $0x1b0] sm:$0xff] %vm223_vm0, %v321_v56  ;;  %v413_v63 = vld [vmem:[#allocation2 + $0x148] sm:$0xff]  ;;  %v4182_v2 = vpack.i.bf16 %v416_v62, %v415_v61  ;;  %v438_v42 = vld [vmem:[#allocation2 + $0xd1] sm:$0xff] }
  0x78   : > { %357 = vst.msk [vmem:[#allocation2 + $0x1e8] sm:$0xff] %vm223_vm0, %v324_v58  ;;  %v414_v1 = vld [vmem:[#allocation2 + $0x150] sm:$0xff] }
  0x79   : > { %3009 = vrot.lane.b32.xlu1 %v4165_v57, %s3840_s30  ;;  %358 = vst.msk [vmem:[#allocation2 + $0x1f0] sm:$0xff] %vm223_vm0, %v325_v59  ;;  %v417_v3 = vld [vmem:[#allocation2 + $0x188] sm:$0xff]  ;;  %v4184_v5 = vpack.i.bf16 %v414_v1, %v413_v63  ;;  %v442_v46 = vld [vmem:[#allocation2 + $0x111] sm:$0xff] }
  0x7a   : > { %v418_v4 = vld [vmem:[#allocation2 + $0x190] sm:$0xff] }
  0x7b   : > { %3019 = vrot.lane.b32.xlu0 %v4173_v60, %s3840_s30  ;;  %v4188_v6 = vpack.i.bf16 %v418_v4, %v417_v3  ;;  %v421_v7 = vld [vmem:[#allocation2 + $0x1c8] sm:$0xff]  ;;  %v446_v50 = vld [vmem:[#allocation2 + $0x151] sm:$0xff] }
  0x7c   : > { %v422_v8 = vld [vmem:[#allocation2 + $0x1d0] sm:$0xff] }
  0x7d   : > { %v419_v9 = vld [vmem:[#allocation2 + $0x1a8] sm:$0xff]  ;;  %v4194_v11 = vpack.i.bf16 %v422_v8, %v421_v7  ;;  %v444_v53 = vld [vmem:[#allocation2 + $0x131] sm:$0xff] }
  0x7e   : > { %v420_v10 = vld [vmem:[#allocation2 + $0x1b0] sm:$0xff] }
  0x7f   : > { %3029 = vrot.lane.b32.xlu2 %v4182_v2, %s3840_s30  ;;  %v423_v12 = vld [vmem:[#allocation2 + $0x1e8] sm:$0xff]  ;;  %v4196_v14 = vpack.i.bf16 %v420_v10, %v419_v9  ;;  %v448_v56 = vld [vmem:[#allocation2 + $0x171] sm:$0xff] }
  0x80   : > { %v424_v13 = vld [vmem:[#allocation2 + $0x1f0] sm:$0xff]  ;;  %v4243_v10 = vld [vmem:[#allocation2 + $0x27] sm:$0xff] }
  0x81   : > { %3024 = vrot.lane.b32.xlu1 %v4184_v5, %s3840_s30  ;;  %v4200_v15 = vpack.i.bf16 %v424_v13, %v423_v12  ;;  %v427_v16 = vld [vmem:[#allocation2 + $0x29] sm:$0xff]  ;;  %v452_v62 = vld [vmem:[#allocation2 + $0x1b1] sm:$0xff] }
  0x82   : > { %v425_v19 = vld [vmem:[#allocation2 + $0x9] sm:$0xff]  ;;  %v4206_v21 = vpack.i.bf16 %v428_v17, %v427_v16  ;;  %v450_v1 = vld [vmem:[#allocation2 + $0x191] sm:$0xff] }
  0x83   : > { %3034 = vrot.lane.b32.xlu0 %v4188_v6, %s3840_s30  ;;  %v429_v22 = vld [vmem:[#allocation2 + $0x49] sm:$0xff]  ;;  %v3053_v25 = vpack.i.bf16 %v426_v20, %v425_v19  ;;  %v454_v7 = vld [vmem:[#allocation2 + $0x1d1] sm:$0xff] }
  0x84   : > { %v4210_v26 = vpack.i.bf16 %v430_v24, %v429_v22  ;;  %v433_v27 = vld [vmem:[#allocation2 + $0x89] sm:$0xff]  ;;  %v456_v16 = vld [vmem:[#allocation2 + $0x1f1] sm:$0xff] }
  0x85   : > { %v431_v30 = vld [vmem:[#allocation2 + $0x69] sm:$0xff]  ;;  %v4215_v32 = vpack.i.bf16 %v434_v29, %v433_v27  ;;  %v327_v27 = vld [vmem:[%s4074_s10 + $0xf8] sm:$0xff] }
  0x86   : > { %v435_v34 = vld [vmem:[#allocation2 + $0xa9] sm:$0xff]  ;;  %v4217_v36 = vpack.i.bf16 %v432_v31, %v431_v30  ;;  %360 = vst.msk [vmem:[#allocation2 + $0x210] sm:$0xff] %vm223_vm0, %v327_v27 }
  0x87   : > { %3044 = vrot.lane.b32.xlu2 %v4194_v11, %s3840_s30  ;;  %v4221_v37 = vpack.i.bf16 %v436_v35, %v435_v34  ;;  %v439_v39 = vld [vmem:[#allocation2 + $0xe9] sm:$0xff] }
  0x88   : > { %v437_v41 = vld [vmem:[#allocation2 + $0xc9] sm:$0xff]  ;;  %v4227_v44 = vpack.i.bf16 %v440_v40, %v439_v39 }
  0x89   : > { %3039 = vrot.lane.b32.xlu1 %v4196_v14, %s3840_s30  ;;  %v441_v45 = vld [vmem:[#allocation2 + $0x109] sm:$0xff]  ;;  %v4229_v47 = vpack.i.bf16 %v438_v42, %v437_v41 }
  0x8a   : > { %v4233_v48 = vpack.i.bf16 %v442_v46, %v441_v45  ;;  %v445_v49 = vld [vmem:[#allocation2 + $0x149] sm:$0xff] }
  0x8b   : > { %3049 = vrot.lane.b32.xlu0 %v4200_v15, %s3840_s30  ;;  %v443_v51 = vld [vmem:[#allocation2 + $0x129] sm:$0xff]  ;;  %v3103_v54 = vpack.i.bf16 %v446_v50, %v445_v49 }
  0x8c   : > { %5519 = vst [vmem:[#allocation9_spill] sm:$0xff] %v4233_v48  ;;  %v447_v55 = vld [vmem:[#allocation2 + $0x169] sm:$0xff]  ;;  %v3098_v58 = vpack.i.bf16 %v444_v53, %v443_v51 }
  0x8d   : > { %v3108_v59 = vpack.i.bf16 %v448_v56, %v447_v55  ;;  %v451_v61 = vld [vmem:[#allocation2 + $0x1a9] sm:$0xff] }
  0x8e   : > { %v449_v63 = vld [vmem:[#allocation2 + $0x189] sm:$0xff]  ;;  %v3118_v3 = vpack.i.bf16 %v452_v62, %v451_v61 }
  0x8f   : > { %3059 = vrot.lane.b32.xlu2 %v4206_v21, %s3841_s11  ;;  %v453_v4 = vld [vmem:[#allocation2 + $0x1c9] sm:$0xff]  ;;  %v3113_v8 = vpack.i.bf16 %v450_v1, %v449_v63 }
  0x90   : > { %v3123_v9 = vpack.i.bf16 %v454_v7, %v453_v4  ;;  %v4245_v12 = vld [vmem:[#allocation2 + $0x2f] sm:$0xff]  ;;  %v4251_v19 = vld [vmem:[#allocation2 + $0x47] sm:$0xff] }
  0x91   : > { %3054 = vrot.lane.b32.xlu1 %v3053_v25, %s3841_s11  ;;  %v455_v13 = vld [vmem:[#allocation2 + $0x1e9] sm:$0xff]  ;;  %v3133_v17 = vpack.i.bf16 %v4245_v12, %v4243_v10  ;;  %5520 = vst [vmem:[#allocation10_spill] sm:$0xff] %v4251_v19  ;;  %v4362_v27 = vpop.permute.xlu0 %2974 }
  0x92   : > { %v4253_v20 = vld [vmem:[#allocation2 + $0x4f] sm:$0xff]  ;;  %v3128_v22 = vpack.i.bf16 %v456_v16, %v455_v13  ;;  %v4263_v29 = vld [vmem:[#allocation2 + $0x87] sm:$0xff] }
  0x93   : > { %3064 = vrot.lane.b32.xlu0 %v4210_v26, %s3841_s11  ;;  %5521 = vst [vmem:[#allocation11_spill] sm:$0xff] %v4253_v20  ;;  %v326_v24 = vld [vmem:[%s4074_s10 + $0xf0] sm:$0xff]  ;;  %v4259_v25 = vpack.i.bf16 %v4253_v20, %v4251_v19  ;;  %v4269_v31 = vld [vmem:[#allocation2 + $0x67] sm:$0xff]  ;;  %s3849_s10 = smov 16  }
  0x94   : > { %359 = vst.msk [vmem:[#allocation2 + $0x208] sm:$0xff] %vm223_vm0, %v326_v24  ;;  %v4265_v30 = vld [vmem:[#allocation2 + $0x8f] sm:$0xff]  ;;  %v4279_v39 = vld [vmem:[#allocation2 + $0xa7] sm:$0xff] }
  0x95   : > { %v4271_v34 = vld [vmem:[#allocation2 + $0x6f] sm:$0xff]  ;;  %v4277_v35 = vpack.i.bf16 %v4265_v30, %v4263_v29  ;;  %v4293_v45 = vld [vmem:[#allocation2 + $0xe7] sm:$0xff] }
  0x96   : > { %v4281_v40 = vld [vmem:[#allocation2 + $0xaf] sm:$0xff]  ;;  %v4285_v41 = vpack.i.bf16 %v4271_v34, %v4269_v31  ;;  %5524 = vst [vmem:[#allocation14_spill] sm:$0xff] %v4293_v45  ;;  %v4301_v50 = vld [vmem:[#allocation2 + $0xc7] sm:$0xff] }
  0x97   : > { %3074 = vrot.lane.b32.xlu2 %v4215_v32, %s3841_s11  ;;  %5522 = vst [vmem:[#allocation12_spill] sm:$0xff] %v4277_v35  ;;  %v4291_v42 = vpack.i.bf16 %v4281_v40, %v4279_v39  ;;  %v4295_v46 = vld [vmem:[#allocation2 + $0xef] sm:$0xff]  ;;  %v4327_v63 = vld [vmem:[#allocation2 + $0x127] sm:$0xff] }
  0x98   : > { %5525 = vst [vmem:[#allocation15_spill] sm:$0xff] %v4295_v46  ;;  %v4303_v51 = vld [vmem:[#allocation2 + $0xcf] sm:$0xff]  ;;  %v3163_v53 = vpack.i.bf16 %v4295_v46, %v4293_v45  ;;  %v4337_v4 = vld [vmem:[#allocation2 + $0x167] sm:$0xff] }
  0x99   : > { %3069 = vrot.lane.b32.xlu1 %v4217_v36, %s3841_s11  ;;  %5523 = vst [vmem:[#allocation13_spill] sm:$0xff] %v4291_v42  ;;  %v4311_v55 = vld [vmem:[#allocation2 + $0x10f] sm:$0xff]  ;;  %v3158_v56 = vpack.i.bf16 %v4303_v51, %v4301_v50  ;;  %v4349_v13 = vld [vmem:[#allocation2 + $0x1a7] sm:$0xff] }
  0x9a   : > { %v4322_v61 = vld [vmem:[#allocation2 + $0x14f] sm:$0xff] }
  0x9b   : > { %3079 = vrot.lane.b32.xlu0 %v4221_v37, %s3841_s11  ;;  %5527 = vst [vmem:[#allocation17_spill] sm:$0xff] %v4322_v61  ;;  %v4329_v1 = vld [vmem:[#allocation2 + $0x12f] sm:$0xff] }
  0x9c   : > { %v4339_v7 = vld [vmem:[#allocation2 + $0x16f] sm:$0xff] }
  0x9d   : > { %v4351_v16 = vld [vmem:[#allocation2 + $0x1af] sm:$0xff] }
  0x9e   : > { %v4359_v24 = vld [vmem:[#allocation2 + $0x18f] sm:$0xff] }
  0x9f   : > { %3089 = vrot.lane.b32.xlu2 %v4227_v44, %s3841_s11  ;;  %v484_v0 = vld [vmem:[#allocation2 + $0x1cf] sm:$0xff] }
  0xa0   : > { %v4374_v45 = vld [vmem:[#allocation2 + $0x1ef] sm:$0xff] }
  0xa1   : > { %3084 = vrot.lane.b32.xlu1 %v4229_v47, %s3841_s11 }
  0xa3   : > { %3094 = vrot.lane.b32.xlu0 %v4233_v48, %s3841_s11 }
  0xa7   : > { %3104 = vrot.lane.b32.xlu2 %v3103_v54, %s3841_s11  ;;  %v4309_v54 = vld [vmem:[#allocation2 + $0x107] sm:$0xff] }
  0xa9   : > { %3099 = vrot.lane.b32.xlu1 %v3098_v58, %s3841_s11  ;;  %v4318_v58 = vpack.i.bf16 %v4311_v55, %v4309_v54 }
  0xab   : > { %3109 = vrot.lane.b32.xlu0 %v3108_v59, %s3841_s11  ;;  %v4320_v59 = vld [vmem:[#allocation2 + $0x147] sm:$0xff] }
  0xac   : > { %5526 = vst [vmem:[#allocation16_spill] sm:$0xff] %v4320_v59 }
  0xaf   : > { %3119 = vrot.lane.b32.xlu2 %v3118_v3, %s3841_s11  ;;  %v4335_v3 = vpack.i.bf16 %v4322_v61, %v4320_v59  ;;  %v487_v59 = vld [vmem:[#allocation2 + $0x207] sm:$0xff]  ;;  %v488_v61 = vld [vmem:[#allocation2 + $0x20f] sm:$0xff] }
  0xb0   : > { %v3208_v48 = vpack.i.bf16 %v488_v61, %v487_v59 }
  0xb1   : > { %3114 = vrot.lane.b32.xlu1 %v3113_v8, %s3841_s11  ;;  %5528 = vst [vmem:[#allocation18_spill] sm:$0xff] %v4335_v3  ;;  %v4343_v8 = vpack.i.bf16 %v4329_v1, %v4327_v63 }
  0xb3   : > { %3124 = vrot.lane.b32.xlu0 %v3123_v9, %s3841_s11  ;;  %5529 = vst [vmem:[#allocation19_spill] sm:$0xff] %v4343_v8  ;;  %v3183_v9 = vpack.i.bf16 %v4339_v7, %v4337_v4 }
  0xb7   : > { %3134 = vrot.lane.b32.xlu2 %v3133_v17, %s3842_s12 }
  0xb9   : > { %3129 = vrot.lane.b32.xlu1 %v3128_v22, %s3841_s11  ;;  %v4357_v22 = vld [vmem:[#allocation2 + $0x187] sm:$0xff]  ;;  %s3850_s11 = smov 8  }
  0xba   : > { %5530 = vst [vmem:[#allocation20_spill] sm:$0xff] %v4357_v22 }
  0xbb   : > { %3139 = vrot.lane.b32.xlu0 %v4259_v25, %s3842_s12 }
  0xbf   : > { %3149 = vrot.lane.b32.xlu2 %v4277_v35, %s3842_s12 }
  0xc1   : > { %3144 = vrot.lane.b32.xlu1 %v4285_v41, %s3842_s12  ;;  %v4299_v49 = vpop.permute.xlu2 %2994 }
  0xc3   : > { %3154 = vrot.lane.b32.xlu0 %v4291_v42, %s3842_s12 }
  0xc7   : > { %3164 = vrot.lane.b32.xlu2 %v3163_v53, %s3842_s12  ;;  %v3193_v53 = vpack.i.bf16 %v4351_v16, %v4349_v13 }
  0xc9   : > { %3159 = vrot.lane.b32.xlu1 %v3158_v56, %s3842_s12  ;;  %v4325_v62 = vpop.permute.xlu2 %2999  ;;  %v483_v56 = vld [vmem:[#allocation2 + $0x1c7] sm:$0xff] }
  0xca   : > { %v3198_v42 = vpack.i.bf16 %v484_v0, %v483_v56 }
  0xcb   : > { %3169 = vrot.lane.b32.xlu0 %v4318_v58, %s3842_s12 }
  0xcf   : > { %3179 = vrot.lane.b32.xlu2 %v4335_v3, %s3842_s12  ;;  %v3188_v3 = vpack.i.bf16 %v4359_v24, %v4357_v22 }
  0xd1   : > { %3174 = vrot.lane.b32.xlu1 %v4343_v8, %s3842_s12  ;;  %v4355_v17 = vpop.permute.xlu2 %3014 }
  0xd3   : > { %3184 = vrot.lane.b32.xlu0 %v3183_v9, %s3842_s12  ;;  %v4372_v9 = vld [vmem:[#allocation2 + $0x1e7] sm:$0xff] }
  0xd7   : > { %3194 = vrot.lane.b32.xlu2 %v3193_v53, %s3842_s12  ;;  %v3203_v53 = vpack.i.bf16 %v4374_v45, %v4372_v9 }
  0xd9   : > { %3189 = vrot.lane.b32.xlu1 %v3188_v3, %s3842_s12  ;;  %v4370_v8 = vpop.permute.xlu2 %3029 }
  0xdb   : > { %v4376_v46 = vpop.permute.xlu1 %2984  ;;  %3199 = vrot.lane.b32.xlu0 %v3198_v42, %s3842_s12 }
  0xdd   : > { %v4379_v35 = vpop.permute.xlu0 %2979 }
  0xdf   : > { %3209 = vrot.lane.b32.xlu2 %v3208_v48, %s3842_s12 }
  0xe1   : > { %3204 = vrot.lane.b32.xlu1 %v3203_v53, %s3842_s12  ;;  %v3045_v3 = vpop.permute.xlu2 %3044  ;;  %s3851_s12 = smov 40  }
  0xe2   : > { %v3047_v20 = vunpack.i.h.bf16 %v3045_v3  ;;  %v3046_v19 = vunpack.i.l.bf16 %v3045_v3 }
  0xe3   : > { %v4385_v22 = vpop.permute.xlu1 %2989  ;;  %3214 = vrot.lane.b32.xlu0 %v4123_v28, %s3843_s13  ;;  %v2997_v28 = vunpack.i.h.bf16 %v4299_v49 }
  0xe4   : > { %v4390_v42 = vsel %vm223_vm0, %v484_v0, %v3047_v20  ;;  %v4393_v59 = vsel %vm223_vm0, %v483_v56, %v3046_v19  ;;  %v2996_v19 = vunpack.i.l.bf16 %v4299_v49 }
  0xe5   : > { %v4395_v61 = vpop.permute.xlu0 %3004 }
  0xe6   : > { %v1682_v56 = vsel %vm223_vm0, %v4263_v29, %v2996_v19  ;;  %v520_v19 = vld [vmem:[#allocation2 + $0x210] sm:$0xff] }
  0xe7   : > { %3224 = vrot.lane.b32.xlu2 %v4137_v38, %s3843_s13 }
  0xe9   : > { %3219 = vrot.lane.b32.xlu1 %v4115_v23, %s3843_s13  ;;  %v4401_v48 = vpop.permute.xlu2 %3059 }
  0xeb   : > { %v4403_v53 = vpop.permute.xlu1 %3009  ;;  %3229 = vrot.lane.b32.xlu0 %v4107_v18, %s3843_s13  ;;  %v1683_v18 = vsel %vm223_vm0, %v4265_v30, %v2997_v28 }
  0xed   : > { %v4407_v0 = vpop.permute.xlu0 %3019 }
  0xef   : > { %3239 = vrot.lane.b32.xlu2 %v4145_v43, %s3843_s13 }
  0xf1   : > { %3234 = vrot.lane.b32.xlu1 %v4131_v33, %s3843_s13  ;;  %v3075_v23 = vpop.permute.xlu2 %3074 }
  0xf2   : > { %v3077_v38 = vunpack.i.h.bf16 %v3075_v23  ;;  %v3076_v20 = vunpack.i.l.bf16 %v3075_v23 }
  0xf3   : > { %v4419_v3 = vpop.permute.xlu1 %3024  ;;  %3244 = vrot.lane.b32.xlu0 %v4165_v57, %s3843_s13 }
  0xf4   : > { %5531 = vst [vmem:[#allocation21_spill] sm:$0xff] %v4419_v3  ;;  %v4424_v43 = vsel %vm1706_vm1, %v1683_v18, %v3077_v38  ;;  %v4427_v33 = vsel %vm1706_vm1, %v1682_v56, %v3076_v20  ;;  %v3002_v18 = vunpack.i.h.bf16 %v4325_v62 }
  0xf5   : > { %v4429_v49 = vpop.permute.xlu0 %3034 }
  0xf7   : > { %3254 = vrot.lane.b32.xlu2 %v4173_v60, %s3843_s13 }
  0xf9   : > { %3249 = vrot.lane.b32.xlu1 %v4159_v52, %s3843_s13  ;;  %v4435_v29 = vpop.permute.xlu2 %3089  ;;  %v519_v52 = vld [vmem:[#allocation2 + $0x208] sm:$0xff] }
  0xfa   : > { %5532 = vst [vmem:[#allocation22_spill] sm:$0xff] %v4435_v29  ;;  %v3288_v20 = vpack.i.bf16 %v520_v19, %v519_v52  ;;  %v2977_v19 = vunpack.i.h.bf16 %v4362_v27 }
  0xfb   : > { %v3040_v30 = vpop.permute.xlu1 %3039  ;;  %3259 = vrot.lane.b32.xlu0 %v4184_v5, %s3843_s13 }
  0xfc   : > { %v3042_v38 = vunpack.i.h.bf16 %v3040_v30  ;;  %v3041_v5 = vunpack.i.l.bf16 %v3040_v30 }
  0xfd   : > { %v4439_v57 = vpop.permute.xlu0 %3049 }
  0xfe   : > { %v1700_v30 = vsel %vm223_vm0, %v4349_v13, %v3041_v5  ;;  %v362_v5 = vld [vmem:[#allocation2 + $0xf] sm:$0xff] }
  0xff   : > { %3269 = vrot.lane.b32.xlu2 %v4188_v6, %s3843_s13 }
 0x101   : > { %3264 = vrot.lane.b32.xlu1 %v4182_v2, %s3843_s13  ;;  %v4445_v28 = vpop.permute.xlu2 %3104 }
 0x102   : > { %5533 = vst [vmem:[#allocation23_spill] sm:$0xff] %v4445_v28  ;;  %v1701_v28 = vsel %vm223_vm0, %v4351_v16, %v3042_v38  ;;  %v1685_v16 = vsel %vm223_vm0, %v4281_v40, %v3002_v18  ;;  %v361_v38 = vld [vmem:[#allocation2 + $0x7] sm:$0xff] }
 0x103   : > { %v3055_v60 = vpop.permute.xlu1 %3054  ;;  %3274 = vrot.lane.b32.xlu0 %v4196_v14, %s3843_s13  ;;  %v3001_v14 = vunpack.i.l.bf16 %v4325_v62  ;;  %v2976_v62 = vunpack.i.l.bf16 %v4362_v27 }
 0x105   : > { %v4449_v23 = vpop.permute.xlu0 %3064  ;;  %v1684_v13 = vsel %vm223_vm0, %v4279_v39, %v3001_v14  ;;  %v1674_v39 = vsel %vm223_vm0, %v361_v38, %v2976_v62  ;;  %v3017_v14 = vunpack.i.h.bf16 %v4355_v17 }
 0x107   : > { %3284 = vrot.lane.b32.xlu2 %v4200_v15, %s3843_s13 }
 0x109   : > { %3279 = vrot.lane.b32.xlu1 %v4194_v11, %s3843_s13  ;;  %v3120_v2 = vpop.permute.xlu2 %3119 }
 0x10a   : > { %v3122_v6 = vunpack.i.h.bf16 %v3120_v2  ;;  %v3121_v56 = vunpack.i.l.bf16 %v3120_v2 }
 0x10b   : > { %v3070_v3 = vpop.permute.xlu1 %3069  ;;  %3289 = vrot.lane.b32.xlu0 %v3288_v20, %s3843_s13  ;;  %v3056_v20 = vunpack.i.l.bf16 %v3055_v60  ;;  %s3852_s13 = smov 32  }
 0x10c   : > { %v4463_v15 = vsel %vm1706_vm1, %v1701_v28, %v3122_v6  ;;  %v4466_v11 = vsel %vm1706_vm1, %v1700_v30, %v3121_v56  ;;  %v3057_v28 = vunpack.i.h.bf16 %v3055_v60  ;;  %v1675_v56 = vsel %vm223_vm0, %v362_v5, %v2977_v19 }
 0x10d   : > { %v3080_v52 = vpop.permute.xlu0 %3079  ;;  %v3016_v30 = vunpack.i.l.bf16 %v4355_v17  ;;  %v1691_v5 = vsel %vm223_vm0, %v4311_v55, %v3017_v14 }
 0x10e   : > { %v3082_v2 = vunpack.i.h.bf16 %v3080_v52  ;;  %v3081_v29 = vunpack.i.l.bf16 %v3080_v52  ;;  %v1708_v52 = vsel %vm1706_vm1, %v1675_v56, %v3057_v28 }
 0x10f   : > { %3299 = vrot.lane.b32.xlu2 %v4210_v26, %s3844_s14  ;;  %v1690_v28 = vsel %vm223_vm0, %v4309_v54, %v3016_v30  ;;  %v3031_v30 = vunpack.i.l.bf16 %v4370_v8 }
 0x110   : > { %v4477_v6 = vsel %vm1706_vm1, %v1685_v16, %v3082_v2  ;;  %v4480_v27 = vsel %vm1706_vm1, %v1684_v13, %v3081_v29  ;;  %v1707_v29 = vsel %vm1706_vm1, %v1674_v39, %v3056_v20  ;;  %v2992_v16 = vunpack.i.h.bf16 %v4385_v22 }
 0x111   : > { %3294 = vrot.lane.b32.xlu1 %v4206_v21, %s3844_s14  ;;  %v3135_v40 = vpop.permute.xlu2 %3134  ;;  %v2991_v13 = vunpack.i.l.bf16 %v4385_v22  ;;  %v3072_v20 = vunpack.i.h.bf16 %v3070_v3  ;;  %v586_v22 = vld [vmem:[#allocation2 + $0x48] sm:$0xff] }
 0x112   : > { %v3137_v60 = vunpack.i.h.bf16 %v3135_v40  ;;  %v3136_v18 = vunpack.i.l.bf16 %v3135_v40  ;;  %v3071_v40 = vunpack.i.l.bf16 %v3070_v3  ;;  %v1681_v54 = vsel %vm223_vm0, %v4271_v34, %v2992_v16 }
 0x113   : > { %v3085_v2 = vpop.permute.xlu1 %3084  ;;  %3304 = vrot.lane.b32.xlu0 %v4217_v36, %s3844_s14  ;;  %v3007_v16 = vunpack.i.h.bf16 %v4395_v61 }
 0x114   : > { %v4493_v21 = vsel %vm1739_vm2, %v1708_v52, %v3137_v60  ;;  %v4496_v62 = vsel %vm1739_vm2, %v1707_v29, %v3136_v18  ;;  %v587_v60 = vld [vmem:[#allocation2 + $0x50] sm:$0xff]  ;;  %v3032_v18 = vunpack.i.h.bf16 %v4370_v8  ;;  %v1714_v29 = vsel %vm1706_vm1, %v1681_v54, %v3072_v20 }
 0x115   : > { %v3095_v19 = vpop.permute.xlu0 %3094  ;;  %v3006_v8 = vunpack.i.l.bf16 %v4395_v61  ;;  %v3087_v20 = vunpack.i.h.bf16 %v3085_v2  ;;  %v588_v61 = vld [vmem:[#allocation2 + $0x68] sm:$0xff] }
 0x116   : > { %v3097_v17 = vunpack.i.h.bf16 %v3095_v19  ;;  %v3096_v38 = vunpack.i.l.bf16 %v3095_v19 }
 0x117   : > { %3314 = vrot.lane.b32.xlu2 %v4221_v37, %s3844_s14  ;;  %v1680_v37 = vsel %vm223_vm0, %v4269_v31, %v2991_v13 }
 0x118   : > { %v4507_v39 = vsel %vm1706_vm1, %v1691_v5, %v3097_v17  ;;  %v4510_v56 = vsel %vm1706_vm1, %v1690_v28, %v3096_v38  ;;  %v1713_v52 = vsel %vm1706_vm1, %v1680_v37, %v3071_v40  ;;  %v3328_v17 = vpack.i.bf16 %v587_v60, %v586_v22 }
 0x119   : > { %3309 = vrot.lane.b32.xlu1 %v4215_v32, %s3844_s14  ;;  %v3150_v55 = vpop.permute.xlu2 %3149  ;;  %v1697_v28 = vsel %vm223_vm0, %v4339_v7, %v3032_v18  ;;  %v3086_v40 = vunpack.i.l.bf16 %v3085_v2  ;;  %v1686_v2 = vsel %vm223_vm0, %v4301_v50, %v3006_v8  ;;  %v2982_v50 = vunpack.i.h.bf16 %v4379_v35 }
 0x11a   : > { %v3152_v3 = vunpack.i.h.bf16 %v3150_v55  ;;  %v3151_v14 = vunpack.i.l.bf16 %v3150_v55  ;;  %v589_v55 = vld [vmem:[#allocation2 + $0x70] sm:$0xff] }
 0x11b   : > { %v4522_v19 = vpop.permute.xlu1 %3099  ;;  %3319 = vrot.lane.b32.xlu0 %v4229_v47, %s3844_s14  ;;  %v1696_v47 = vsel %vm223_vm0, %v4337_v4, %v3031_v30  ;;  %v1687_v4 = vsel %vm223_vm0, %v4303_v51, %v3007_v16  ;;  %v1719_v37 = vsel %vm1706_vm1, %v1686_v2, %v3086_v40  ;;  %v3052_v40 = vunpack.i.h.bf16 %v4439_v57 }
 0x11c   : > { %v4527_v38 = vsel %vm1739_vm2, %v1714_v29, %v3152_v3  ;;  %v4530_v34 = vsel %vm1739_vm2, %v1713_v52, %v3151_v14  ;;  %v1720_v3 = vsel %vm1706_vm1, %v1687_v4, %v3087_v20  ;;  %v2981_v52 = vunpack.i.l.bf16 %v4379_v35 }
 0x11d   : > { %v3110_v31 = vpop.permute.xlu0 %3109 }
 0x11e   : > { %v3112_v13 = vunpack.i.h.bf16 %v3110_v31  ;;  %v3111_v5 = vunpack.i.l.bf16 %v3110_v31  ;;  %v3021_v31 = vunpack.i.l.bf16 %v4407_v0  ;;  %v1676_v20 = vsel %vm223_vm0, %v4243_v10, %v2981_v52 }
 0x11f   : > { %3329 = vrot.lane.b32.xlu2 %v3328_v17, %s3845_s15  ;;  %v3022_v17 = vunpack.i.h.bf16 %v4407_v0  ;;  %v3062_v10 = vunpack.i.h.bf16 %v4401_v48 }
 0x120   : > { %v4540_v22 = vsel %vm1706_vm1, %v1697_v28, %v3112_v13  ;;  %v4543_v60 = vsel %vm1706_vm1, %v1696_v47, %v3111_v5  ;;  %v3102_v13 = vunpack.i.h.bf16 %v4522_v19  ;;  %v3101_v5 = vunpack.i.l.bf16 %v4522_v19 }
 0x121   : > { %3324 = vrot.lane.b32.xlu1 %v4259_v25, %s3846_s16  ;;  %v3165_v7 = vpop.permute.xlu2 %3164  ;;  %v3343_v25 = vpack.i.bf16 %v589_v55, %v588_v61  ;;  %v2987_v28 = vunpack.i.h.bf16 %v4376_v46  ;;  %v2986_v47 = vunpack.i.l.bf16 %v4376_v46  ;;  %v1677_v19 = vsel %vm223_vm0, %v4245_v12, %v2982_v50 }
 0x122   : > { %v3167_v18 = vunpack.i.h.bf16 %v3165_v7  ;;  %v3166_v54 = vunpack.i.l.bf16 %v3165_v7  ;;  %v3051_v61 = vunpack.i.l.bf16 %v4439_v57 }
 0x123   : > { %v4553_v14 = vpop.permute.xlu1 %3114  ;;  %3334 = vrot.lane.b32.xlu0 %v4210_v26, %s3847_s17  ;;  %v3061_v26 = vunpack.i.l.bf16 %v4401_v48  ;;  %v599_v48 = vld [vmem:[#allocation2 + $0x110] sm:$0xff] }
 0x124   : > { %v4558_v30 = vsel %vm1739_vm2, %v1719_v37, %v3166_v54  ;;  %v4561_v51 = vsel %vm1739_vm2, %v1720_v3, %v3167_v18  ;;  %v598_v54 = vld [vmem:[#allocation2 + $0x108] sm:$0xff]  ;;  %v3037_v37 = vunpack.i.h.bf16 %v4429_v49  ;;  %v3036_v3 = vunpack.i.l.bf16 %v4429_v49 }
 0x125   : > { %v3125_v29 = vpop.permute.xlu0 %3124  ;;  %v1709_v12 = vsel %vm1706_vm1, %v1676_v20, %v3061_v26  ;;  %v3116_v26 = vunpack.i.l.bf16 %v4553_v14 }
 0x126   : > { %v3127_v16 = vunpack.i.h.bf16 %v3125_v29  ;;  %v3126_v8 = vunpack.i.l.bf16 %v3125_v29 }
 0x127   : > { %3344 = vrot.lane.b32.xlu2 %v3343_v25, %s3845_s15  ;;  %v1705_v25 = vsel %vm223_vm0, %v4374_v45, %v3052_v40  ;;  %v3363_v45 = vpack.i.bf16 %v599_v48, %v598_v54 }
 0x128   : > { %v4575_v35 = vsel %vm1706_vm1, %v4390_v42, %v3127_v16  ;;  %v4579_v0 = vsel %vm1706_vm1, %v4393_v59, %v3126_v8  ;;  %v1693_v42 = vsel %vm223_vm0, %v4329_v1, %v3022_v17  ;;  %v1692_v59 = vsel %vm223_vm0, %v4327_v63, %v3021_v31 }
 0x129   : > { %3339 = vrot.lane.b32.xlu1 %v4285_v41, %s3846_s16  ;;  %v3180_v46 = vpop.permute.xlu2 %3179  ;;  %v1725_v4 = vsel %vm1706_vm1, %v1692_v59, %v3101_v5  ;;  %v1726_v57 = vsel %vm1706_vm1, %v1693_v42, %v3102_v13  ;;  %v1710_v16 = vsel %vm1706_vm1, %v1677_v19, %v3062_v10  ;;  %v3117_v8 = vunpack.i.h.bf16 %v4553_v14  ;;  %v5534_v19 = vld [vmem:[#allocation20_spill] sm:$0xff]  ;;  %v5536_v59 = vld [vmem:[#allocation11_spill] sm:$0xff] }
 0x12a   : > { %v3182_v55 = vunpack.i.h.bf16 %v3180_v46  ;;  %v3181_v7 = vunpack.i.l.bf16 %v3180_v46  ;;  %v3067_v13 = vunpack.i.h.bf16 %v4449_v23  ;;  %v3066_v5 = vunpack.i.l.bf16 %v4449_v23  ;;  %v5535_v46 = vld [vmem:[#allocation10_spill] sm:$0xff] }
 0x12b   : > { %v3130_v2 = vpop.permute.xlu1 %3129  ;;  %3349 = vrot.lane.b32.xlu0 %v4217_v36, %s3847_s17  ;;  %v1704_v36 = vsel %vm223_vm0, %v4372_v9, %v3051_v61  ;;  %v1699_v14 = vsel %vm223_vm0, %v4359_v24, %v3037_v37  ;;  %v1678_v42 = vsel %vm223_vm0, %v5535_v46, %v2986_v47  ;;  %v591_v47 = vld [vmem:[#allocation2 + $0x90] sm:$0xff] }
 0x12c   : > { %v3132_v41 = vunpack.i.h.bf16 %v3130_v2  ;;  %v3131_v18 = vunpack.i.l.bf16 %v3130_v2  ;;  %v4600_v1 = vsel %vm1739_vm2, %v1725_v4, %v3181_v7  ;;  %v4603_v63 = vsel %vm1739_vm2, %v1726_v57, %v3182_v55  ;;  %v590_v57 = vld [vmem:[#allocation2 + $0x88] sm:$0xff] }
 0x12d   : > { %v3140_v50 = vpop.permute.xlu0 %3139  ;;  %v1679_v55 = vsel %vm223_vm0, %v5536_v59, %v2987_v28  ;;  %v1732_v7 = vsel %vm1706_vm1, %v1699_v14, %v3117_v8  ;;  %v1711_v28 = vsel %vm1706_vm1, %v1678_v42, %v3066_v5 }
 0x12e   : > { %v1737_v52 = vsel %vm1706_vm1, %v1704_v36, %v3131_v18  ;;  %v1738_v29 = vsel %vm1706_vm1, %v1705_v25, %v3132_v41  ;;  %v3142_v17 = vunpack.i.h.bf16 %v3140_v50  ;;  %v3141_v31 = vunpack.i.l.bf16 %v3140_v50 }
 0x12f   : > { %3359 = vrot.lane.b32.xlu2 %v4318_v58, %s3846_s16  ;;  %v1698_v58 = vsel %vm223_vm0, %v5534_v19, %v3036_v3  ;;  %v1712_v2 = vsel %vm1706_vm1, %v1679_v55, %v3067_v13  ;;  %v5537_v3 = vld [vmem:[#allocation12_spill] sm:$0xff]  ;;  %v3378_v25 = vpack.i.bf16 %v591_v47, %v590_v57  ;;  %v5539_v13 = vld [vmem:[#allocation22_spill] sm:$0xff]  ;;  %v5542_v57 = vld [vmem:[#allocation21_spill] sm:$0xff] }
 0x130   : > { %v4619_v49 = vsel %vm1739_vm2, %v1709_v12, %v3141_v31  ;;  %v4622_v9 = vsel %vm1739_vm2, %v1710_v16, %v3142_v17  ;;  %v1731_v23 = vsel %vm1706_vm1, %v1698_v58, %v3116_v26  ;;  %v3012_v17 = vunpack.i.h.bf16 %v4403_v53  ;;  %v5538_v16 = vld [vmem:[#allocation9_spill] sm:$0xff]  ;;  %v5540_v58 = vld [vmem:[#allocation15_spill] sm:$0xff] }
 0x131   : > { %3354 = vrot.lane.b32.xlu1 %v4227_v44, %s3844_s14  ;;  %v3195_v20 = vpop.permute.xlu2 %3194  ;;  %v3011_v31 = vunpack.i.l.bf16 %v4403_v53  ;;  %v3092_v5 = vunpack.i.h.bf16 %v5539_v13  ;;  %v3027_v47 = vunpack.i.h.bf16 %v5542_v57 }
 0x132   : > { %v3197_v40 = vunpack.i.h.bf16 %v3195_v20  ;;  %v3196_v61 = vunpack.i.l.bf16 %v3195_v20  ;;  %v3091_v20 = vunpack.i.l.bf16 %v5539_v13 }
 0x133   : > { %v3145_v44 = vpop.permute.xlu1 %3144  ;;  %3364 = vrot.lane.b32.xlu0 %v3363_v45, %s3845_s15 }
 0x134   : > { %v3147_v10 = vunpack.i.h.bf16 %v3145_v44  ;;  %v3146_v24 = vunpack.i.l.bf16 %v3145_v44  ;;  %v4640_v12 = vsel %vm1739_vm2, %v1731_v23, %v3196_v61  ;;  %v4643_v4 = vsel %vm1739_vm2, %v1732_v7, %v3197_v40  ;;  %v5541_v61 = vld [vmem:[#allocation14_spill] sm:$0xff] }
 0x135   : > { %v3155_v41 = vpop.permute.xlu0 %3154  ;;  %v1689_v40 = vsel %vm223_vm0, %v5540_v58, %v3012_v17  ;;  %v1688_v46 = vsel %vm223_vm0, %v5541_v61, %v3011_v31 }
 0x136   : > { %v1744_v18 = vsel %vm1739_vm2, %v1711_v28, %v3146_v24  ;;  %v1745_v54 = vsel %vm1739_vm2, %v1712_v2, %v3147_v10  ;;  %v3157_v48 = vunpack.i.h.bf16 %v3155_v41  ;;  %v3156_v37 = vunpack.i.l.bf16 %v3155_v41  ;;  %v632_v24 = vld [vmem:[#allocation2 + $0x129] sm:$0xff] }
 0x137   : > { %3374 = vrot.lane.b32.xlu2 %v5537_v3, %s3846_s16  ;;  %v5543_v3 = vld [vmem:[#allocation23_spill] sm:$0xff] }
 0x138   : > { %v4653_v36 = vsel %vm1739_vm2, %v4424_v43, %v3157_v48  ;;  %v4657_v50 = vsel %vm1739_vm2, %v4427_v33, %v3156_v37  ;;  %v600_v48 = vld [vmem:[#allocation2 + $0x128] sm:$0xff]  ;;  %v601_v37 = vld [vmem:[#allocation2 + $0x130] sm:$0xff]  ;;  %v3106_v17 = vunpack.i.l.bf16 %v5543_v3 }
 0x139   : > { %3369 = vrot.lane.b32.xlu1 %v5538_v16, %s3847_s17  ;;  %v3210_v8 = vpop.permute.xlu2 %3209  ;;  %v3398_v58 = vpack.i.bf16 %v601_v37, %v600_v48 }
 0x13a   : > { %v3212_v26 = vunpack.i.h.bf16 %v3210_v8  ;;  %v3211_v45 = vunpack.i.l.bf16 %v3210_v8 }
 0x13b   : > { %v3160_v43 = vpop.permute.xlu1 %3159  ;;  %3379 = vrot.lane.b32.xlu0 %v3378_v25, %s3845_s15  ;;  %v3107_v25 = vunpack.i.h.bf16 %v5543_v3 }
 0x13c   : > { %v3162_v14 = vunpack.i.h.bf16 %v3160_v43  ;;  %v3161_v33 = vunpack.i.l.bf16 %v3160_v43  ;;  %v4667_v19 = vsel %vm1739_vm2, %v1737_v52, %v3211_v45  ;;  %v4670_v53 = vsel %vm1739_vm2, %v1738_v29, %v3212_v26  ;;  %v5546_v43 = vld [vmem:[#allocation16_spill] sm:$0xff] }
 0x13d   : > { %v3170_v42 = vpop.permute.xlu0 %3169  ;;  %v1722_v52 = vsel %vm1706_vm1, %v1689_v40, %v3092_v5  ;;  %v1721_v29 = vsel %vm1706_vm1, %v1688_v46, %v3091_v20  ;;  %v5545_v5 = vld [vmem:[#allocation17_spill] sm:$0xff] }
 0x13e   : > { %v1750_v59 = vsel %vm1739_vm2, %v4480_v27, %v3161_v33  ;;  %v1751_v55 = vsel %vm1739_vm2, %v4477_v6, %v3162_v14  ;;  %v3172_v23 = vunpack.i.h.bf16 %v3170_v42  ;;  %v3171_v7 = vunpack.i.l.bf16 %v3170_v42  ;;  %v633_v27 = vld [vmem:[#allocation2 + $0x131] sm:$0xff] }
 0x13f   : > { %3389 = vrot.lane.b32.xlu2 %v5538_v16, %s3844_s14  ;;  %v3026_v6 = vunpack.i.l.bf16 %v5542_v57  ;;  %v5544_v16 = vld [vmem:[#allocation19_spill] sm:$0xff]  ;;  %v3403_v8 = vpack.i.bf16 %v633_v27, %v632_v24  ;;  %v1695_v20 = vsel %vm223_vm0, %v5545_v5, %v3027_v47  ;;  %v593_v57 = vld [vmem:[#allocation2 + $0xb0] sm:$0xff] }
 0x140   : > { %v4685_v44 = vsel %vm1739_vm2, %v1722_v52, %v3172_v23  ;;  %v4688_v10 = vsel %vm1739_vm2, %v1721_v29, %v3171_v7  ;;  %v1728_v42 = vsel %vm1706_vm1, %v1695_v20, %v3107_v25  ;;  %v624_v52 = vld [vmem:[#allocation2 + $0xa9] sm:$0xff]  ;;  %v625_v29 = vld [vmem:[#allocation2 + $0xb1] sm:$0xff] }
 0x141   : > { %3384 = vrot.lane.b32.xlu1 %v4215_v32, %s3847_s17  ;;  %v3225_v2 = vpop.permute.xlu2 %3224  ;;  %v1694_v14 = vsel %vm223_vm0, %v5546_v43, %v3026_v6  ;;  %v592_v27 = vld [vmem:[#allocation2 + $0xa8] sm:$0xff]  ;;  %v5547_v6 = vld [vmem:[#allocation13_spill] sm:$0xff]  ;;  %vm2632_vm0 = vcmask 392192  }
 0x142   : > { %v3227_v28 = vunpack.i.h.bf16 %v3225_v2  ;;  %v3226_v41 = vunpack.i.l.bf16 %v3225_v2  ;;  %v3418_v2 = vpack.i.bf16 %v625_v29, %v624_v52  ;;  %v3413_v25 = vpack.i.bf16 %v593_v57, %v592_v27  ;;  %v603_v5 = vld [vmem:[#allocation2 + $0x150] sm:$0xff]  ;;  %v594_v29 = vld [vmem:[#allocation2 + $0xc8] sm:$0xff] }
 0x143   : > { %v3175_v31 = vpop.permute.xlu1 %3174  ;;  %3394 = vrot.lane.b32.xlu0 %v5544_v16, %s3846_s16  ;;  %v562_v27 = vld [vmem:[#allocation2 + $0xc7] sm:$0xff]  ;;  %v563_v57 = vld [vmem:[#allocation2 + $0xcf] sm:$0xff] }
 0x144   : > { %v3177_v26 = vunpack.i.h.bf16 %v3175_v31  ;;  %v3176_v45 = vunpack.i.l.bf16 %v3175_v31  ;;  %v4699_v13 = vsel %vm1772_vm3, %v1744_v18, %v3226_v41  ;;  %v4702_v32 = vsel %vm1772_vm3, %v1745_v54, %v3227_v28 }
 0x145   : > { %v3185_v33 = vpop.permute.xlu0 %3184  ;;  %v1727_v54 = vsel %vm1706_vm1, %v1694_v14, %v3106_v17  ;;  %vm2641_vm1 = vcmask 457728  }
 0x146   : > { %v1756_v40 = vsel %vm1739_vm2, %v4510_v56, %v3176_v45  ;;  %v1757_v61 = vsel %vm1739_vm2, %v4507_v39, %v3177_v26  ;;  %v3187_v46 = vunpack.i.h.bf16 %v3185_v33  ;;  %v3186_v18 = vunpack.i.l.bf16 %v3185_v33 }
 0x147   : > { %3404 = vrot.lane.b32.xlu2 %v3403_v8, %s3847_s17 }
 0x148   : > { %v4716_v23 = vsel %vm1739_vm2, %v1728_v42, %v3187_v46  ;;  %v4719_v7 = vsel %vm1739_vm2, %v1727_v54, %v3186_v18  ;;  %v635_v18 = vld [vmem:[#allocation2 + $0x151] sm:$0xff] }
 0x149   : > { %3399 = vrot.lane.b32.xlu1 %v3398_v58, %s3845_s15  ;;  %v3240_v56 = vpop.permute.xlu2 %3239 }
 0x14a   : > { %v3242_v39 = vunpack.i.h.bf16 %v3240_v56  ;;  %v3241_v24 = vunpack.i.l.bf16 %v3240_v56  ;;  %v595_v56 = vld [vmem:[#allocation2 + $0xd0] sm:$0xff] }
 0x14b   : > { %v3190_v47 = vpop.permute.xlu1 %3189  ;;  %3409 = vrot.lane.b32.xlu0 %v5547_v6, %s3846_s16 }
 0x14c   : > { %v3192_v28 = vunpack.i.h.bf16 %v3190_v47  ;;  %v3191_v41 = vunpack.i.l.bf16 %v3190_v47  ;;  %v4725_v48 = vsel %vm1772_vm3, %v1750_v59, %v3241_v24  ;;  %v4728_v37 = vsel %vm1772_vm3, %v1751_v55, %v3242_v39  ;;  %v602_v55 = vld [vmem:[#allocation2 + $0x148] sm:$0xff] }
 0x14d   : > { %v3200_v3 = vpop.permute.xlu0 %3199  ;;  %v3433_v14 = vpack.i.bf16 %v603_v5, %v602_v55 }
 0x14e   : > { %v1762_v17 = vsel %vm1739_vm2, %v4543_v60, %v3191_v41  ;;  %v1763_v31 = vsel %vm1739_vm2, %v4540_v22, %v3192_v28  ;;  %v3202_v16 = vunpack.i.h.bf16 %v3200_v3  ;;  %v3201_v26 = vunpack.i.l.bf16 %v3200_v3  ;;  %v626_v41 = vld [vmem:[#allocation2 + $0xc9] sm:$0xff]  ;;  %v627_v3 = vld [vmem:[#allocation2 + $0xd1] sm:$0xff] }
 0x14f   : > { %3419 = vrot.lane.b32.xlu2 %v3418_v2, %s3847_s17 }
 0x150   : > { %v4737_v45 = vsel %vm1739_vm2, %v4463_v15, %v3202_v16  ;;  %v4741_v59 = vsel %vm1739_vm2, %v4466_v11, %v3201_v26  ;;  %v634_v11 = vld [vmem:[#allocation2 + $0x149] sm:$0xff]  ;;  %v3443_v16 = vpack.i.bf16 %v563_v57, %v562_v27 }
 0x151   : > { %3414 = vrot.lane.b32.xlu1 %v3413_v25, %s3845_s15  ;;  %v3255_v60 = vpop.permute.xlu2 %3254 }
 0x152   : > { %v3257_v20 = vunpack.i.h.bf16 %v3255_v60  ;;  %v3256_v43 = vunpack.i.l.bf16 %v3255_v60 }
 0x153   : > { %v3205_v22 = vpop.permute.xlu1 %3204  ;;  %3424 = vrot.lane.b32.xlu0 %v3403_v8, %s3844_s14  ;;  %v3438_v8 = vpack.i.bf16 %v635_v18, %v634_v11 }
 0x154   : > { %v3207_v33 = vunpack.i.h.bf16 %v3205_v22  ;;  %v3206_v58 = vunpack.i.l.bf16 %v3205_v22  ;;  %v4746_v15 = vsel %vm1772_vm3, %v1756_v40, %v3256_v43  ;;  %v4749_v46 = vsel %vm1772_vm3, %v1757_v61, %v3257_v20  ;;  %v5548_v40 = vld [vmem:[#allocation18_spill] sm:$0xff]  ;;  %v545_v43 = vld [vmem:[#allocation2 + $0x1a9] sm:$0xff] }
 0x155   : > { %v4751_v42 = vpop.permute.xlu0 %3214 }
 0x156   : > { %v1768_v54 = vsel %vm1739_vm2, %v4579_v0, %v3206_v58  ;;  %v1769_v52 = vsel %vm1739_vm2, %v4575_v35, %v3207_v33  ;;  %v3448_v0 = vpack.i.bf16 %v595_v56, %v594_v29  ;;  %v572_v29 = vld [vmem:[#allocation2 + $0x167] sm:$0xff]  ;;  %v573_v56 = vld [vmem:[#allocation2 + $0x16f] sm:$0xff]  ;;  %vm2650_vm2 = vcmask 523264  }
 0x157   : > { %3434 = vrot.lane.b32.xlu2 %v3433_v14, %s3845_s15  ;;  %v3468_v57 = vpack.i.bf16 %v573_v56, %v572_v29 }
 0x159   : > { %3429 = vrot.lane.b32.xlu1 %v5548_v40, %s3846_s16  ;;  %v3270_v61 = vpop.permute.xlu2 %3269 }
 0x15a   : > { %v3272_v39 = vunpack.i.h.bf16 %v3270_v61  ;;  %v3271_v24 = vunpack.i.l.bf16 %v3270_v61 }
 0x15b   : > { %v3220_v47 = vpop.permute.xlu1 %3219  ;;  %3439 = vrot.lane.b32.xlu0 %v3438_v8, %s3847_s17 }
 0x15c   : > { %v3222_v6 = vunpack.i.h.bf16 %v3220_v47  ;;  %v3221_v2 = vunpack.i.l.bf16 %v3220_v47  ;;  %v4762_v35 = vsel %vm1772_vm3, %v1762_v17, %v3271_v24  ;;  %v4765_v28 = vsel %vm1772_vm3, %v1763_v31, %v3272_v39  ;;  %v604_v47 = vld [vmem:[#allocation2 + $0x168] sm:$0xff] }
 0x15d   : > { %v3230_v25 = vpop.permute.xlu0 %3229  ;;  %v3453_v17 = vpack.i.bf16 %v627_v3, %v626_v41 }
 0x15e   : > { %v4769_v26 = vsel %vm1772_vm3, %v4619_v49, %v3221_v2  ;;  %v4773_v55 = vsel %vm1772_vm3, %v4622_v9, %v3222_v6  ;;  %v3232_v5 = vunpack.i.h.bf16 %v3230_v25  ;;  %v3231_v60 = vunpack.i.l.bf16 %v3230_v25  ;;  %v546_v49 = vld [vmem:[#allocation2 + $0x1b1] sm:$0xff] }
 0x15f   : > { %3449 = vrot.lane.b32.xlu2 %v3448_v0, %s3845_s15  ;;  %v4786_v58 = vpack.i.bf16 %v546_v49, %v545_v43  ;;  %v605_v0 = vld [vmem:[#allocation2 + $0x170] sm:$0xff] }
 0x160   : > { %v4778_v31 = vsel %vm1772_vm3, %v4527_v38, %v3232_v5  ;;  %v4782_v20 = vsel %vm1772_vm3, %v4530_v34, %v3231_v60  ;;  %v579_v6 = vld [vmem:[#allocation2 + $0x1cf] sm:$0xff]  ;;  %v3478_v41 = vpack.i.bf16 %v605_v0, %v604_v47 }
 0x161   : > { %3444 = vrot.lane.b32.xlu1 %v3443_v16, %s3846_s16  ;;  %v3285_v22 = vpop.permute.xlu2 %3284  ;;  %v611_v16 = vld [vmem:[#allocation2 + $0x1d0] sm:$0xff] }
 0x162   : > { %v3287_v9 = vunpack.i.h.bf16 %v3285_v22  ;;  %v3286_v14 = vunpack.i.l.bf16 %v3285_v22  ;;  %v2866_v22 = vld [vmem:[%s5494_s1 + $0x8] sm:$0xf] }
 0x163   : > { %v3235_v33 = vpop.permute.xlu1 %3234  ;;  %3454 = vrot.lane.b32.xlu0 %v3453_v17, %s3847_s17 }
 0x164   : > { %v3237_v11 = vunpack.i.h.bf16 %v3235_v33  ;;  %v3236_v18 = vunpack.i.l.bf16 %v3235_v33  ;;  %v4789_v38 = vsel %vm1772_vm3, %v1768_v54, %v3286_v14  ;;  %v4792_v34 = vsel %vm1772_vm3, %v1769_v52, %v3287_v9  ;;  %v2908_v9 = vld [vmem:[%s5494_s1 + $0x8] sm:$0x30]  ;;  %v643_v33 = vld [vmem:[#allocation2 + $0x1d1] sm:$0xff] }
 0x165   : > { %v3245_v40 = vpop.permute.xlu0 %3244  ;;  %v642_v14 = vld [vmem:[#allocation2 + $0x1c9] sm:$0xff] }
 0x166   : > { %v1781_v61 = vsel %vm1772_vm3, %v4657_v50, %v3236_v18  ;;  %v1782_v39 = vsel %vm1772_vm3, %v4653_v36, %v3237_v11  ;;  %v3247_v24 = vunpack.i.h.bf16 %v3245_v40  ;;  %v3246_v27 = vunpack.i.l.bf16 %v3245_v40  ;;  %v578_v36 = vld [vmem:[#allocation2 + $0x1c7] sm:$0xff] }
 0x167   : > { %3464 = vrot.lane.b32.xlu2 %v4786_v58, %s3844_s14  ;;  %v3473_v60 = vpack.i.bf16 %v579_v6, %v578_v36  ;;  %v2867_v18 = vor.u32 %v2908_v9, %v2866_v22  ;;  %v636_v40 = vld [vmem:[#allocation2 + $0x169] sm:$0xff]  ;;  %v3493_v47 = vpack.i.bf16 %v643_v33, %v642_v14  ;;  %v629_v22 = vld [vmem:[#allocation2 + $0xf1] sm:$0xff] }
 0x168   : > { %v4802_v54 = vsel %vm1772_vm3, %v4558_v30, %v3246_v27  ;;  %v4806_v52 = vsel %vm1772_vm3, %v4561_v51, %v3247_v24  ;;  %v610_v30 = vld [vmem:[#allocation2 + $0x1c8] sm:$0xff]  ;;  %v637_v24 = vld [vmem:[#allocation2 + $0x171] sm:$0xff]  ;;  %v3848_v27 = vmov 65535  }
 0x169   : > { %3459 = vrot.lane.b32.xlu1 %v3438_v8, %s3844_s14  ;;  %v4809_v50 = vpop.permute.xlu2 %3299  ;;  %v3483_v49 = vpack.i.bf16 %v611_v16, %v610_v30  ;;  %v3488_v30 = vpack.i.bf16 %v637_v24, %v636_v40  ;;  %v596_v14 = vld [vmem:[#allocation2 + $0xe8] sm:$0xff]  ;;  %v597_v33 = vld [vmem:[#allocation2 + $0xf0] sm:$0xff] }
 0x16b   : > { %v3250_v2 = vpop.permute.xlu1 %3249  ;;  %3469 = vrot.lane.b32.xlu0 %v3468_v57, %s3846_s16  ;;  %v2023_v57 = vsel %vm2021_vm4, 4294967295, %v3848_v27  ;;  %vm2784_vm4 = vcmask 122880  }
 0x16c   : > { %v3252_v3 = vunpack.i.h.bf16 %v3250_v2  ;;  %v3251_v25 = vunpack.i.l.bf16 %v3250_v2 }
 0x16d   : > { %v3260_v5 = vpop.permute.xlu0 %3259 }
 0x16e   : > { %v4814_v51 = vsel %vm1772_vm3, %v4688_v10, %v3251_v25  ;;  %v4818_v8 = vsel %vm1772_vm3, %v4685_v44, %v3252_v3  ;;  %v3262_v17 = vunpack.i.h.bf16 %v3260_v5  ;;  %v3261_v43 = vunpack.i.l.bf16 %v3260_v5  ;;  %v565_v3 = vld [vmem:[#allocation2 + $0xef] sm:$0xff] }
 0x16f   : > { %3479 = vrot.lane.b32.xlu2 %v3478_v41, %s3845_s15  ;;  %v564_v41 = vld [vmem:[#allocation2 + $0xe7] sm:$0xff] }
 0x170   : > { %v4829_v10 = vsel %vm1772_vm3, %v4600_v1, %v3261_v43  ;;  %v4833_v44 = vsel %vm1772_vm3, %v4603_v63, %v3262_v17  ;;  %v2024_v63 = vsel %vm2022_vm5, %v2023_v57, 0 }
 0x171   : > { %3474 = vrot.lane.b32.xlu1 %v3473_v60, %s3846_s16  ;;  %v3315_v11 = vpop.permute.xlu2 %3314  ;;  %v2026_v16 = vand.u32 %v2867_v18, %v2024_v63 }
 0x172   : > { %v3317_v29 = vunpack.i.h.bf16 %v3315_v11  ;;  %v3316_v56 = vunpack.i.l.bf16 %v3315_v11 }
 0x173   : > { %v3265_v1 = vpop.permute.xlu1 %3264  ;;  %3484 = vrot.lane.b32.xlu0 %v3483_v49, %s3845_s15  ;;  %2034 = vmatpush.bf16.msra.mxu0 %v2026_v16 }
 0x174   : > { %v3267_v0 = vunpack.i.h.bf16 %v3265_v1  ;;  %v3266_v36 = vunpack.i.l.bf16 %v3265_v1  ;;  %v4838_v6 = vsel %vm1805_vm6, %v1781_v61, %v3316_v56  ;;  %v4841_v2 = vsel %vm1805_vm6, %v1782_v39, %v3317_v29  ;;  %v2907_v39 = vld [vmem:[%s5494_s1] sm:$0xff]  ;;  %2913 = vmatpush.bf16.msra.mxu2 %v2026_v16  ;;  %2914 = vmatpush.bf16.msra.mxu3 %v2026_v16 }
 0x175   : > { %v3275_v25 = vpop.permute.xlu0 %3274  ;;  %v3498_v61 = vpack.i.bf16 %v565_v3, %v564_v41  ;;  %v3503_v56 = vpack.i.bf16 %v597_v33, %v596_v14  ;;  %v580_v3 = vld [vmem:[#allocation2 + $0x1e7] sm:$0xff]  ;;  %v639_v14 = vld [vmem:[#allocation2 + $0x191] sm:$0xff] }
 0x176   : > { %v4845_v5 = vsel %vm1772_vm3, %v4719_v7, %v3266_v36  ;;  %v4849_v60 = vsel %vm1772_vm3, %v4716_v23, %v3267_v0  ;;  %v3277_v17 = vunpack.i.h.bf16 %v3275_v25  ;;  %v3276_v43 = vunpack.i.l.bf16 %v3275_v25  ;;  %v628_v23 = vld [vmem:[#allocation2 + $0xe9] sm:$0xff] }
 0x177   : > { %3494 = vrot.lane.b32.xlu2 %v3493_v47, %s3847_s17  ;;  %v3508_v18 = vpack.i.bf16 %v629_v22, %v628_v23  ;;  %2035 = vmatpush.bf16.msra.mxu0 %v2907_v39  ;;  %v574_v0 = vld [vmem:[#allocation2 + $0x187] sm:$0xff]  ;;  %v575_v36 = vld [vmem:[#allocation2 + $0x18f] sm:$0xff] }
 0x178   : > { %v4857_v49 = vsel %vm1772_vm3, %v4640_v12, %v3276_v43  ;;  %v4861_v7 = vsel %vm1772_vm3, %v4643_v4, %v3277_v17  ;;  %2915 = vmatpush.bf16.msra.mxu2 %v2907_v39  ;;  %2916 = vmatpush.bf16.msra.mxu3 %v2907_v39  ;;  %v3523_v41 = vpack.i.bf16 %v575_v36, %v574_v0  ;;  %v581_v25 = vld [vmem:[#allocation2 + $0x1ef] sm:$0xff] }
 0x179   : > { %3489 = vrot.lane.b32.xlu1 %v3488_v30, %s3847_s17  ;;  %v4864_v9 = vpop.permute.xlu2 %3329  ;;  %v612_v17 = vld [vmem:[#allocation2 + $0x1e8] sm:$0xff]  ;;  %v607_v39 = vld [vmem:[#allocation2 + $0x190] sm:$0xff] }
 0x17a   : > { %v638_v22 = vld [vmem:[#allocation2 + $0x189] sm:$0xff]  ;;  %v645_v0 = vld [vmem:[#allocation2 + $0x1f1] sm:$0xff] }
 0x17b   : > { %v3280_v11 = vpop.permute.xlu1 %3279  ;;  %3499 = vrot.lane.b32.xlu0 %v3498_v61, %s3846_s16  ;;  %v606_v61 = vld [vmem:[#allocation2 + $0x188] sm:$0xff] }
 0x17c   : > { %v3282_v12 = vunpack.i.h.bf16 %v3280_v11  ;;  %v3281_v29 = vunpack.i.l.bf16 %v3280_v11  ;;  %v3533_v11 = vpack.i.bf16 %v607_v39, %v606_v61 }
 0x17d   : > { %v3290_v4 = vpop.permute.xlu0 %3289 }
 0x17e   : > { %v4869_v40 = vsel %vm1772_vm3, %v4741_v59, %v3281_v29  ;;  %v4873_v24 = vsel %vm1772_vm3, %v4737_v45, %v3282_v12  ;;  %v3292_v27 = vunpack.i.h.bf16 %v3290_v4  ;;  %v3291_v57 = vunpack.i.l.bf16 %v3290_v4 }
 0x17f   : > { %3509 = vrot.lane.b32.xlu2 %v3508_v18, %s3847_s17  ;;  %v3217_v29 = vunpack.i.h.bf16 %v4751_v42  ;;  %v3216_v4 = vunpack.i.l.bf16 %v4751_v42 }
 0x180   : > { %v4878_v1 = vsel %vm1772_vm3, %v4667_v19, %v3291_v57  ;;  %v4882_v63 = vsel %vm1772_vm3, %v4670_v53, %v3292_v27  ;;  %v3528_v19 = vpack.i.bf16 %v581_v25, %v580_v3  ;;  %v613_v53 = vld [vmem:[#allocation2 + $0x1f0] sm:$0xff] }
 0x181   : > { %3504 = vrot.lane.b32.xlu1 %v3503_v56, %s3845_s15  ;;  %v4885_v59 = vpop.permute.xlu2 %3344  ;;  %v644_v57 = vld [vmem:[#allocation2 + $0x1e9] sm:$0xff]  ;;  %v1774_v42 = vsel %vm1772_vm3, %v4493_v21, %v3217_v29  ;;  %v1773_v25 = vsel %vm1772_vm3, %v4496_v62, %v3216_v4  ;;  %vm2703_vm3 = vcmask 588800  }
 0x182   : > { %v582_v29 = vld [vmem:[#allocation2 + $0x207] sm:$0xff]  ;;  %v583_v4 = vld [vmem:[#allocation2 + $0x20f] sm:$0xff] }
 0x183   : > { %v3295_v45 = vpop.permute.xlu1 %3294  ;;  %3514 = vrot.lane.b32.xlu0 %v3488_v30, %s3844_s14  ;;  %v3538_v30 = vpack.i.bf16 %v613_v53, %v612_v17  ;;  %v3331_v53 = vunpack.i.l.bf16 %v4864_v9 }
 0x184   : > { %v3297_v36 = vunpack.i.h.bf16 %v3295_v45 }
 0x185   : > { %v4888_v16 = vpop.permute.xlu0 %3304 }
 0x186   : > { %v1807_v21 = vsel %vm1805_vm6, %v1774_v42, %v3297_v36  ;;  %v576_v36 = vld [vmem:[#allocation2 + $0x1a7] sm:$0xff] }
 0x187   : > { %3524 = vrot.lane.b32.xlu2 %v3523_v41, %s3846_s16  ;;  %v3296_v41 = vunpack.i.l.bf16 %v3295_v45  ;;  %v3332_v45 = vunpack.i.h.bf16 %v4864_v9 }
 0x189   : > { %3519 = vrot.lane.b32.xlu1 %v3493_v47, %s3844_s14  ;;  %v4892_v43 = vpop.permute.xlu2 %3359  ;;  %v3543_v47 = vpack.i.bf16 %v639_v14, %v638_v22  ;;  %v1806_v61 = vsel %vm1805_vm6, %v1773_v25, %v3296_v41  ;;  %v577_v41 = vld [vmem:[#allocation2 + $0x1af] sm:$0xff]  ;;  %v3568_v25 = vpack.i.bf16 %v583_v4, %v582_v29 }
 0x18a   : > { %v615_v29 = vld [vmem:[#allocation2 + $0x210] sm:$0xff] }
 0x18b   : > { %v4894_v23 = vpop.permute.xlu1 %3309  ;;  %3529 = vrot.lane.b32.xlu0 %v3528_v19, %s3846_s16 }
 0x18d   : > { %v3320_v33 = vpop.permute.xlu0 %3319 }
 0x18e   : > { %v3322_v18 = vunpack.i.h.bf16 %v3320_v33  ;;  %v3321_v12 = vunpack.i.l.bf16 %v3320_v33 }
 0x18f   : > { %3539 = vrot.lane.b32.xlu2 %v3538_v30, %s3845_s15 }
 0x190   : > { %v4902_v56 = vsel %vm1805_vm6, %v4725_v48, %v3321_v12  ;;  %v4906_v27 = vsel %vm1805_vm6, %v4728_v37, %v3322_v18  ;;  %v3548_v37 = vpack.i.bf16 %v645_v0, %v644_v57  ;;  %v3301_v18 = vunpack.i.l.bf16 %v4809_v50 }
 0x191   : > { %3534 = vrot.lane.b32.xlu1 %v3533_v11, %s3845_s15  ;;  %v4909_v3 = vpop.permute.xlu2 %3374  ;;  %v3302_v57 = vunpack.i.h.bf16 %v4809_v50  ;;  %v609_v50 = vld [vmem:[#allocation2 + $0x1b0] sm:$0xff] }
 0x193   : > { %v3325_v48 = vpop.permute.xlu1 %3324  ;;  %3544 = vrot.lane.b32.xlu0 %v3543_v47, %s3847_s17 }
 0x194   : > { %v3327_v19 = vunpack.i.h.bf16 %v3325_v48  ;;  %v3326_v17 = vunpack.i.l.bf16 %v3325_v48  ;;  %v1808_v48 = vsel %vm1805_vm6, %v4769_v26, %v3301_v18 }
 0x195   : > { %v3335_v39 = vpop.permute.xlu0 %3334 }
 0x196   : > { %v1839_v62 = vsel %vm1838_vm7, %v1806_v61, %v3326_v17  ;;  %v1840_v30 = vsel %vm1838_vm7, %v1807_v21, %v3327_v19  ;;  %v3337_v22 = vunpack.i.h.bf16 %v3335_v39  ;;  %v3336_v14 = vunpack.i.l.bf16 %v3335_v39 }
 0x197   : > { %3554 = vrot.lane.b32.xlu2 %v3543_v47, %s3844_s14  ;;  %v1872_v33 = vsel %vm1871_vm8, %v1839_v62, %v3331_v53  ;;  %v1873_v11 = vsel %vm1871_vm8, %v1840_v30, %v3332_v45  ;;  %v608_v45 = vld [vmem:[#allocation2 + $0x1a8] sm:$0xff]  ;;  %v1809_v53 = vsel %vm1805_vm6, %v4773_v55, %v3302_v57  ;;  %v3347_v61 = vunpack.i.h.bf16 %v4885_v59 }
 0x198   : > { %v1905_v9 = vsel %vm1904_vm9, %v1872_v33, %v3336_v14  ;;  %v1906_v12 = vsel %vm1904_vm9, %v1873_v11, %v3337_v22  ;;  %v3346_v21 = vunpack.i.l.bf16 %v4885_v59  ;;  %v3563_v62 = vpack.i.bf16 %v577_v41, %v576_v36  ;;  %v646_v36 = vld [vmem:[#allocation2 + $0x209] sm:$0xff]  ;;  %v647_v41 = vld [vmem:[#allocation2 + $0x211] sm:$0xff] }
 0x199   : > { %3549 = vrot.lane.b32.xlu1 %v3548_v37, %s3847_s17  ;;  %v4930_v0 = vpop.permute.xlu2 %3389  ;;  %v1937_v47 = vpack.c.bf16 %v1906_v12, %v1905_v9  ;;  %v3573_v26 = vpack.i.bf16 %v609_v50, %v608_v45  ;;  %v614_v12 = vld [vmem:[#allocation2 + $0x208] sm:$0xff]  ;;  %v3362_v45 = vunpack.i.h.bf16 %v4892_v43  ;;  %v3361_v50 = vunpack.i.l.bf16 %v4892_v43 }
 0x19b   : > { %v3340_v42 = vpop.permute.xlu1 %3339  ;;  %3559 = vrot.lane.b32.xlu0 %v3548_v37, %s3844_s14  ;;  %2868 = vmatmul.msk.bf16.vlgmr.msra.gmra.mxu0 %vm1972_vm10, %v1937_v47 }
 0x19c   : > { %v3342_v19 = vunpack.i.h.bf16 %v3340_v42  ;;  %v3341_v17 = vunpack.i.l.bf16 %v3340_v42 }
 0x19d   : > { %v3350_v39 = vpop.permute.xlu0 %3349 }
 0x19e   : > { %v1841_v37 = vsel %vm1838_vm7, %v1808_v48, %v3341_v17  ;;  %v1842_v30 = vsel %vm1838_vm7, %v1809_v53, %v3342_v19  ;;  %v3352_v22 = vunpack.i.h.bf16 %v3350_v39  ;;  %v3351_v14 = vunpack.i.l.bf16 %v3350_v39  ;;  %v584_v53 = vld [vmem:[#allocation2 + $0x227] sm:$0xff] }
 0x19f   : > { %v1874_v33 = vsel %vm1871_vm8, %v1841_v37, %v3346_v21  ;;  %v1875_v11 = vsel %vm1871_vm8, %v1842_v30, %v3347_v61  ;;  %3569 = vrot.lane.b32.xlu2 %v3568_v25, %s3846_s16  ;;  %v3578_v25 = vpack.i.bf16 %v615_v29, %v614_v12  ;;  %v3588_v17 = vpack.i.bf16 %v647_v41, %v646_v36  ;;  %v585_v61 = vld [vmem:[#allocation2 + $0x22f] sm:$0xff] }
 0x1a0   : > { %v1907_v55 = vsel %vm1904_vm9, %v1874_v33, %v3351_v14  ;;  %v1908_v18 = vsel %vm1904_vm9, %v1875_v11, %v3352_v22  ;;  %v616_v22 = vld [vmem:[#allocation2 + $0x228] sm:$0xff]  ;;  %v617_v14 = vld [vmem:[#allocation2 + $0x230] sm:$0xff]  ;;  %v3307_v12 = vunpack.i.h.bf16 %v4888_v16  ;;  %v3306_v29 = vunpack.i.l.bf16 %v4888_v16 }
 0x1a1   : > { %3564 = vrot.lane.b32.xlu1 %v3563_v62, %s3846_s16  ;;  %v4948_v59 = vpop.permute.xlu2 %3404  ;;  %v1938_v9 = vpack.c.bf16 %v1908_v18, %v1907_v55 }
 0x1a2   : > { %v1810_v16 = vsel %vm1805_vm6, %v4699_v13, %v3306_v29 }
 0x1a3   : > { %v3355_v4 = vpop.permute.xlu1 %3354  ;;  %3574 = vrot.lane.b32.xlu0 %v3573_v26, %s3845_s15 }
 0x1a4   : > { %v3357_v57 = vunpack.i.h.bf16 %v3355_v4  ;;  %v3356_v47 = vunpack.i.l.bf16 %v3355_v4 }
 0x1a5   : > { %v3365_v42 = vpop.permute.xlu0 %3364 }
 0x1a6   : > { %v1818_v48 = vsel %vm1805_vm6, %v4802_v54, %v3356_v47  ;;  %v1819_v19 = vsel %vm1805_vm6, %v4806_v52, %v3357_v57  ;;  %v3367_v21 = vunpack.i.h.bf16 %v3365_v42  ;;  %v3366_v39 = vunpack.i.l.bf16 %v3365_v42 }
 0x1a7   : > { %3584 = vrot.lane.b32.xlu2 %v4786_v58, %s3847_s17  ;;  %v1851_v54 = vsel %vm1838_vm7, %v1818_v48, %v3361_v50  ;;  %v1852_v52 = vsel %vm1838_vm7, %v1819_v19, %v3362_v45  ;;  %v3598_v58 = vpack.i.bf16 %v585_v61, %v584_v53  ;;  %v3377_v57 = vunpack.i.h.bf16 %v4909_v3  ;;  %v649_v48 = vld [vmem:[#allocation2 + $0x231] sm:$0xff] }
 0x1a8   : > { %v1884_v26 = vsel %vm1871_vm8, %v1851_v54, %v3366_v39  ;;  %v1885_v33 = vsel %vm1871_vm8, %v1852_v52, %v3367_v21  ;;  %v3376_v47 = vunpack.i.l.bf16 %v4909_v3  ;;  %v1811_v19 = vsel %vm1805_vm6, %v4702_v32, %v3307_v12 }
 0x1a9   : > { %3579 = vrot.lane.b32.xlu1 %v3578_v25, %s3845_s15  ;;  %v4960_v62 = vpop.permute.xlu2 %3419  ;;  %v648_v25 = vld [vmem:[#allocation2 + $0x229] sm:$0xff]  ;;  %v1844_v50 = vsel %vm1838_vm7, %v1811_v19, %v3377_v57 }
 0x1aa   : > { %v1843_v3 = vsel %vm1838_vm7, %v1810_v16, %v3376_v47  ;;  %v3608_v54 = vpack.i.bf16 %v649_v48, %v648_v25 }
 0x1ab   : > { %v3370_v37 = vpop.permute.xlu1 %3369  ;;  %3589 = vrot.lane.b32.xlu0 %v3588_v17, %s3847_s17  ;;  %2869 = vmatmul.msk.bf16.gmra.mxu0 %vm1972_vm10, %v1938_v9  ;;  %v3603_v9 = vpack.i.bf16 %v617_v14, %v616_v22 }
 0x1ac   : > { %v3372_v30 = vunpack.i.h.bf16 %v3370_v37  ;;  %v3371_v43 = vunpack.i.l.bf16 %v3370_v37  ;;  %v3392_v37 = vunpack.i.h.bf16 %v4930_v0 }
 0x1ad   : > { %v3380_v11 = vpop.permute.xlu0 %3379 }
 0x1ae   : > { %v1917_v55 = vsel %vm1904_vm9, %v1884_v26, %v3371_v43  ;;  %v1918_v18 = vsel %vm1904_vm9, %v1885_v33, %v3372_v30  ;;  %v3382_v36 = vunpack.i.h.bf16 %v3380_v11  ;;  %v3381_v41 = vunpack.i.l.bf16 %v3380_v11 }
 0x1af   : > { %v1943_v4 = vpack.c.bf16 %v1918_v18, %v1917_v55  ;;  %3599 = vrot.lane.b32.xlu2 %v3598_v58, %s3846_s16  ;;  %v3391_v58 = vunpack.i.l.bf16 %v4930_v0  ;;  %v1821_v33 = vsel %vm1805_vm6, %v4818_v8, %v3392_v37  ;;  %v3407_v18 = vunpack.i.h.bf16 %v4948_v59  ;;  %s3855_s16 = smov 64  }
 0x1b0   : > { %v1876_v61 = vsel %vm1871_vm8, %v1843_v3, %v3381_v41  ;;  %v1877_v21 = vsel %vm1871_vm8, %v1844_v50, %v3382_v36  ;;  %v3406_v0 = vunpack.i.l.bf16 %v4948_v59  ;;  %v3312_v8 = vunpack.i.h.bf16 %v4894_v23 }
 0x1b1   : > { %3594 = vrot.lane.b32.xlu1 %v3588_v17, %s3844_s14  ;;  %2874 = vmatmul.msk.bf16.vlgmr.msra.gmra.mxu2 %vm1972_vm10, %v1943_v4  ;;  %v4977_v42 = vpop.permute.xlu2 %3434  ;;  %v1820_v26 = vsel %vm1805_vm6, %v4814_v51, %v3391_v58  ;;  %v3311_v36 = vunpack.i.l.bf16 %v4894_v23  ;;  %s3853_s14 = smov 56  }
 0x1b2   : > { %v1813_v19 = vsel %vm1805_vm6, %v4778_v31, %v3312_v8 }
 0x1b3   : > { %v3385_v45 = vpop.permute.xlu1 %3384  ;;  %3604 = vrot.lane.b32.xlu0 %v3603_v9, %s3845_s15  ;;  %v1812_v16 = vsel %vm1805_vm6, %v4782_v20, %v3311_v36  ;;  %s3854_s15 = smov 48  }
 0x1b4   : > { %v3387_v17 = vunpack.i.h.bf16 %v3385_v45  ;;  %v3386_v53 = vunpack.i.l.bf16 %v3385_v45 }
 0x1b5   : > { %v3395_v39 = vpop.permute.xlu0 %3394 }
 0x1b6   : > { %v1909_v13 = vsel %vm1904_vm9, %v1876_v61, %v3386_v53  ;;  %v1910_v52 = vsel %vm1904_vm9, %v1877_v21, %v3387_v17  ;;  %v3397_v30 = vunpack.i.h.bf16 %v3395_v39  ;;  %v3396_v43 = vunpack.i.l.bf16 %v3395_v39 }
 0x1b7   : > { %v1939_v32 = vpack.c.bf16 %v1910_v52, %v1909_v13  ;;  %v3422_v17 = vunpack.i.h.bf16 %v4960_v62  ;;  %v3421_v53 = vunpack.i.l.bf16 %v4960_v62 }
 0x1b8   : > { %v1853_v12 = vsel %vm1838_vm7, %v1820_v26, %v3396_v43  ;;  %v1854_v29 = vsel %vm1838_vm7, %v1821_v33, %v3397_v30  ;;  %v3437_v30 = vunpack.i.h.bf16 %v4977_v42  ;;  %v3436_v43 = vunpack.i.l.bf16 %v4977_v42 }
 0x1b9   : > { %3609 = vrot.lane.b32.xlu1 %v3608_v54, %s3847_s17  ;;  %v4993_v22 = vpop.permute.xlu2 %3449 }
 0x1ba   : > { %v3451_v8 = vunpack.i.l.bf16 %v4993_v22 }
 0x1bb   : > { %v3400_v14 = vpop.permute.xlu1 %3399  ;;  %2870 = vmatmul.msk.bf16.gmra.mxu0 %vm1972_vm10, %v1939_v32 }
 0x1bc   : > { %v3402_v11 = vunpack.i.h.bf16 %v3400_v14  ;;  %v3401_v55 = vunpack.i.l.bf16 %v3400_v14 }
 0x1bd   : > { %v3410_v4 = vpop.permute.xlu0 %3409 }
 0x1be   : > { %v1886_v9 = vsel %vm1871_vm8, %v1853_v12, %v3401_v55  ;;  %v1887_v57 = vsel %vm1871_vm8, %v1854_v29, %v3402_v11  ;;  %v3412_v25 = vunpack.i.h.bf16 %v3410_v4  ;;  %v3411_v59 = vunpack.i.l.bf16 %v3410_v4 }
 0x1bf   : > { %v1919_v51 = vsel %vm1904_vm9, %v1886_v9, %v3406_v0  ;;  %v1920_v47 = vsel %vm1904_vm9, %v1887_v57, %v3407_v18 }
 0x1c0   : > { %v1944_v41 = vpack.c.bf16 %v1920_v47, %v1919_v51  ;;  %v1845_v23 = vsel %vm1838_vm7, %v1812_v16, %v3411_v59  ;;  %v1846_v61 = vsel %vm1838_vm7, %v1813_v19, %v3412_v25  ;;  %v3452_v47 = vunpack.i.h.bf16 %v4993_v22 }
 0x1c1   : > { %v3465_v50 = vpop.permute.xlu2 %3464 }
 0x1c2   : > { %2875 = vmatmul.msk.bf16.gmra.mxu2 %vm1972_vm10, %v1944_v41 }
 0x1c3   : > { %v3415_v48 = vpop.permute.xlu1 %3414 }
 0x1c4   : > { %v3417_v45 = vunpack.i.h.bf16 %v3415_v48  ;;  %v3416_v3 = vunpack.i.l.bf16 %v3415_v48 }
 0x1c5   : > { %v3425_v21 = vpop.permute.xlu0 %3424 }
 0x1c6   : > { %v1878_v39 = vsel %vm1871_vm8, %v1845_v23, %v3416_v3  ;;  %v1879_v54 = vsel %vm1871_vm8, %v1846_v61, %v3417_v45  ;;  %v3427_v52 = vunpack.i.h.bf16 %v3425_v21  ;;  %v3426_v32 = vunpack.i.l.bf16 %v3425_v21 }
 0x1c7   : > { %v1911_v20 = vsel %vm1904_vm9, %v1878_v39, %v3421_v53  ;;  %v1912_v31 = vsel %vm1904_vm9, %v1879_v54, %v3422_v17  ;;  %v3466_v61 = vunpack.i.l.bf16 %v3465_v50 }
 0x1c8   : > { %v1940_v13 = vpack.c.bf16 %v1912_v31, %v1911_v20  ;;  %v1822_v14 = vsel %vm1805_vm6, %v4746_v15, %v3426_v32  ;;  %v1823_v26 = vsel %vm1805_vm6, %v4749_v46, %v3427_v52 }
 0x1c9   : > { %v5032_v18 = vpop.permute.xlu2 %3479  ;;  %v1830_v20 = vsel %vm1805_vm6, %v4857_v49, %v3466_v61 }
 0x1cb   : > { %v3430_v37 = vpop.permute.xlu1 %3429  ;;  %2871 = vmatmul.msk.bf16.gmra.mxu0 %vm1972_vm10, %v1940_v13 }
 0x1cc   : > { %v3432_v62 = vunpack.i.h.bf16 %v3430_v37  ;;  %v3431_v58 = vunpack.i.l.bf16 %v3430_v37 }
 0x1cd   : > { %v3440_v33 = vpop.permute.xlu0 %3439 }
 0x1ce   : > { %v1855_v11 = vsel %vm1838_vm7, %v1822_v14, %v3431_v58  ;;  %v1856_v55 = vsel %vm1838_vm7, %v1823_v26, %v3432_v62  ;;  %v3442_v0 = vunpack.i.h.bf16 %v3440_v33  ;;  %v3441_v12 = vunpack.i.l.bf16 %v3440_v33 }
 0x1cf   : > { %v1888_v29 = vsel %vm1871_vm8, %v1855_v11, %v3436_v43  ;;  %v1889_v4 = vsel %vm1871_vm8, %v1856_v55, %v3437_v30  ;;  %v3482_v55 = vunpack.i.h.bf16 %v5032_v18 }
 0x1d0   : > { %v1921_v42 = vsel %vm1904_vm9, %v1888_v29, %v3441_v12  ;;  %v1922_v15 = vsel %vm1904_vm9, %v1889_v4, %v3442_v0  ;;  %v3481_v0 = vunpack.i.l.bf16 %v5032_v18 }
 0x1d1   : > { %v1945_v9 = vpack.c.bf16 %v1922_v15, %v1921_v42  ;;  %v3495_v45 = vpop.permute.xlu2 %3494 }
 0x1d2   : > { %v3497_v32 = vunpack.i.h.bf16 %v3495_v45  ;;  %v3496_v37 = vunpack.i.l.bf16 %v3495_v45 }
 0x1d3   : > { %v3445_v57 = vpop.permute.xlu1 %3444  ;;  %2876 = vmatmul.msk.bf16.gmra.mxu2 %vm1972_vm10, %v1945_v9 }
 0x1d4   : > { %v3447_v46 = vunpack.i.h.bf16 %v3445_v57  ;;  %v3446_v51 = vunpack.i.l.bf16 %v3445_v57 }
 0x1d5   : > { %v3455_v36 = vpop.permute.xlu0 %3454 }
 0x1d6   : > { %v1847_v41 = vsel %vm1838_vm7, %v4838_v6, %v3446_v51  ;;  %v1848_v25 = vsel %vm1838_vm7, %v4841_v2, %v3447_v46  ;;  %v3457_v59 = vunpack.i.h.bf16 %v3455_v36  ;;  %v3456_v48 = vunpack.i.l.bf16 %v3455_v36 }
 0x1d7   : > { %v1880_v16 = vsel %vm1871_vm8, %v1847_v41, %v3451_v8  ;;  %v1881_v19 = vsel %vm1871_vm8, %v1848_v25, %v3452_v47  ;;  %v3467_v6 = vunpack.i.h.bf16 %v3465_v50 }
 0x1d8   : > { %v1913_v3 = vsel %vm1904_vm9, %v1880_v16, %v3456_v48  ;;  %v1914_v17 = vsel %vm1904_vm9, %v1881_v19, %v3457_v59 }
 0x1d9   : > { %v1941_v53 = vpack.c.bf16 %v1914_v17, %v1913_v3  ;;  %v3510_v21 = vpop.permute.xlu2 %3509  ;;  %v1831_v31 = vsel %vm1805_vm6, %v4861_v7, %v3467_v6 }
 0x1da   : > { %v3512_v19 = vunpack.i.h.bf16 %v3510_v21  ;;  %v3511_v45 = vunpack.i.l.bf16 %v3510_v21 }
 0x1db   : > { %v3460_v22 = vpop.permute.xlu1 %3459  ;;  %2872 = vmatmul.msk.bf16.gmra.mxu0 %vm1972_vm10, %v1941_v53 }
 0x1dc   : > { %v3462_v2 = vunpack.i.h.bf16 %v3460_v22  ;;  %v3461_v39 = vunpack.i.l.bf16 %v3460_v22 }
 0x1dd   : > { %v3470_v23 = vpop.permute.xlu0 %3469 }
 0x1de   : > { %v3472_v62 = vunpack.i.h.bf16 %v3470_v23  ;;  %v3471_v58 = vunpack.i.l.bf16 %v3470_v23  ;;  %v1824_v33 = vsel %vm1805_vm6, %v4829_v10, %v3461_v39  ;;  %v1825_v49 = vsel %vm1805_vm6, %v4833_v44, %v3462_v2 }
 0x1e0   : > { %v1857_v4 = vsel %vm1838_vm7, %v1824_v33, %v3471_v58  ;;  %v1858_v42 = vsel %vm1838_vm7, %v1825_v49, %v3472_v62 }
 0x1e1   : > { %v3525_v9 = vpop.permute.xlu2 %3524  ;;  %v1890_v51 = vsel %vm1871_vm8, %v1857_v4, %v3481_v0  ;;  %v1891_v18 = vsel %vm1871_vm8, %v1858_v42, %v3482_v55 }
 0x1e3   : > { %v3475_v54 = vpop.permute.xlu1 %3474 }
 0x1e4   : > { %v3477_v13 = vunpack.i.h.bf16 %v3475_v54  ;;  %v3476_v52 = vunpack.i.l.bf16 %v3475_v54 }
 0x1e5   : > { %v3485_v30 = vpop.permute.xlu0 %3484 }
 0x1e6   : > { %v1863_v43 = vsel %vm1838_vm7, %v1830_v20, %v3476_v52  ;;  %v1864_v50 = vsel %vm1838_vm7, %v1831_v31, %v3477_v13  ;;  %v3487_v14 = vunpack.i.h.bf16 %v3485_v30  ;;  %v3486_v26 = vunpack.i.l.bf16 %v3485_v30 }
 0x1e7   : > { %v3527_v13 = vunpack.i.h.bf16 %v3525_v9 }
 0x1e8   : > { %v1896_v7 = vsel %vm1871_vm8, %v1863_v43, %v3486_v26  ;;  %v1897_v11 = vsel %vm1871_vm8, %v1864_v50, %v3487_v14 }
 0x1e9   : > { %v1929_v12 = vsel %vm1904_vm9, %v1896_v7, %v3496_v37  ;;  %v1930_v29 = vsel %vm1904_vm9, %v1897_v11, %v3497_v32  ;;  %v3540_v22 = vpop.permute.xlu2 %3539 }
 0x1ea   : > { %v1949_v10 = vpack.c.bf16 %v1930_v29, %v1929_v12  ;;  %v3542_v42 = vunpack.i.h.bf16 %v3540_v22 }
 0x1eb   : > { %v3490_v15 = vpop.permute.xlu1 %3489 }
 0x1ec   : > { %v3492_v44 = vunpack.i.h.bf16 %v3490_v15  ;;  %v3491_v57 = vunpack.i.l.bf16 %v3490_v15  ;;  %2880 = vmatmul.msk.bf16.vlgmr.msra.gmra.mxu3 %vm1972_vm10, %v1949_v10  ;;  %v3541_v10 = vunpack.i.l.bf16 %v3540_v22 }
 0x1ed   : > { %v3500_v46 = vpop.permute.xlu0 %3499 }
 0x1ee   : > { %v1923_v47 = vsel %vm1904_vm9, %v1890_v51, %v3491_v57  ;;  %v1924_v8 = vsel %vm1904_vm9, %v1891_v18, %v3492_v44  ;;  %v3502_v41 = vunpack.i.h.bf16 %v3500_v46  ;;  %v3501_v25 = vunpack.i.l.bf16 %v3500_v46 }
 0x1ef   : > { %v1946_v36 = vpack.c.bf16 %v1924_v8, %v1923_v47 }
 0x1f0   : > { %v1849_v3 = vsel %vm1838_vm7, %v4902_v56, %v3501_v25  ;;  %v1850_v17 = vsel %vm1838_vm7, %v4906_v27, %v3502_v41  ;;  %v3526_v27 = vunpack.i.l.bf16 %v3525_v9 }
 0x1f1   : > { %2877 = vmatmul.msk.bf16.gmra.mxu2 %vm1972_vm10, %v1946_v36  ;;  %v3555_v31 = vpop.permute.xlu2 %3554  ;;  %v5549_v36 = vmov 0.0  }
 0x1f2   : > { %2221 = vst.msk [vmem:[#allocation4] sm:$0xff] %vm2165_vm11, %v5549_v36  ;;  %v3557_v25 = vunpack.i.h.bf16 %v3555_v31 }
 0x1f3   : > { %v3505_v59 = vpop.permute.xlu1 %3504  ;;  %2222 = vst.msk [vmem:[#allocation4 + $0x8] sm:$0xff] %vm2165_vm11, %v5549_v36 }
 0x1f4   : > { %v3507_v48 = vunpack.i.h.bf16 %v3505_v59  ;;  %v3506_v16 = vunpack.i.l.bf16 %v3505_v59  ;;  %v3556_v59 = vunpack.i.l.bf16 %v3555_v31  ;;  %2223 = vst.msk [vmem:[#allocation4 + $0x10] sm:$0xff] %vm2165_vm11, %v5549_v36 }
 0x1f5   : > { %v3515_v53 = vpop.permute.xlu0 %3514  ;;  %2224 = vst.msk [vmem:[#allocation4 + $0x18] sm:$0xff] %vm2165_vm11, %v5549_v36 }
 0x1f6   : > { %v1882_v23 = vsel %vm1871_vm8, %v1849_v3, %v3506_v16  ;;  %v1883_v6 = vsel %vm1871_vm8, %v1850_v17, %v3507_v48  ;;  %v3517_v20 = vunpack.i.h.bf16 %v3515_v53  ;;  %v3516_v56 = vunpack.i.l.bf16 %v3515_v53  ;;  %2225 = vst.msk [vmem:[#allocation4 + $0x20] sm:$0xff] %vm2165_vm11, %v5549_v36 }
 0x1f7   : > { %v1915_v61 = vsel %vm1904_vm9, %v1882_v23, %v3511_v45  ;;  %v1916_v2 = vsel %vm1904_vm9, %v1883_v6, %v3512_v19  ;;  %2226 = vst.msk [vmem:[#allocation4 + $0x28] sm:$0xff] %vm2165_vm11, %v5549_v36  ;;  %v1828_v19 = vsel %vm1805_vm6, %v4762_v35, %v3556_v59  ;;  %v1829_v45 = vsel %vm1805_vm6, %v4765_v28, %v3557_v25 }
 0x1f8   : > { %v1942_v39 = vpack.c.bf16 %v1916_v2, %v1915_v61  ;;  %v1826_v52 = vsel %vm1805_vm6, %v4845_v5, %v3516_v56  ;;  %v1827_v32 = vsel %vm1805_vm6, %v4849_v60, %v3517_v20  ;;  %2227 = vst.msk [vmem:[#allocation4 + $0x30] sm:$0xff] %vm2165_vm11, %v5549_v36 }
 0x1f9   : > { %v1859_v26 = vsel %vm1838_vm7, %v1826_v52, %v3526_v27  ;;  %v1860_v33 = vsel %vm1838_vm7, %v1827_v32, %v3527_v13  ;;  %v5097_v4 = vpop.permute.xlu2 %3569  ;;  %2228 = vst.msk [vmem:[#allocation4 + $0x38] sm:$0xff] %vm2165_vm11, %v5549_v36 }
 0x1fa   : > { %2873 = vmatmul.msk.bf16.gmra.mxu0 %vm1972_vm10, %v1942_v39  ;;  %2229 = vst.msk [vmem:[#allocation4 + $0x40] sm:$0xff] %vm2165_vm11, %v5549_v36  ;;  %v3572_v56 = vunpack.i.h.bf16 %v5097_v4  ;;  %v3571_v31 = vunpack.i.l.bf16 %v5097_v4 }
 0x1fb   : > { %v3520_v21 = vpop.permute.xlu1 %3519  ;;  %2230 = vst.msk [vmem:[#allocation4 + $0x48] sm:$0xff] %vm2165_vm11, %v5549_v36 }
 0x1fc   : > { %v3522_v37 = vunpack.i.h.bf16 %v3520_v21  ;;  %v3521_v62 = vunpack.i.l.bf16 %v3520_v21  ;;  %2231 = vst.msk [vmem:[#allocation4 + $0x50] sm:$0xff] %vm2165_vm11, %v5549_v36 }
 0x1fd   : > { %v3530_v54 = vpop.permute.xlu0 %3529  ;;  %2232 = vst.msk [vmem:[#allocation4 + $0x58] sm:$0xff] %vm2165_vm11, %v5549_v36 }
 0x1fe   : > { %v3532_v50 = vunpack.i.h.bf16 %v3530_v54  ;;  %v3531_v14 = vunpack.i.l.bf16 %v3530_v54  ;;  %v1832_v60 = vsel %vm1805_vm6, %v4869_v40, %v3521_v62  ;;  %v1833_v0 = vsel %vm1805_vm6, %v4873_v24, %v3522_v37  ;;  %2233 = vst.msk [vmem:[#allocation4 + $0x60] sm:$0xff] %vm2165_vm11, %v5549_v36 }
 0x1ff   : > { %2234 = vst.msk [vmem:[#allocation4 + $0x68] sm:$0xff] %vm2165_vm11, %v5549_v36 }
 0x200   : > { %v1865_v9 = vsel %vm1838_vm7, %v1832_v60, %v3531_v14  ;;  %v1866_v44 = vsel %vm1838_vm7, %v1833_v0, %v3532_v50  ;;  %2235 = vst.msk [vmem:[#allocation4 + $0x70] sm:$0xff] %vm2165_vm11, %v5549_v36 }
 0x201   : > { %v1898_v24 = vsel %vm1871_vm8, %v1865_v9, %v3541_v10  ;;  %v1899_v18 = vsel %vm1871_vm8, %v1866_v44, %v3542_v42  ;;  %v3585_v48 = vpop.permute.xlu2 %3584  ;;  %2236 = vst.msk [vmem:[#allocation4 + $0x78] sm:$0xff] %vm2165_vm11, %v5549_v36 }
 0x202   : > { %v3587_v6 = vunpack.i.h.bf16 %v3585_v48  ;;  %v3586_v61 = vunpack.i.l.bf16 %v3585_v48  ;;  %2237 = vst.msk [vmem:[#allocation4 + $0x80] sm:$0xff] %vm2165_vm11, %v5549_v36 }
 0x203   : > { %v3535_v58 = vpop.permute.xlu1 %3534  ;;  %2238 = vst.msk [vmem:[#allocation4 + $0x88] sm:$0xff] %vm2165_vm11, %v5549_v36 }
 0x204   : > { %v3537_v30 = vunpack.i.h.bf16 %v3535_v58  ;;  %v3536_v43 = vunpack.i.l.bf16 %v3535_v58  ;;  %2239 = vst.msk [vmem:[#allocation4 + $0x90] sm:$0xff] %vm2165_vm11, %v5549_v36 }
 0x205   : > { %v3545_v49 = vpop.permute.xlu0 %3544  ;;  %2240 = vst.msk [vmem:[#allocation4 + $0x98] sm:$0xff] %vm2165_vm11, %v5549_v36 }
 0x206   : > { %v1892_v7 = vsel %vm1871_vm8, %v1859_v26, %v3536_v43  ;;  %v1893_v11 = vsel %vm1871_vm8, %v1860_v33, %v3537_v30  ;;  %v3547_v5 = vunpack.i.h.bf16 %v3545_v49  ;;  %v3546_v55 = vunpack.i.l.bf16 %v3545_v49  ;;  %2241 = vst.msk [vmem:[#allocation4 + $0xa0] sm:$0xff] %vm2165_vm11, %v5549_v36 }
 0x207   : > { %2242 = vst.msk [vmem:[#allocation4 + $0xa8] sm:$0xff] %vm2165_vm11, %v5549_v36 }
 0x208   : > { %v1925_v12 = vsel %vm1904_vm9, %v1892_v7, %v3546_v55  ;;  %v1926_v29 = vsel %vm1904_vm9, %v1893_v11, %v3547_v5  ;;  %v5175_v55 = vld [vmem:[%s5495_s2] ss:$0 sm:$0xff]  ;;  %2243 = vst.msk [vmem:[#allocation4 + $0xb0] sm:$0xff] %vm2165_vm11, %v5549_v36 }
 0x209   : > { %v1947_v15 = vpack.c.bf16 %v1926_v29, %v1925_v12  ;;  %v3600_v0 = vpop.permute.xlu2 %3599  ;;  %2244 = vst.msk [vmem:[#allocation4 + $0xb8] sm:$0xff] %vm2165_vm11, %v5549_v36 }
 0x20a   : > { %v3602_v4 = vunpack.i.h.bf16 %v3600_v0  ;;  %v3601_v42 = vunpack.i.l.bf16 %v3600_v0  ;;  %2245 = vst.msk [vmem:[#allocation4 + $0xc0] sm:$0xff] %vm2165_vm11, %v5549_v36 }
 0x20b   : > { %v3550_v57 = vpop.permute.xlu1 %3549  ;;  %2878 = vmatmul.msk.bf16.gmra.mxu2 %vm1972_vm10, %v1947_v15  ;;  %2246 = vst.msk [vmem:[#allocation4 + $0xc8] sm:$0xff] %vm2165_vm11, %v5549_v36 }
 0x20c   : > { %v3552_v40 = vunpack.i.h.bf16 %v3550_v57  ;;  %v3551_v46 = vunpack.i.l.bf16 %v3550_v57  ;;  %2247 = vst.msk [vmem:[#allocation4 + $0xd0] sm:$0xff] %vm2165_vm11, %v5549_v36 }
 0x20d   : > { %v3560_v51 = vpop.permute.xlu0 %3559  ;;  %2248 = vst.msk [vmem:[#allocation4 + $0xd8] sm:$0xff] %vm2165_vm11, %v5549_v36 }
 0x20e   : > { %v1931_v47 = vsel %vm1904_vm9, %v1898_v24, %v3551_v46  ;;  %v1932_v8 = vsel %vm1904_vm9, %v1899_v18, %v3552_v40  ;;  %v3562_v53 = vunpack.i.h.bf16 %v3560_v51  ;;  %v3561_v22 = vunpack.i.l.bf16 %v3560_v51  ;;  %2249 = vst.msk [vmem:[#allocation4 + $0xe0] sm:$0xff] %vm2165_vm11, %v5549_v36 }
 0x20f   : > { %v1950_v41 = vpack.c.bf16 %v1932_v8, %v1931_v47  ;;  %2250 = vst.msk [vmem:[#allocation4 + $0xe8] sm:$0xff] %vm2165_vm11, %v5549_v36 }
 0x210   : > { %v1834_v52 = vsel %vm1805_vm6, %v4789_v38, %v3561_v22  ;;  %v1835_v32 = vsel %vm1805_vm6, %v4792_v34, %v3562_v53 }
 0x211   : > { %2881 = vmatmul.msk.bf16.gmra.mxu3 %vm1972_vm10, %v1950_v41  ;;  %v1867_v38 = vsel %vm1838_vm7, %v1834_v52, %v3571_v31  ;;  %v1868_v43 = vsel %vm1838_vm7, %v1835_v32, %v3572_v56  ;;  %v2276_v31 = vld [vmem:[#allocation4 + $0x9] sm:$0xff] }
 0x213   : > { %v3565_v16 = vpop.permute.xlu1 %3564 }
 0x214   : > { %v3567_v3 = vunpack.i.h.bf16 %v3565_v16  ;;  %v3566_v17 = vunpack.i.l.bf16 %v3565_v16 }
 0x215   : > { %v3575_v23 = vpop.permute.xlu0 %3574 }
 0x216   : > { %v1861_v2 = vsel %vm1838_vm7, %v1828_v19, %v3566_v17  ;;  %v1862_v35 = vsel %vm1838_vm7, %v1829_v45, %v3567_v3  ;;  %v3577_v39 = vunpack.i.h.bf16 %v3575_v23  ;;  %v3576_v21 = vunpack.i.l.bf16 %v3575_v23 }
 0x218   : > { %v1894_v28 = vsel %vm1871_vm8, %v1861_v2, %v3576_v21  ;;  %v1895_v54 = vsel %vm1871_vm8, %v1862_v35, %v3577_v39  ;;  %v2037_v20 = vpop.f32.mrf.mxu0 }
 0x219   : > { %v1927_v13 = vsel %vm1904_vm9, %v1894_v28, %v3586_v61  ;;  %v1928_v27 = vsel %vm1904_vm9, %v1895_v54, %v3587_v6  ;;  %v2038_v15 = vadd.f32 %v5175_v55, %v2037_v20 }
 0x21a   : > { %v1948_v37 = vpack.c.bf16 %v1928_v27, %v1927_v13  ;;  %v2268_v13 = vld [vmem:[#allocation4 + $0x8] sm:$0xff] }
 0x21b   : > { %v3580_v62 = vpop.permute.xlu1 %3579 }
 0x21c   : > { %v3582_v58 = vunpack.i.h.bf16 %v3580_v62  ;;  %v3581_v30 = vunpack.i.l.bf16 %v3580_v62  ;;  %2879 = vmatmul.msk.bf16.gmra.mxu2 %vm1972_vm10, %v1948_v37 }
 0x21d   : > { %v3590_v34 = vpop.permute.xlu0 %3589 }
 0x21e   : > { %v1900_v50 = vsel %vm1871_vm8, %v1867_v38, %v3581_v30  ;;  %v1901_v14 = vsel %vm1871_vm8, %v1868_v43, %v3582_v58  ;;  %v3592_v26 = vunpack.i.h.bf16 %v3590_v34  ;;  %v3591_v33 = vunpack.i.l.bf16 %v3590_v34 }
 0x220   : > { %v2039_v49 = vpop.f32.mrf.mxu0  ;;  %v1933_v7 = vsel %vm1904_vm9, %v1900_v50, %v3591_v33  ;;  %v1934_v11 = vsel %vm1904_vm9, %v1901_v14, %v3592_v26 }
 0x221   : > { %v1951_v5 = vpack.c.bf16 %v1934_v11, %v1933_v7  ;;  %v2040_v45 = vadd.f32 %v5175_v55, %v2039_v49 }
 0x223   : > { %v3595_v60 = vpop.permute.xlu1 %3594  ;;  %2882 = vmatmul.msk.bf16.gmra.mxu3 %vm1972_vm10, %v1951_v5  ;;  %v2118_v53 = vmax.f32 %v2040_v45, 0.0 }
 0x224   : > { %v3597_v12 = vunpack.i.h.bf16 %v3595_v60  ;;  %v3596_v29 = vunpack.i.l.bf16 %v3595_v60 }
 0x225   : > { %v3605_v10 = vpop.permute.xlu0 %3604 }
 0x226   : > { %v1836_v9 = vsel %vm1805_vm6, %v4878_v1, %v3596_v29  ;;  %v1837_v44 = vsel %vm1805_vm6, %v4882_v63, %v3597_v12  ;;  %v3607_v40 = vunpack.i.h.bf16 %v3605_v10  ;;  %v3606_v46 = vunpack.i.l.bf16 %v3605_v10 }
 0x227   : > { %v1869_v24 = vsel %vm1838_vm7, %v1836_v9, %v3601_v42  ;;  %v1870_v1 = vsel %vm1838_vm7, %v1837_v44, %v3602_v4  ;;  %v2117_v63 = vmax.f32 %v2038_v15, 0.0 }
 0x228   : > { %v2042_v57 = vpop.f32.mrf.mxu0  ;;  %v1902_v25 = vsel %vm1871_vm8, %v1869_v24, %v3606_v46  ;;  %v1903_v59 = vsel %vm1871_vm8, %v1870_v1, %v3607_v40 }
 0x229   : > { %v2043_v51 = vadd.f32 %v5175_v55, %v2042_v57 }
 0x22b   : > { %v2119_v18 = vmax.f32 %v2043_v51, 0.0  ;;  %v3610_v47 = vpop.permute.xlu1 %3609 }
 0x22c   : > { %v3612_v8 = vunpack.i.h.bf16 %v3610_v47  ;;  %v3611_v41 = vunpack.i.l.bf16 %v3610_v47 }
 0x22d   : > { %v2149_v48 = vmax.f32 %v2117_v63, %v2119_v18 }
 0x22e   : > { %v1935_v16 = vsel %vm1904_vm9, %v1902_v25, %v3611_v41  ;;  %v1936_v19 = vsel %vm1904_vm9, %v1903_v59, %v3612_v8 }
 0x22f   : > { %2166 = vst.msk [vmem:[#allocation3] sm:$0xff] %vm2165_vm11, %v2149_v48  ;;  %v1952_v3 = vpack.c.bf16 %v1936_v19, %v1935_v16 }
 0x230   : > { %v2044_v17 = vpop.f32.mrf.mxu0 }
 0x231   : > { %v2045_v36 = vadd.f32 %v5175_v55, %v2044_v17 }
 0x233   : > { %v2120_v22 = vmax.f32 %v2045_v36, 0.0  ;;  %2883 = vmatmul.msk.bf16.gmra.mxu3 %vm1972_vm10, %v1952_v3 }
 0x234   : > { %v2067_v23 = vpop.f32.mrf.mxu2 }
 0x235   : > { %v2150_v6 = vmax.f32 %v2118_v53, %v2120_v22  ;;  %v2068_v54 = vadd.f32 %v5175_v55, %v2067_v23 }
 0x237   : > { %2167 = vst.msk [vmem:[#allocation3 + $0x8] sm:$0xff] %vm2165_vm11, %v2150_v6  ;;  %v2129_v52 = vmax.f32 %v2068_v54, 0.0 }
 0x238   : > { %v2047_v61 = vpop.f32.mrf.mxu0 }
 0x239   : > { %v2048_v27 = vadd.f32 %v5175_v55, %v2047_v61 }
 0x23b   : > { %v2121_v50 = vmax.f32 %v2048_v27, 0.0 }
 0x23c   : > { %v2069_v2 = vpop.f32.mrf.mxu2 }
 0x23d   : > { %v2070_v26 = vadd.f32 %v5175_v55, %v2069_v2 }
 0x23e   : > { %v2182_v35 = vld [vmem:[#allocation3] ss:$2 sm:$0xff]  ;;  %v2198_v39 = vld [vmem:[#allocation3 + $0x1] ss:$2 sm:$0xff] }
 0x23f   : > { %v2213_v21 = vmax.f32 %v2182_v35, %v2198_v39  ;;  %v2130_v5 = vmax.f32 %v2070_v26, 0.0 }
 0x240   : > { %v2049_v28 = vpop.f32.mrf.mxu0 }
 0x241   : > { %2252 = vst.msk [vmem:[#allocation4 + $0x20] sm:$0xff] %vm2165_vm11, %v2213_v21  ;;  %v2050_v11 = vadd.f32 %v5175_v55, %v2049_v28 }
 0x243   : > { %v2122_v4 = vmax.f32 %v2050_v11, 0.0 }
 0x245   : > { %v2072_v20 = vpop.f32.mrf.mxu2 }
 0x246   : > { %v2073_v56 = vadd.f32 %v5175_v55, %v2072_v20 }
 0x248   : > { %v2131_v32 = vmax.f32 %v2073_v56, 0.0  ;;  %v2052_v37 = vpop.f32.mrf.mxu0  ;;  %v2277_v62 = vld [vmem:[#allocation4 + $0x21] sm:$0xff] }
 0x249   : > { %v2269_v58 = vld [vmem:[#allocation4 + $0x20] sm:$0xff]  ;;  %v2053_v30 = vadd.f32 %v5175_v55, %v2052_v37  ;;  %v3618_v38 = vpack.i.bf16 %v2277_v62, %v2276_v31 }
 0x24a   : > { %v3613_v43 = vpack.i.bf16 %v2269_v58, %v2268_v13  ;;  %v2155_v34 = vmax.f32 %v2129_v52, %v2131_v32  ;;  %v5230_v1 = vld [vmem:[#allocation4 + $0x1f] sm:$0xff] }
 0x24b   : > { %v2123_v14 = vmax.f32 %v2053_v30, 0.0  ;;  %3619 = vrot.lane.b32.xlu0 %v3618_v38, %s3849_s10 }
 0x24c   : > { %3614 = vrot.lane.b32.xlu2 %v3613_v43, %s3850_s11  ;;  %2172 = vst.msk [vmem:[#allocation3 + $0x30] sm:$0xff] %vm2165_vm11, %v2155_v34 }
 0x24d   : > { %v2151_v33 = vmax.f32 %v2121_v50, %v2123_v14  ;;  %v2074_v49 = vpop.f32.mrf.mxu2 }
 0x24e   : > { %v2075_v7 = vadd.f32 %v5175_v55, %v2074_v49 }
 0x24f   : > { %2168 = vst.msk [vmem:[#allocation3 + $0x10] sm:$0xff] %vm2165_vm11, %v2151_v33 }
 0x250   : > { %v2132_v60 = vmax.f32 %v2075_v7, 0.0  ;;  %v2054_v0 = vpop.f32.mrf.mxu0 }
 0x251   : > { %v2055_v12 = vadd.f32 %v5175_v55, %v2054_v0 }
 0x252   : > { %v2156_v29 = vmax.f32 %v2130_v5, %v2132_v60 }
 0x253   : > { %v2124_v42 = vmax.f32 %v2055_v12, 0.0 }
 0x254   : > { %2173 = vst.msk [vmem:[#allocation3 + $0x38] sm:$0xff] %vm2165_vm11, %v2156_v29 }
 0x255   : > { %v2152_v10 = vmax.f32 %v2122_v4, %v2124_v42 }
 0x256   : > { %v2077_v51 = vpop.f32.mrf.mxu2 }
 0x257   : > { %2169 = vst.msk [vmem:[#allocation3 + $0x18] sm:$0xff] %vm2165_vm11, %v2152_v10  ;;  %v2078_v16 = vadd.f32 %v5175_v55, %v2077_v51 }
 0x258   : > { %v2057_v24 = vpop.f32.mrf.mxu0 }
 0x259   : > { %v2058_v3 = vadd.f32 %v5175_v55, %v2057_v24  ;;  %v2133_v17 = vmax.f32 %v2078_v16, 0.0 }
 0x25b   : > { %v2188_v15 = vld [vmem:[#allocation3 + $0x30] ss:$2 sm:$0xff]  ;;  %v2204_v9 = vld [vmem:[#allocation3 + $0x31] ss:$2 sm:$0xff]  ;;  %v2125_v6 = vmax.f32 %v2058_v3, 0.0 }
 0x25c   : > { %v2216_v44 = vmax.f32 %v2188_v15, %v2204_v9 }
 0x25e   : > { %2255 = vst.msk [vmem:[#allocation4 + $0x68] sm:$0xff] %vm2165_vm11, %v2216_v44  ;;  %v2184_v57 = vld [vmem:[#allocation3 + $0x10] ss:$2 sm:$0xff]  ;;  %v2200_v40 = vld [vmem:[#allocation3 + $0x11] ss:$2 sm:$0xff]  ;;  %v2079_v59 = vpop.f32.mrf.mxu2 }
 0x25f   : > { %v2214_v46 = vmax.f32 %v2184_v57, %v2200_v40  ;;  %v2080_v2 = vadd.f32 %v5175_v55, %v2079_v59 }
 0x260   : > { %v2059_v48 = vpop.f32.mrf.mxu0 }
 0x261   : > { %2253 = vst.msk [vmem:[#allocation4 + $0x38] sm:$0xff] %vm2165_vm11, %v2214_v46  ;;  %v2060_v28 = vadd.f32 %v5175_v55, %v2059_v48  ;;  %v2134_v54 = vmax.f32 %v2080_v2, 0.0 }
 0x263   : > { %v2126_v27 = vmax.f32 %v2060_v28, 0.0 }
 0x265   : > { %v5260_v33 = vld [vmem:[#allocation4 + $0x68] sm:$0xff] }
 0x266   : > { %v5262_v49 = vld [vmem:[#allocation4 + $0x67] sm:$0xff] }
 0x267   : > { %v5264_v7 = vld [vmem:[#allocation4 + $0x69] sm:$0xff] }
 0x268   : > { %v5232_v63 = vld [vmem:[#allocation4 + $0x37] sm:$0xff] }
 0x269   : > { %v5234_v18 = vld [vmem:[#allocation4 + $0x39] sm:$0xff]  ;;  %v3623_v8 = vpack.i.bf16 %v5232_v63, %v5230_v1 }
 0x26a   : > { %v5236_v47 = vld [vmem:[#allocation4 + $0x38] sm:$0xff]  ;;  %v3633_v41 = vpack.i.bf16 %v5234_v18, %v2277_v62 }
 0x26b   : > { %v3628_v25 = vpack.i.bf16 %v5236_v47, %v2269_v58  ;;  %3624 = vrot.lane.b32.xlu1 %v3623_v8, %s3847_s17 }
 0x26c   : > { %3634 = vrot.lane.b32.xlu0 %v3633_v41, %s3851_s12 }
 0x26d   : > { %3629 = vrot.lane.b32.xlu2 %v3628_v25, %s3852_s13 }
 0x26f   : > { %v2097_v52 = vpop.f32.mrf.mxu3 }
 0x270   : > { %v2098_v26 = vadd.f32 %v5175_v55, %v2097_v52 }
 0x272   : > { %v2141_v15 = vmax.f32 %v2098_v26, 0.0 }
 0x274   : > { %v2082_v19 = vpop.f32.mrf.mxu2 }
 0x275   : > { %v2083_v45 = vadd.f32 %v5175_v55, %v2082_v19 }
 0x277   : > { %v2135_v36 = vmax.f32 %v2083_v45, 0.0  ;;  %v2062_v53 = vpop.f32.mrf.mxu0  ;;  %v2099_v38 = vpop.f32.mrf.mxu3 }
 0x278   : > { %v2063_v22 = vadd.f32 %v5175_v55, %v2062_v53  ;;  %v2100_v46 = vadd.f32 %v5175_v55, %v2099_v38 }
 0x279   : > { %v2157_v23 = vmax.f32 %v2133_v17, %v2135_v36 }
 0x27a   : > { %v2127_v61 = vmax.f32 %v2063_v22, 0.0  ;;  %v2142_v16 = vmax.f32 %v2100_v46, 0.0 }
 0x27b   : > { %2174 = vst.msk [vmem:[#allocation3 + $0x40] sm:$0xff] %vm2165_vm11, %v2157_v23 }
 0x27c   : > { %v2153_v35 = vmax.f32 %v2125_v6, %v2127_v61  ;;  %v2084_v39 = vpop.f32.mrf.mxu2 }
 0x27d   : > { %v2085_v21 = vadd.f32 %v5175_v55, %v2084_v39 }
 0x27e   : > { %2170 = vst.msk [vmem:[#allocation3 + $0x20] sm:$0xff] %vm2165_vm11, %v2153_v35 }
 0x27f   : > { %v2136_v20 = vmax.f32 %v2085_v21, 0.0  ;;  %v2064_v56 = vpop.f32.mrf.mxu0 }
 0x280   : > { %v2065_v31 = vadd.f32 %v5175_v55, %v2064_v56 }
 0x281   : > { %v2158_v13 = vmax.f32 %v2134_v54, %v2136_v20 }
 0x282   : > { %v2128_v32 = vmax.f32 %v2065_v31, 0.0 }
 0x283   : > { %2175 = vst.msk [vmem:[#allocation3 + $0x48] sm:$0xff] %vm2165_vm11, %v2158_v13 }
 0x284   : > { %v2154_v37 = vmax.f32 %v2126_v27, %v2128_v32 }
 0x286   : > { %2171 = vst.msk [vmem:[#allocation3 + $0x28] sm:$0xff] %vm2165_vm11, %v2154_v37 }
 0x28a   : > { %v2190_v62 = vld [vmem:[#allocation3 + $0x40] ss:$2 sm:$0xff]  ;;  %v2206_v58 = vld [vmem:[#allocation3 + $0x41] ss:$2 sm:$0xff] }
 0x28b   : > { %v2217_v30 = vmax.f32 %v2190_v62, %v2206_v58 }
 0x28d   : > { %2256 = vst.msk [vmem:[#allocation4 + $0x80] sm:$0xff] %vm2165_vm11, %v2217_v30  ;;  %v2186_v43 = vld [vmem:[#allocation3 + $0x20] ss:$2 sm:$0xff]  ;;  %v2202_v34 = vld [vmem:[#allocation3 + $0x21] ss:$2 sm:$0xff] }
 0x28e   : > { %v2215_v50 = vmax.f32 %v2186_v43, %v2202_v34  ;;  %v2087_v14 = vpop.f32.mrf.mxu2 }
 0x28f   : > { %v2088_v59 = vadd.f32 %v5175_v55, %v2087_v14 }
 0x290   : > { %2254 = vst.msk [vmem:[#allocation4 + $0x50] sm:$0xff] %vm2165_vm11, %v2215_v50 }
 0x291   : > { %v2137_v36 = vmax.f32 %v2088_v59, 0.0 }
 0x294   : > { %v2102_v11 = vpop.f32.mrf.mxu3  ;;  %v5266_v5 = vld [vmem:[#allocation4 + $0x80] sm:$0xff] }
 0x295   : > { %v5268_v60 = vld [vmem:[#allocation4 + $0x7f] sm:$0xff]  ;;  %v2103_v12 = vadd.f32 %v5175_v55, %v2102_v11  ;;  %v3643_v29 = vpack.i.bf16 %v5266_v5, %v5260_v33 }
 0x296   : > { %v5270_v0 = vld [vmem:[#allocation4 + $0x81] sm:$0xff]  ;;  %v3638_v4 = vpack.i.bf16 %v5268_v60, %v5262_v49  ;;  %v2089_v10 = vpop.f32.mrf.mxu2 }
 0x297   : > { %v5279_v42 = vpack.i.bf16 %v5270_v0, %v5264_v7  ;;  %v2143_v9 = vmax.f32 %v2103_v12, 0.0  ;;  %3644 = vrot.lane.b32.xlu1 %v3643_v29, %s3853_s14  ;;  %v5285_v57 = vld [vmem:[#allocation4 + $0x4f] sm:$0xff]  ;;  %v2090_v22 = vadd.f32 %v5175_v55, %v2089_v10 }
 0x298   : > { %3639 = vrot.lane.b32.xlu0 %v3638_v4, %s3854_s15  ;;  %v2326_v40 = vld [vmem:[#allocation4 + $0x51] sm:$0xff]  ;;  %v3653_v41 = vpack.i.bf16 %v5285_v57, %v5232_v63 }
 0x299   : > { %3649 = vrot.lane.b32.xlu2 %v5279_v42, %s3855_s16  ;;  %v2161_v44 = vmax.f32 %v2141_v15, %v2143_v9  ;;  %v2318_v51 = vld [vmem:[#allocation4 + $0x50] sm:$0xff]  ;;  %v3663_v25 = vpack.i.bf16 %v2326_v40, %v5234_v18  ;;  %v2138_v2 = vmax.f32 %v2090_v22, 0.0  ;;  %v3698_v31 = vpack.i.bf16 %v5264_v7, %v2326_v40  ;;  %v2912_v22 = vld [vmem:[%s5496_s3 + $0x18] sm:$0xff] }
 0x29a   : > { %v3658_v48 = vpack.i.bf16 %v2318_v51, %v5236_v47  ;;  %v3678_v47 = vpack.i.bf16 %v5262_v49, %v5285_v57  ;;  %v3688_v20 = vpack.i.bf16 %v5260_v33, %v2318_v51 }
 0x29b   : > { %2178 = vst.msk [vmem:[#allocation3 + $0x60] sm:$0xff] %vm2165_vm11, %v2161_v44 }
 0x29c   : > { %v2104_v24 = vpop.f32.mrf.mxu3 }
 0x29d   : > { %v2105_v8 = vadd.f32 %v5175_v55, %v2104_v24 }
 0x29f   : > { %v2144_v19 = vmax.f32 %v2105_v8, 0.0  ;;  %v2092_v45 = vpop.f32.mrf.mxu2  ;;  %3654 = vrot.lane.b32.xlu1 %v3653_v41, %s3854_s15 }
 0x2a0   : > { %3664 = vrot.lane.b32.xlu0 %v3663_v25, %s3855_s16  ;;  %v2093_v3 = vadd.f32 %v5175_v55, %v2092_v45 }
 0x2a1   : > { %3659 = vrot.lane.b32.xlu2 %v3658_v48, %s3853_s14  ;;  %v2162_v17 = vmax.f32 %v2142_v16, %v2144_v19  ;;  %v2332_v16 = vld [vmem:[#allocation4 + $0xe1] sm:$0xff] }
 0x2a2   : > { %v2139_v53 = vmax.f32 %v2093_v3, 0.0  ;;  %v2324_v19 = vld [vmem:[#allocation4 + $0xe0] sm:$0xff] }
 0x2a3   : > { %2179 = vst.msk [vmem:[#allocation3 + $0x68] sm:$0xff] %vm2165_vm11, %v2162_v17 }
 0x2a4   : > { %v2159_v18 = vmax.f32 %v2137_v36, %v2139_v53  ;;  %v2671_v36 = vld [vmem:[%s5496_s3 + $0x20] sm:$0xf] }
 0x2a5   : > { %v2693_v53 = vunpack.c.l.b16 %v2671_v36 }
 0x2a6   : > { %2176 = vst.msk [vmem:[#allocation3 + $0x50] sm:$0xff] %vm2165_vm11, %v2159_v18  ;;  %v2107_v23 = vpop.f32.mrf.mxu3 }
 0x2a7   : > { %v2094_v6 = vpop.f32.mrf.mxu2  ;;  %3669 = vrot.lane.b32.xlu1 %v3658_v48, %s3850_s11  ;;  %v2108_v13 = vadd.f32 %v5175_v55, %v2107_v23  ;;  %v2316_v48 = vld [vmem:[#allocation4 + $0xdf] sm:$0xff]  ;;  %v2698_v18 = vpack.c.b16 %v2693_v53, %v2693_v53  ;;  %v2911_v23 = vld [vmem:[%s5496_s3 + $0x10] sm:$0xff] }
 0x2a8   : > { %3679 = vrot.lane.b32.xlu0 %v3678_v47, %s3847_s17  ;;  %v2095_v61 = vadd.f32 %v5175_v55, %v2094_v6  ;;  %v3615_v6 = vpop.permute.xlu2 %3614 }
 0x2a9   : > { %3674 = vrot.lane.b32.xlu2 %v3663_v25, %s3849_s10  ;;  %v2145_v58 = vmax.f32 %v2108_v13, 0.0  ;;  %v2718_v47 = vsel %vm2716_vm12, %v2698_v18, 0 }
 0x2aa   : > { %v2194_v35 = vld [vmem:[#allocation3 + $0x60] ss:$2 sm:$0xff]  ;;  %v2210_v39 = vld [vmem:[#allocation3 + $0x61] ss:$2 sm:$0xff]  ;;  %v2140_v21 = vmax.f32 %v2095_v61, 0.0  ;;  %2723 = vmatpush.bf16.msra.mxu1 %v2718_v47 }
 0x2ab   : > { %v2219_v28 = vmax.f32 %v2194_v35, %v2210_v39  ;;  %v2910_v61 = vld [vmem:[%s5496_s3 + $0x8] sm:$0xff] }
 0x2ac   : > { %v2160_v54 = vmax.f32 %v2138_v2, %v2140_v21  ;;  %v2909_v2 = vld [vmem:[%s5496_s3] sm:$0xff] }
 0x2ad   : > { %2258 = vst.msk [vmem:[#allocation4 + $0xb0] sm:$0xff] %vm2165_vm11, %v2219_v28 }
 0x2ae   : > { %2177 = vst.msk [vmem:[#allocation3 + $0x58] sm:$0xff] %vm2165_vm11, %v2160_v54  ;;  %v2109_v56 = vpop.f32.mrf.mxu3  ;;  %2724 = vmatpush.bf16.msra.mxu1 %v2912_v22 }
 0x2af   : > { %3689 = vrot.lane.b32.xlu1 %v3688_v20, %s3852_s13  ;;  %v2110_v43 = vadd.f32 %v5175_v55, %v2109_v56  ;;  %v3616_v20 = vunpack.i.l.bf16 %v3615_v6  ;;  %v2260_v56 = vld [vmem:[#allocation4 + $0x7] sm:$0xff] }
 0x2b0   : > { %3684 = vrot.lane.b32.xlu0 %v3643_v29, %s3850_s11 }
 0x2b1   : > { %3699 = vrot.lane.b32.xlu2 %v3698_v31, %s3851_s12  ;;  %v2146_v12 = vmax.f32 %v2110_v43, 0.0  ;;  %v3617_v31 = vunpack.i.h.bf16 %v3615_v6 }
 0x2b2   : > { %2725 = vmatpush.bf16.msra.mxu1 %v2911_v23 }
 0x2b4   : > { %v2322_v10 = vld [vmem:[#allocation4 + $0xb0] sm:$0xff] }
 0x2b5   : > { %v2192_v27 = vld [vmem:[#allocation3 + $0x50] ss:$2 sm:$0xff]  ;;  %v2208_v52 = vld [vmem:[#allocation3 + $0x51] ss:$2 sm:$0xff] }
 0x2b6   : > { %v2218_v32 = vmax.f32 %v2192_v27, %v2208_v52  ;;  %v2112_v37 = vpop.f32.mrf.mxu3  ;;  %v5333_v9 = vld [vmem:[#allocation4 + $0xaf] sm:$0xff]  ;;  %2726 = vmatpush.bf16.msra.mxu1 %v2910_v61 }
 0x2b7   : > { %v2113_v62 = vadd.f32 %v5175_v55, %v2112_v37  ;;  %3694 = vrot.lane.b32.xlu1 %v5279_v42, %s3849_s10 }
 0x2b8   : > { %2257 = vst.msk [vmem:[#allocation4 + $0x98] sm:$0xff] %vm2165_vm11, %v2218_v32 }
 0x2b9   : > { %v2147_v30 = vmax.f32 %v2113_v62, 0.0 }
 0x2ba   : > { %2727 = vmatpush.bf16.msra.mxu1 %v2909_v2 }
 0x2bb   : > { %v2163_v38 = vmax.f32 %v2145_v58, %v2147_v30  ;;  %v2589_v58 = vsel %vm2165_vm11, %v2260_v56, %v3616_v20  ;;  %v2590_v30 = vsel %vm2165_vm11, %v5230_v1, %v3617_v31 }
 0x2bd   : > { %2180 = vst.msk [vmem:[#allocation3 + $0x70] sm:$0xff] %vm2165_vm11, %v2163_v38  ;;  %v3620_v35 = vpop.permute.xlu0 %3619 }
 0x2be   : > { %v2114_v34 = vpop.f32.mrf.mxu3  ;;  %v3621_v13 = vunpack.i.l.bf16 %v3620_v35  ;;  %v3622_v27 = vunpack.i.h.bf16 %v3620_v35 }
 0x2bf   : > { %v2115_v50 = vadd.f32 %v5175_v55, %v2114_v34  ;;  %v2305_v14 = vld [vmem:[#allocation4 + $0x99] sm:$0xff]  ;;  %v2330_v55 = vld [vmem:[#allocation4 + $0xb1] sm:$0xff] }
 0x2c0   : > { %v2297_v26 = vld [vmem:[#allocation4 + $0x98] sm:$0xff]  ;;  %v3713_v7 = vpack.i.bf16 %v2305_v14, %v5270_v0  ;;  %v3728_v15 = vpack.i.bf16 %v2330_v55, %v2305_v14  ;;  %v2598_v38 = vsel %vm2597_vm13, %v2589_v58, %v3621_v13  ;;  %v2599_v43 = vsel %vm2597_vm13, %v2590_v30, %v3622_v27 }
 0x2c1   : > { %v5323_v33 = vld [vmem:[#allocation4 + $0x97] sm:$0xff]  ;;  %v3708_v11 = vpack.i.bf16 %v2297_v26, %v5266_v5  ;;  %v2148_v29 = vmax.f32 %v2115_v50, 0.0  ;;  %v3723_v0 = vpack.i.bf16 %v2322_v10, %v2297_v26 }
 0x2c2   : > { %v3703_v4 = vpack.i.bf16 %v5323_v33, %v5268_v60  ;;  %3714 = vrot.lane.b32.xlu1 %v3713_v7, %s3851_s12  ;;  %v3718_v5 = vpack.i.bf16 %v5333_v9, %v5323_v33 }
 0x2c3   : > { %3709 = vrot.lane.b32.xlu0 %v3708_v11, %s3852_s13  ;;  %v2164_v42 = vmax.f32 %v2146_v12, %v2148_v29 }
 0x2c4   : > { %3704 = vrot.lane.b32.xlu2 %v3703_v4, %s3847_s17 }
 0x2c5   : > { %2181 = vst.msk [vmem:[#allocation3 + $0x78] sm:$0xff] %vm2165_vm11, %v2164_v42 }
 0x2c7   : > { %v3630_v39 = vpop.permute.xlu2 %3629 }
 0x2c8   : > { %v3631_v14 = vunpack.i.l.bf16 %v3630_v39  ;;  %v3632_v7 = vunpack.i.h.bf16 %v3630_v39 }
 0x2ca   : > { %3729 = vrot.lane.b32.xlu1 %v3728_v15, %s3855_s16 }
 0x2cb   : > { %3724 = vrot.lane.b32.xlu0 %v3723_v0, %s3853_s14 }
 0x2cc   : > { %3719 = vrot.lane.b32.xlu2 %v3718_v5, %s3854_s15  ;;  %v2196_v44 = vld [vmem:[#allocation3 + $0x70] ss:$2 sm:$0xff]  ;;  %v2212_v40 = vld [vmem:[#allocation3 + $0x71] ss:$2 sm:$0xff] }
 0x2cd   : > { %v2220_v46 = vmax.f32 %v2196_v44, %v2212_v40 }
 0x2cf   : > { %2259 = vst.msk [vmem:[#allocation4 + $0xc8] sm:$0xff] %vm2165_vm11, %v2220_v46 }
 0x2d3   : > { %3739 = vrot.lane.b32.xlu0 %v3728_v15, %s3849_s10 }
 0x2d4   : > { %3734 = vrot.lane.b32.xlu2 %v3723_v0, %s3850_s11 }
 0x2d6   : > { %v2291_v51 = vld [vmem:[#allocation4 + $0xc7] sm:$0xff] }
 0x2d7   : > { %v2307_v24 = vld [vmem:[#allocation4 + $0xc9] sm:$0xff]  ;;  %v3743_v41 = vpack.i.bf16 %v2291_v51, %v5333_v9  ;;  %v3758_v45 = vpack.i.bf16 %v2316_v48, %v2291_v51 }
 0x2d8   : > { %v2299_v8 = vld [vmem:[#allocation4 + $0xc8] sm:$0xff]  ;;  %v3753_v25 = vpack.i.bf16 %v2307_v24, %v2330_v55  ;;  %v3768_v3 = vpack.i.bf16 %v2332_v16, %v2307_v24 }
 0x2d9   : > { %v3748_v59 = vpack.i.bf16 %v2299_v8, %v2322_v10  ;;  %3744 = vrot.lane.b32.xlu1 %v3743_v41, %s3847_s17  ;;  %v3763_v17 = vpack.i.bf16 %v2324_v19, %v2299_v8 }
 0x2db   : > { %3754 = vrot.lane.b32.xlu0 %v3753_v25, %s3851_s12 }
 0x2dc   : > { %3749 = vrot.lane.b32.xlu2 %v3748_v59, %s3852_s13  ;;  %s215_s13 = sand.u32 1, %s3829_s19  }
 0x2dd   : > { %v3625_v21 = vpop.permute.xlu1 %3624  ;;  %s216_s23 = scalar_lea.vmem [#allocation6], %s215_s13  ;;  %s2787_s26 = scalar_lea.sflag [#allocation7], %s215_s13 }
 0x2de   : > { %v3635_v28 = vpop.permute.xlu0 %3634  ;;  %v3626_v52 = vunpack.i.l.bf16 %v3625_v21  ;;  %v3627_v32 = vunpack.i.h.bf16 %v3625_v21  ;;  %s2797_s25 = sshll.u32 %s216_s23, 4  ;;  %s2798_s25 = int_to_ptr.vmem [resolvable:$true] %s2797_s25 }
 0x2df   : > { %v3636_v12 = vunpack.i.l.bf16 %v3635_v28  ;;  %v3637_v4 = vunpack.i.h.bf16 %v3635_v28 }
 0x2e0   : > { %v2606_v34 = vsel %vm1904_vm9, %v2598_v38, %v3626_v52  ;;  %v2607_v26 = vsel %vm1904_vm9, %v2599_v43, %v3627_v32 }
 0x2e1   : > { %3759 = vrot.lane.b32.xlu1 %v3758_v45, %s3854_s15  ;;  %v2615_v11 = vsel %vm2614_vm14, %v2606_v34, %v3631_v14  ;;  %v2616_v29 = vsel %vm2614_vm14, %v2607_v26, %v3632_v7 }
 0x2e2   : > { %v2624_v55 = vsel %vm2623_vm15, %v2615_v11, %v3636_v12  ;;  %v2625_v0 = vsel %vm2623_vm15, %v2616_v29, %v3637_v4 }
 0x2e3   : > { %3769 = vrot.lane.b32.xlu0 %v3768_v3, %s3855_s16  ;;  %s2795_s16 = scalar_lea.hbm %s5498_s5, %s3907_s22 }
 0x2e4   : > { %3764 = vrot.lane.b32.xlu2 %v3763_v17, %s3853_s14  ;;  %s2799_s17 = sshll.u32 %s2795_s16, 4  ;;  %s2800_s17 = int_to_ptr.hbm [resolvable:$true] %s2799_s17 }
 0x2e5   : > { %s3789_s30 = sshra.s32 %s2800_s17, 4  ;;  %s3790_s30 = int_to_ptr.hbm [resolvable:$true] %s3789_s30 }
 0x2e6   : > { %s3791_s6 = scalar_lea.hbm %s3790_s30, 1  ;;  %p3796_p0 = scmp.lt.s32.totalorder %s3790_s30, %s5498_s5 }
 0x2e7   : > { %p3792_p11 = scmp.ne.s32.totalorder %s3790_s30, %s3791_s6  ;;  %p3797_p1 = scmp.lt.s32.totalorder %s3795_s8, %s3791_s6 }
 0x2e9   : > { %p3793_p12 = pnand %p3792_p11, %p3924_p5  ;;  %p3798_p2 = por %p3797_p1, %p3796_p0 }
 0x2eb   : > { %p3794_p13 = pneg %p3793_p12 }
 0x2ed   : > { %p3799_p3 = pnand %p3798_p2, %p3794_p13 }
 0x2f3   : > { %v5365_v54 = vpop.permute.xlu2 %3649 }
 0x2f4   : > { %v3652_v38 = vunpack.i.h.bf16 %v5365_v54  ;;  %v3651_v43 = vunpack.i.l.bf16 %v5365_v54 }
 0x2fb   : > { %v3660_v50 = vpop.permute.xlu2 %3659 }
 0x2fc   : > { %v3662_v5 = vunpack.i.h.bf16 %v3660_v50  ;;  %v3661_v44 = vunpack.i.l.bf16 %v3660_v50 }
 0x303   : > { %v3675_v25 = vpop.permute.xlu2 %3674 }
 0x304   : > { %v3677_v53 = vunpack.i.h.bf16 %v3675_v25  ;;  %v3676_v18 = vunpack.i.l.bf16 %v3675_v25 }
 0x309   : > { %v5367_v37 = vpop.permute.xlu1 %3644 }
 0x30a   : > { %v5369_v62 = vpop.permute.xlu0 %3639  ;;  %v3647_v52 = vunpack.i.h.bf16 %v5367_v37  ;;  %v3646_v32 = vunpack.i.l.bf16 %v5367_v37 }
 0x30b   : > { %v3700_v22 = vpop.permute.xlu2 %3699  ;;  %v3641_v31 = vunpack.i.l.bf16 %v5369_v62 }
 0x30c   : > { %v3702_v28 = vunpack.i.h.bf16 %v3700_v22  ;;  %v3701_v20 = vunpack.i.l.bf16 %v3700_v22 }
 0x311   : > { %v3655_v1 = vpop.permute.xlu1 %3654 }
 0x312   : > { %v3665_v42 = vpop.permute.xlu0 %3664  ;;  %v3657_v10 = vunpack.i.h.bf16 %v3655_v1  ;;  %v3656_v15 = vunpack.i.l.bf16 %v3655_v1 }
 0x313   : > { %v3667_v51 = vunpack.i.h.bf16 %v3665_v42  ;;  %v3666_v24 = vunpack.i.l.bf16 %v3665_v42 }
 0x314   : > { %v2633_v40 = vsel %vm2632_vm0, %v2624_v55, %v3656_v15  ;;  %v2634_v46 = vsel %vm2632_vm0, %v2625_v0, %v3657_v10 }
 0x315   : > { %v2642_v8 = vsel %vm2641_vm1, %v2633_v40, %v3661_v44  ;;  %v2643_v41 = vsel %vm2641_vm1, %v2634_v46, %v3662_v5 }
 0x316   : > { %v2651_v59 = vsel %vm2650_vm2, %v2642_v8, %v3666_v24  ;;  %v2652_v48 = vsel %vm2650_vm2, %v2643_v41, %v3667_v51 }
 0x317   : > { %v2659_v16 = vpack.c.bf16 %v2652_v48, %v2651_v59 }
 0x319   : > { %v3670_v19 = vpop.permute.xlu1 %3669  ;;  %2900 = vmatmul.msk.bf16.vlgmr.msra.gmra.mxu1 %vm2703_vm3, %v2659_v16 }
 0x31a   : > { %v3672_v45 = vunpack.i.h.bf16 %v3670_v19  ;;  %v3671_v3 = vunpack.i.l.bf16 %v3670_v19  ;;  %v3680_v47 = vpop.permute.xlu0 %3679 }
 0x31b   : > { %v3682_v61 = vunpack.i.h.bf16 %v3680_v47  ;;  %v3681_v2 = vunpack.i.l.bf16 %v3680_v47 }
 0x31c   : > { %v2592_v17 = vsel %vm2165_vm11, %v5285_v57, %v3672_v45  ;;  %v2591_v36 = vsel %vm2165_vm11, %v5232_v63, %v3671_v3  ;;  %v3642_v63 = vunpack.i.h.bf16 %v5369_v62 }
 0x31d   : > { %v2600_v23 = vsel %vm2597_vm13, %v2591_v36, %v3676_v18  ;;  %v2601_v6 = vsel %vm2597_vm13, %v2592_v17, %v3677_v53 }
 0x31e   : > { %v2608_v57 = vsel %vm1904_vm9, %v2600_v23, %v3681_v2  ;;  %v2609_v56 = vsel %vm1904_vm9, %v2601_v6, %v3682_v61  ;;  %v3705_v7 = vpop.permute.xlu2 %3704 }
 0x31f   : > { %v3707_v46 = vunpack.i.h.bf16 %v3705_v7  ;;  %v3706_v51 = vunpack.i.l.bf16 %v3705_v7 }
 0x321   : > { %v3690_v35 = vpop.permute.xlu1 %3689 }
 0x322   : > { %v3692_v39 = vunpack.i.h.bf16 %v3690_v35  ;;  %v3691_v21 = vunpack.i.l.bf16 %v3690_v35  ;;  %v3685_v12 = vpop.permute.xlu0 %3684 }
 0x323   : > { %v3687_v4 = vunpack.i.h.bf16 %v3685_v12  ;;  %v3686_v54 = vunpack.i.l.bf16 %v3685_v12 }
 0x324   : > { %v2617_v13 = vsel %vm2614_vm14, %v2608_v57, %v3691_v21  ;;  %v2618_v27 = vsel %vm2614_vm14, %v2609_v56, %v3692_v39 }
 0x325   : > { %v2626_v58 = vsel %vm2623_vm15, %v2617_v13, %v3701_v20  ;;  %v2627_v30 = vsel %vm2623_vm15, %v2618_v27, %v3702_v28  ;;  %v2594_v55 = vsel %vm2165_vm11, %v5268_v60, %v3687_v4  ;;  %v2593_v10 = vsel %vm2165_vm11, %v5262_v49, %v3686_v54 }
 0x326   : > { %v2635_v34 = vsel %vm2632_vm0, %v2626_v58, %v3641_v31  ;;  %v2636_v62 = vsel %vm2632_vm0, %v2627_v30, %v3642_v63  ;;  %v3720_v15 = vpop.permute.xlu2 %3719 }
 0x327   : > { %v2644_v50 = vsel %vm2641_vm1, %v2635_v34, %v3646_v32  ;;  %v2645_v14 = vsel %vm2641_vm1, %v2636_v62, %v3647_v52  ;;  %v3722_v45 = vunpack.i.h.bf16 %v3720_v15  ;;  %v3721_v3 = vunpack.i.l.bf16 %v3720_v15 }
 0x328   : > { %v2653_v26 = vsel %vm2650_vm2, %v2644_v50, %v3651_v43  ;;  %v2654_v37 = vsel %vm2650_vm2, %v2645_v14, %v3652_v38 }
 0x329   : > { %v2660_v11 = vpack.c.bf16 %v2654_v37, %v2653_v26  ;;  %v3695_v29 = vpop.permute.xlu1 %3694 }
 0x32a   : > { %v3697_v1 = vunpack.i.h.bf16 %v3695_v29  ;;  %v3696_v42 = vunpack.i.l.bf16 %v3695_v29 }
 0x32b   : > { %2901 = vmatmul.msk.bf16.gmra.mxu1 %vm2703_vm3, %v2660_v11 }
 0x32c   : > { %v2602_v0 = vsel %vm2597_vm13, %v2593_v10, %v3696_v42  ;;  %v2603_v5 = vsel %vm2597_vm13, %v2594_v55, %v3697_v1 }
 0x32d   : > { %v2610_v59 = vsel %vm1904_vm9, %v2602_v0, %v3706_v51  ;;  %v2611_v60 = vsel %vm1904_vm9, %v2603_v5, %v3707_v46 }
 0x32e   : > { %v3735_v53 = vpop.permute.xlu2 %3734 }
 0x32f   : > { %v3737_v56 = vunpack.i.h.bf16 %v3735_v53  ;;  %v3736_v63 = vunpack.i.l.bf16 %v3735_v53 }
 0x331   : > { %v2596_v30 = vsel %vm2165_vm11, %v5333_v9, %v3737_v56  ;;  %v2595_v38 = vsel %vm2165_vm11, %v5323_v33, %v3736_v63 }
 0x334   : > { %v3715_v44 = vpop.permute.xlu1 %3714 }
 0x335   : > { %v3710_v40 = vpop.permute.xlu0 %3709  ;;  %v3717_v41 = vunpack.i.h.bf16 %v3715_v44  ;;  %v3716_v25 = vunpack.i.l.bf16 %v3715_v44 }
 0x336   : > { %v3712_v24 = vunpack.i.h.bf16 %v3710_v40  ;;  %v3711_v8 = vunpack.i.l.bf16 %v3710_v40  ;;  %v3750_v57 = vpop.permute.xlu2 %3749 }
 0x337   : > { %v3752_v14 = vunpack.i.h.bf16 %v3750_v57  ;;  %v3751_v26 = vunpack.i.l.bf16 %v3750_v57 }
 0x338   : > { %v2619_v48 = vsel %vm2614_vm14, %v2610_v59, %v3711_v8  ;;  %v2620_v49 = vsel %vm2614_vm14, %v2611_v60, %v3712_v24 }
 0x339   : > { %v2628_v16 = vsel %vm2623_vm15, %v2619_v48, %v3716_v25  ;;  %v2629_v19 = vsel %vm2623_vm15, %v2620_v49, %v3717_v41  ;;  %v3774_v25 = vld [vmem:[%s5497_s4] ss:$0 sm:$0xff] }
 0x33a   : > { %v2637_v6 = vsel %vm2632_vm0, %v2628_v16, %v3721_v3  ;;  %v2638_v61 = vsel %vm2632_vm0, %v2629_v19, %v3722_v45 }
 0x33c   : > { %v3730_v17 = vpop.permute.xlu1 %3729 }
 0x33d   : > { %v3725_v36 = vpop.permute.xlu0 %3724  ;;  %v3732_v18 = vunpack.i.h.bf16 %v3730_v17  ;;  %v3731_v47 = vunpack.i.l.bf16 %v3730_v17 }
 0x33e   : > { %v3727_v22 = vunpack.i.h.bf16 %v3725_v36  ;;  %v3726_v23 = vunpack.i.l.bf16 %v3725_v36  ;;  %v3765_v37 = vpop.permute.xlu2 %3764 }
 0x33f   : > { %v3767_v4 = vunpack.i.h.bf16 %v3765_v37  ;;  %v3766_v33 = vunpack.i.l.bf16 %v3765_v37 }
 0x340   : > { %v2646_v2 = vsel %vm2641_vm1, %v2637_v6, %v3726_v23  ;;  %v2647_v35 = vsel %vm2641_vm1, %v2638_v61, %v3727_v22 }
 0x341   : > { %v2655_v39 = vsel %vm2650_vm2, %v2646_v2, %v3731_v47  ;;  %v2656_v21 = vsel %vm2650_vm2, %v2647_v35, %v3732_v18 }
 0x342   : > { %v2661_v28 = vpack.c.bf16 %v2656_v21, %v2655_v39 }
 0x344   : > { %2902 = vmatmul.msk.bf16.gmra.mxu1 %vm2703_vm3, %v2661_v28 }
 0x345   : > { %v3740_v20 = vpop.permute.xlu0 %3739 }
 0x346   : > { %v3742_v31 = vunpack.i.h.bf16 %v3740_v20  ;;  %v3741_v13 = vunpack.i.l.bf16 %v3740_v20 }
 0x348   : > { %v2604_v43 = vsel %vm2597_vm13, %v2595_v38, %v3741_v13  ;;  %v2605_v34 = vsel %vm2597_vm13, %v2596_v30, %v3742_v31 }
 0x34b   : > { %v3745_v27 = vpop.permute.xlu1 %3744 }
 0x34c   : > { %v3747_v52 = vunpack.i.h.bf16 %v3745_v27  ;;  %v3746_v32 = vunpack.i.l.bf16 %v3745_v27 }
 0x34d   : > { %v3755_v58 = vpop.permute.xlu0 %3754 }
 0x34e   : > { %v2612_v62 = vsel %vm1904_vm9, %v2604_v43, %v3746_v32  ;;  %v2613_v50 = vsel %vm1904_vm9, %v2605_v34, %v3747_v52  ;;  %v3757_v7 = vunpack.i.h.bf16 %v3755_v58  ;;  %v3756_v11 = vunpack.i.l.bf16 %v3755_v58 }
 0x34f   : > { %v2621_v12 = vsel %vm2614_vm14, %v2612_v62, %v3751_v26  ;;  %v2622_v9 = vsel %vm2614_vm14, %v2613_v50, %v3752_v14 }
 0x350   : > { %v2630_v55 = vsel %vm2623_vm15, %v2621_v12, %v3756_v11  ;;  %v2631_v10 = vsel %vm2623_vm15, %v2622_v9, %v3757_v7 }
 0x353   : > { %v3760_v29 = vpop.permute.xlu1 %3759 }
 0x354   : > { %v3762_v54 = vunpack.i.h.bf16 %v3760_v29  ;;  %v3761_v1 = vunpack.i.l.bf16 %v3760_v29 }
 0x355   : > { %v3770_v42 = vpop.permute.xlu0 %3769 }
 0x356   : > { %v3772_v15 = vunpack.i.h.bf16 %v3770_v42  ;;  %v3771_v0 = vunpack.i.l.bf16 %v3770_v42  ;;  %v2639_v5 = vsel %vm2632_vm0, %v2630_v55, %v3761_v1  ;;  %v2640_v44 = vsel %vm2632_vm0, %v2631_v10, %v3762_v54 }
 0x357   : > { %v2648_v40 = vsel %vm2641_vm1, %v2639_v5, %v3766_v33  ;;  %v2649_v46 = vsel %vm2641_vm1, %v2640_v44, %v3767_v4 }
 0x358   : > { %v2657_v51 = vsel %vm2650_vm2, %v2648_v40, %v3771_v0  ;;  %v2658_v24 = vsel %vm2650_vm2, %v2649_v46, %v3772_v15 }
 0x359   : > { %v2662_v8 = vpack.c.bf16 %v2658_v24, %v2657_v51 }
 0x35b   : > { %2903 = vmatmul.msk.bf16.gmra.mxu1 %vm2703_vm3, %v2662_v8 }
 0x396   : > { %v2729_v41 = vpop.f32.mrf.mxu1 }
 0x397   : > { %v2730_v59 = vadd.f32 %v3774_v25, %v2729_v41 }
 0x399   : > { %v2749_v49 = vmax.f32 %v2730_v59, 0.0 }
 0x39e   : > { %v2731_v60 = vpop.f32.mrf.mxu1 }
 0x39f   : > { %v2732_v48 = vadd.f32 %v3774_v25, %v2731_v60 }
 0x3a1   : > { %v2750_v16 = vmax.f32 %v2732_v48, 0.0 }
 0x3a3   : > { %v2757_v19 = vmax.f32 %v2749_v49, %v2750_v16 }
 0x3a5   : > { %2761 = vst.msk [vmem:[#allocation5] sm:$0xff] %vm2597_vm13, %v2757_v19 }
 0x3a8   : > { %v2734_v45 = vpop.f32.mrf.mxu1 }
 0x3a9   : > { %v2735_v3 = vadd.f32 %v3774_v25, %v2734_v45 }
 0x3ab   : > { %v2751_v53 = vmax.f32 %v2735_v3, 0.0 }
 0x3b0   : > { %v2736_v17 = vpop.f32.mrf.mxu1 }
 0x3b1   : > { %v2737_v36 = vadd.f32 %v3774_v25, %v2736_v17 }
 0x3b3   : > { %v2752_v18 = vmax.f32 %v2737_v36, 0.0 }
 0x3b5   : > { %v2758_v47 = vmax.f32 %v2751_v53, %v2752_v18 }
 0x3b7   : > { %2762 = vst.msk [vmem:[#allocation5 + $0x8] sm:$0xff] %vm2597_vm13, %v2758_v47 }
 0x3be   : > { %v2765_v13 = vld [vmem:[#allocation5] ss:$2 sm:$0xff]  ;;  %v2769_v27 = vld [vmem:[#allocation5 + $0x1] ss:$2 sm:$0xff] }
 0x3bf   : > { %v2772_v52 = vmax.f32 %v2765_v13, %v2769_v27 }
 0x3c1   : > { %v2739_v22 = vpop.f32.mrf.mxu1  ;;  %v2774_v38 = vsel %vm2597_vm13, %v2772_v52, 0.0 }
 0x3c2   : > { %v2740_v23 = vadd.f32 %v3774_v25, %v2739_v22 }
 0x3c4   : > { %v2753_v2 = vmax.f32 %v2740_v23, 0.0 }
 0x3c9   : > { %v2741_v6 = vpop.f32.mrf.mxu1 }
 0x3ca   : > { %v2742_v61 = vadd.f32 %v3774_v25, %v2741_v6 }
 0x3cc   : > { %v2754_v35 = vmax.f32 %v2742_v61, 0.0 }
 0x3ce   : > { %v2759_v39 = vmax.f32 %v2753_v2, %v2754_v35 }
 0x3d0   : > { %2763 = vst.msk [vmem:[#allocation5 + $0x10] sm:$0xff] %vm2597_vm13, %v2759_v39 }
 0x3d8   : > { %v2744_v21 = vpop.f32.mrf.mxu1 }
 0x3d9   : > { %v2745_v28 = vadd.f32 %v3774_v25, %v2744_v21 }
 0x3db   : > { %v2755_v56 = vmax.f32 %v2745_v28, 0.0 }
 0x3e0   : > { %v2746_v20 = vpop.f32.mrf.mxu1 }
 0x3e1   : > { %v2747_v57 = vadd.f32 %v3774_v25, %v2746_v20 }
 0x3e3   : > { %v2756_v63 = vmax.f32 %v2747_v57, 0.0 }
 0x3e5   : > { %v2760_v31 = vmax.f32 %v2755_v56, %v2756_v63 }
 0x3e7   : > { %2764 = vst.msk [vmem:[#allocation5 + $0x18] sm:$0xff] %vm2597_vm13, %v2760_v31 }
 0x3ee   : > { %v2767_v32 = vld [vmem:[#allocation5 + $0x10] ss:$2 sm:$0xff]  ;;  %v2771_v58 = vld [vmem:[#allocation5 + $0x11] ss:$2 sm:$0xff] }
 0x3ef   : > { %v2773_v30 = vmax.f32 %v2767_v32, %v2771_v58 }
 0x3f1   : > { %v2775_v43 = vsel %vm2597_vm13, %v2773_v30, 0.0 }
 0x3f2   : > { %v2776_v34 = vadd.f32 %v2775_v43, %v2774_v38 }
 0x3f4   : > { %v2777_v62 = vrot.slane %v2776_v34, 4 }
 0x3f6   : > { %v2778_v50 = vadd.f32 %v2777_v62, %v2776_v34 }
 0x3f8   : > { %v2779_v14 = vrot.slane %v2778_v50, 2 }
 0x3fa   : > { %v2780_v26 = vadd.f32 %v2779_v14, %v2778_v50 }
 0x3fc   : > { %v2781_v37 = vrot.slane %v2780_v26, 1 }
 0x3fe   : > { %v2782_v7 = vadd.f32 %v2781_v37, %v2780_v26 }
 0x400   : > { %v2783_v11 = vmul.f32 0.0625, %v2782_v7 }
 0x402   : > { %2785 = vst.msk [vmem:[%s216_s23] sm:$0x1] %vm2784_vm4, %v2783_v11 }
 0x403   : > { %3802 = shalt.err (!%p3799_p3)
}
 0x404   : > { %2917 = dma.vmem_to_hbm [thread:$0]  (%p3924_p5), %s2798_s25, 16, %s2800_s17, %s2787_s26  }
 0x405 PF: > { %p2923_p4 = scmp.ge.s32.totalorder %s3837_s21, 2  ;;  %s2811_s11 = sand.u32 1, %s3825_s18  }
 0x406   : > { %s2812_s12 = scalar_lea.sflag [#allocation7], %s2811_s11 }
 0x407   : > { %p2920_p7 = pnand %p2923_p4, %p3928_p6 }
 0x409   : > { %p2921_p8 = pneg %p2920_p7 }
 0x40b   : > { %3820 = dma.done.wait (%p2921_p8), %s2812_s12, 16  }
 0x40c   : > { %3822 = vsyncadd (%p2921_p8), %s2812_s12, 4294967280  ;;  %p15_p9 = scmp.ge.s32.totalorder %s3911_s24, 4   ;;  %s5550_s18 = smov %s3829_s19 }
 0x40d   : > { %s5551_s19 = smov %s3833_s20  ;;  %s5552_s20 = smov %s3922_s27 }
 0x40e   : > { %s5553_s21 = smov %s3911_s24  ;;  %17 = sbr.rel (!%p15_p9) target bundleno = 3 (0x3), region = 97 }
 0x413   :  { %2817 = vsyncpa [#allocation7], 1 }
 0x414   :  { %2819 = vsyncpa [#allocation7 + $0x1], 1 }

</bundles_post_ra>
